<compile_context>
chip_gen: v5e
topology: v5e:2x2
jax: 0.10.0
libtpu: 0.0.40
codegen_flags: <defaults>
</compile_context>

<pallas_src>
import functools

import numpy as np
import jax
import jax.numpy as jnp
from jax.experimental import pallas as pl
from jax.experimental.pallas import tpu as pltpu


def _round_up(x, m):
    return ((x + m - 1) // m) * m


# --------------------------------------------------------------------------
# Pallas kernel: one row tile (R groups of (v,n), each with Z genome copies)
# of the full BlockMLP forward.
# --------------------------------------------------------------------------
def block_mlp_kernel(x_ref, w1_ref, b1_ref, pw1_ref, pb1_ref,
                     w2_ref, b2_ref, pw2_ref, pb2_ref,
                     hw_ref, hb_ref, out_ref, *, rows, z, nbp, hdim, ncp):
    # ---- first-layer blocks: bf16 MXU matmul against the packed block-diag
    #      weight (columns h-major: col = h*NBp + block), f32 accumulation ----
    # TODO(synk): for realistic L_total, grid over first-layer blocks with
    # scalar-prefetched column offsets (PrefetchScalarGridSpec) and stream W1
    # block columns as double-buffered bf16 tiles instead of this dense
    # block-diagonal W1 (removes ~NBx wasted MXU FLOPs / VMEM residency).
    h1 = jnp.dot(x_ref[...], w1_ref[...],
                 preferred_element_type=jnp.float32) + b1_ref[...]
    h1 = jnp.maximum(h1, 0.0)                               # (rows*z, hdim*nbp)

    # ---- per-block H->1 projection + ReLU: lane-aligned (nbp % 128 == 0)
    #      reshape + reduce over H (XLU slot) instead of a serial VALU chain --
    h1r = h1.reshape(rows * z, hdim, nbp)
    ys = jnp.sum(h1r * pw1_ref[...][None, :, :], axis=1) + pb1_ref[...]
    ys = jnp.maximum(ys, 0.0)                               # (rows*z, nbp)

    # ---- softmax over Z + softmax-weighted sum ('vnzl,vnzl->vnl') ----
    # Z rows of each (v,n) group are contiguous sublanes; EUP reciprocal.
    ys3 = ys.reshape(rows, z, nbp)
    m = jnp.max(ys3, axis=1, keepdims=True)
    e = jnp.exp(ys3 - m)
    sm = e * pl.reciprocal(jnp.sum(e, axis=1, keepdims=True), approx=True)
    yagg = jnp.sum(sm * ys3, axis=1)                        # (rows, nbp)

    # ---- second-layer blocks (small, kept f32 for accuracy) + projection ----
    h2 = jnp.dot(yagg, w2_ref[...],
                 preferred_element_type=jnp.float32) + b2_ref[...]
    h2 = jnp.maximum(h2, 0.0)                               # (rows, hdim*ncp)
    h2r = h2.reshape(rows, hdim, ncp)
    outs = jnp.sum(h2r * pw2_ref[...][None, :, :], axis=1) + pb2_ref[...]
    outs = jnp.maximum(outs, 0.0)                           # (rows, ncp)

    # ---- fused actor/critic heads -> lane-dense (rows, 128) output slab ----
    # lane 0 = actor, lane 1 = per-sample critic, remaining lanes = 0.
    out_ref[...] = (jnp.dot(outs, hw_ref[...],
                            preferred_element_type=jnp.float32) + hb_ref[...])


# --------------------------------------------------------------------------
# Parameter construction (mimics the PyTorch __init__ shapes and custom_init
# offsets) and lane-padded packing for the kernel.
# --------------------------------------------------------------------------
def make_params(key, block_per_chr, chr_lens, hidden_dim, custom_init=True):
    n_chr = len(chr_lens)
    H = hidden_dim

    block_lens = []
    for Lc in chr_lens:
        bl = int(round(Lc / block_per_chr))
        block_lens += [bl] * (block_per_chr - 1) + [Lc - bl * (block_per_chr - 1)]
    NB = len(block_lens)
    L_total = int(sum(chr_lens))
    NBp = _round_up(NB, 128)          # lane-aligned per-hidden block slices
    NCp = _round_up(n_chr, 128)

    keys = jax.random.split(key, 4 * NB + 4 * n_chr + 4)
    kidx = iter(range(len(keys)))

    def uniform(shape, bound):
        return jax.random.uniform(keys[next(kidx)], shape, jnp.float32, -bound, bound)

    def bf16_round(a):
        # first-layer matmul runs in bf16 on the MXU; pre-round so the f32
        # reference sees exactly the same weight values.
        return a.astype(jnp.bfloat16).astype(jnp.float32)

    # first layer blocks
    fl = []
    for f in block_lens:
        bnd = 1.0 / np.sqrt(f)
        w = uniform((H, f), bnd)
        if custom_init:
            w = w + 1.0
        w = bf16_round(w)
        b = uniform((H,), bnd)
        if H == 1:
            pw = jnp.ones((1, 1), jnp.float32)
            pb = jnp.zeros((1,), jnp.float32)
        else:
            bndp = 1.0 / np.sqrt(H)
            pw = uniform((1, H), bndp)
            if custom_init:
                pw = pw + 1.0 / H
            pb = uniform((1,), bndp)
        fl.append((w, b, pw, pb))

    # second layer blocks (no +1 custom init on the first linear here)
    sl = []
    for _ in range(n_chr):
        bnd = 1.0 / np.sqrt(block_per_chr)
        w = uniform((H, block_per_chr), bnd)
        b = uniform((H,), bnd)
        if H == 1:
            pw = jnp.ones((1, 1), jnp.float32)
            pb = jnp.zeros((1,), jnp.float32)
        else:
            bndp = 1.0 / np.sqrt(H)
            pw = uniform((1, H), bndp)
            if custom_init:
                pw = pw + 1.0 / H
            pb = uniform((1,), bndp)
        sl.append((w, b, pw, pb))

    # heads (weight += 1 unconditionally, as in the module)
    bnd = 1.0 / np.sqrt(n_chr)
    aw = uniform((1, n_chr), bnd) + 1.0
    ab = uniform((1,), bnd)
    cw = uniform((1, n_chr), bnd) + 1.0
    cb = uniform((1,), bnd)

    # ---- pack for the kernel ----
    # W1: block-diagonal, columns ordered h-major: col = h*NBp + block;
    # padded columns/rows are zero so they contribute nothing downstream.
    W1 = np.zeros((L_total, H * NBp), np.float32)
    b1 = np.zeros((H * NBp,), np.float32)
    pw1 = np.zeros((H, NBp), np.float32)
    pb1 = np.zeros((NBp,), np.float32)
    start = 0
    for i, (w, b, pw, pb) in enumerate(fl):
        f = w.shape[1]
        wn = np.asarray(w)
        bn = np.asarray(b)
        for hh in range(H):
            W1[start:start + f, hh * NBp + i] = wn[hh]
            b1[hh * NBp + i] = bn[hh]
        pw1[:, i] = np.asarray(pw)[0]
        pb1[i] = float(np.asarray(pb)[0])
        start += f

    # W2: block-diagonal per chromosome, columns h-major: col = h*NCp + chr.
    W2 = np.zeros((NBp, H * NCp), np.float32)
    b2 = np.zeros((H * NCp,), np.float32)
    pw2 = np.zeros((H, NCp), np.float32)
    pb2 = np.zeros((NCp,), np.float32)
    for j, (w, b, pw, pb) in enumerate(sl):
        wn = np.asarray(w)
        bn = np.asarray(b)
        for hh in range(H):
            W2[j * block_per_chr:(j + 1) * block_per_chr, hh * NCp + j] = wn[hh]
            b2[hh * NCp + j] = bn[hh]
        pw2[:, j] = np.asarray(pw)[0]
        pb2[j] = float(np.asarray(pb)[0])

    # fused heads, padded to 128 lanes for unmasked full-width stores.
    hw = np.zeros((NCp, 128), np.float32)
    hb = np.zeros((128,), np.float32)
    hw[:n_chr, 0] = np.asarray(aw)[0]
    hw[:n_chr, 1] = np.asarray(cw)[0]
    hb[0] = float(np.asarray(ab)[0])
    hb[1] = float(np.asarray(cb)[0])

    packed = (
        jnp.asarray(W1, jnp.bfloat16),            # lossless: already bf16-rounded
        jnp.asarray(b1)[None, :],
        jnp.asarray(pw1), jnp.asarray(pb1)[None, :],
        jnp.asarray(W2), jnp.asarray(b2)[None, :],
        jnp.asarray(pw2), jnp.asarray(pb2)[None, :],
        jnp.asarray(hw), jnp.asarray(hb)[None, :],
    )
    raw = (fl, sl, (aw, ab, cw, cb), block_lens)
    return raw, packed


# --------------------------------------------------------------------------
# Wrapper calling the Pallas kernel.
# --------------------------------------------------------------------------
def _vmem_budget_bytes():
    # Generation-aware scoped-VMEM budget: ~3/4 of physical capacity
    # (v7x: 64 MiB -> ~48 MiB usable; v5e/v6e: 128 MiB -> ~96 MiB).
    cap = 64 * 1024 * 1024
    try:
        cap = int(pltpu.get_tpu_info().vmem_capacity_bytes)
    except Exception:
        pass
    return max(32 * 1024 * 1024, min((cap * 3) // 4, 112 * 1024 * 1024))


def _choose_row_tile(VN, Z, L, H, NBp, NCp, row_tile, weight_bytes, vmem_budget):
    # Largest multiple-of-8 tile <= row_tile that (a) still leaves >= 2 grid
    # steps when VN allows it (so v7x's two TensorCores both get work) and
    # (b) fits the VMEM budget (resident weights + double-buffered x tile +
    # f32 intermediates, with slack for relayout temporaries).
    R = max(8, min(int(row_tile), _round_up(max(1, pl.cdiv(VN, 2)), 8)))
    R = _round_up(R, 8)

    def footprint(r):
        x_tile = 2 * (r * Z * L * 2)                  # bf16, double-buffered
        h1 = r * Z * H * NBp * 4
        ys = r * Z * NBp * 4
        h2 = r * H * NCp * 4
        out = 2 * (r * 128 * 4)
        return weight_bytes + x_tile + 2 * (h1 + ys + h2) + out

    while R > 8 and footprint(R) > vmem_budget:
        R -= 8
    return R


def block_mlp_forward(x, packed, *, row_tile=64):
    V, N, L, Z = x.shape
    VN = V * N
    (W1, b1, pw1, pb1, W2, b2, pw2, pb2, hw, hb) = packed
    H, NBp = pw1.shape
    NCp = pw2.shape[1]

    weight_bytes = sum(int(np.prod(a.shape)) * a.dtype.itemsize for a in packed)
    vmem_budget = _vmem_budget_bytes()
    R = _choose_row_tile(VN, Z, L, H, NBp, NCp, row_tile, weight_bytes, vmem_budget)
    VN_pad = _round_up(VN, R)
    grid = (VN_pad // R,)

    # glue: permute (V,N,L,Z)->(V,N,Z,L) fused with the bf16 cast, flatten rows.
    # TODO(synk): fold this permute into the kernel (native-layout x blocks +
    # in-kernel XLU transpose) to drop the extra HBM pass over x.
    xp = jnp.transpose(x.astype(jnp.bfloat16), (0, 1, 3, 2)).reshape(VN * Z, L)
    if VN_pad != VN:
        xp = jnp.pad(xp, ((0, (VN_pad - VN) * Z), (0, 0)))

    kernel = functools.partial(block_mlp_kernel,
                               rows=R, z=Z, nbp=NBp, hdim=H, ncp=NCp)

    def full(a):
        return pl.BlockSpec(a.shape, lambda i, nd=a.ndim: (0,) * nd)

    bytes_accessed = int(xp.size) * 2 + weight_bytes + VN_pad * 128 * 4
    flops = (2 * VN_pad * Z * L * (H * NBp)       # first-layer matmul (dominant)
             + 2 * VN_pad * NBp * (H * NCp)       # second-layer matmul
             + 2 * VN_pad * NCp * 128)            # fused heads

    # TODO(synk): if profiling shows the x-tile DMA exposed at large R, switch
    # the x BlockSpec to pipeline_mode=pl.Buffered(3) (budget against v7x VMEM).
    head = pl.pallas_call(
        kernel,
        grid=grid,
        out_shape=jax.ShapeDtypeStruct((VN_pad, 128), jnp.float32),
        in_specs=[pl.BlockSpec((R * Z, L), lambda i: (i, 0))]
                 + [full(a) for a in packed],
        out_specs=pl.BlockSpec((R, 128), lambda i: (i, 0)),
        compiler_params=pltpu.CompilerParams(
            dimension_semantics=("parallel",),
            vmem_limit_bytes=vmem_budget),
        cost_estimate=pl.CostEstimate(flops=flops,
                                      transcendentals=VN_pad * Z * NBp,
                                      bytes_accessed=bytes_accessed),
    )(xp, *packed)

    actor = head[:VN, 0].reshape(V, N)                    # matches .squeeze()
    critic = head[:VN, 1].reshape(V, N).mean(axis=1)      # .mean(axis=-1) -> (V,)
    return actor, critic


# --------------------------------------------------------------------------
# Pure-JAX reference (loops over individual blocks, mirrors the torch code).
# --------------------------------------------------------------------------
def reference_forward(x, raw, block_per_chr, hidden_dim):
    fl, sl, (aw, ab, cw, cb), _ = raw
    hp = jax.lax.Precision.HIGHEST
    xp = jnp.transpose(x, (0, 1, 3, 2))                                # (V,N,Z,L)

    ys_cols, start = [], 0
    for (w, b, pw, pb) in fl:
        f = w.shape[1]
        seg = xp[..., start:start + f]
        h = jnp.maximum(jnp.einsum('vnzf,hf->vnzh', seg, w, precision=hp) + b, 0.0)
        if hidden_dim == 1:
            y = h[..., 0]
        else:
            y = jnp.maximum(jnp.einsum('vnzh,oh->vnzo', h, pw, precision=hp) + pb, 0.0)[..., 0]
        ys_cols.append(y)
        start += f
    ys = jnp.stack(ys_cols, axis=-1)                                   # (V,N,Z,NB)
    sm = jax.nn.softmax(ys, axis=-2)
    ys2 = jnp.einsum('vnzl,vnzl->vnl', sm, ys, precision=hp)           # (V,N,NB)

    outs_cols, start = [], 0
    for (w, b, pw, pb) in sl:
        seg = ys2[..., start:start + block_per_chr]
        h = jnp.maximum(jnp.einsum('vnf,hf->vnh', seg, w, precision=hp) + b, 0.0)
        if hidden_dim == 1:
            o = h[..., 0]
        else:
            o = jnp.maximum(jnp.einsum('vnh,oh->vno', h, pw, precision=hp) + pb, 0.0)[..., 0]
        outs_cols.append(o)
        start += block_per_chr
    outs = jnp.stack(outs_cols, axis=-1)                               # (V,N,n_chr)

    actor = (jnp.einsum('vnc,oc->vno', outs, aw, precision=hp) + ab)[..., 0]           # (V,N)
    critic = ((jnp.einsum('vnc,oc->vno', outs, cw, precision=hp) + cb)[..., 0]).mean(axis=-1)
    return actor, critic


if __name__ == "__main__":
    block_per_chr = 2
    chr_lens = [20, 12]
    hidden_dim = 4
    V, N, Z = 2, 6, 8

    key = jax.random.PRNGKey(0)
    kx, kp = jax.random.split(key)
    x = jax.random.normal(kx, (V, N, int(sum(chr_lens)), Z), dtype=jnp.float32)
    # The kernel feeds x to the MXU in bf16; round x to the bf16 grid up front
    # so the f32 reference sees exactly the same input values.
    x = x.astype(jnp.bfloat16).astype(jnp.float32)

    raw, packed = make_params(kp, block_per_chr, chr_lens, hidden_dim, custom_init=True)

    fwd = jax.jit(block_mlp_forward)
    actor, critic = fwd(x, packed)
    jax.block_until_ready((actor, critic))

    ref_actor, ref_critic = reference_forward(x, raw, block_per_chr, hidden_dim)
    assert actor.shape == (V, N) and critic.shape == (V,)
    # bf16 MXU inputs + approx reciprocal in the softmax -> slightly looser tol.
    np.testing.assert_allclose(np.asarray(actor), np.asarray(ref_actor), rtol=5e-3, atol=5e-3)
    np.testing.assert_allclose(np.asarray(critic), np.asarray(ref_critic), rtol=5e-3, atol=5e-3)

    print("KERNEL_OK")
</pallas_src>

<mosaic_0001>
module attributes {stable_mosaic.version = 11 : i64} {
  func.func @block_mlp_kernel(%arg0: i32, %arg1: memref<64x32xbf16, #tpu.memory_space<vmem>>, %arg2: memref<32x512xbf16, #tpu.memory_space<vmem>>, %arg3: memref<1x512xf32, #tpu.memory_space<vmem>>, %arg4: memref<4x128xf32, #tpu.memory_space<vmem>>, %arg5: memref<1x128xf32, #tpu.memory_space<vmem>>, %arg6: memref<128x512xf32, #tpu.memory_space<vmem>>, %arg7: memref<1x512xf32, #tpu.memory_space<vmem>>, %arg8: memref<4x128xf32, #tpu.memory_space<vmem>>, %arg9: memref<1x128xf32, #tpu.memory_space<vmem>>, %arg10: memref<128x128xf32, #tpu.memory_space<vmem>>, %arg11: memref<1x128xf32, #tpu.memory_space<vmem>>, %arg12: memref<8x128xf32, #tpu.memory_space<vmem>>) attributes {dimension_semantics = [#tpu.dimension_semantics<parallel>], iteration_bounds = array<i64: 2>, scalar_prefetch = 0 : i64, scratch_operands = 0 : i64, tpu.core_type = #tpu.core_type<tc>, window_params = [{transform_indices = @transform_0, window_bounds = array<i64: 64, 32>}, {pipeline_mode = #tpu.pipeline_mode<synchronous>, transform_indices = @transform_1, window_bounds = array<i64: 32, 512>}, {pipeline_mode = #tpu.pipeline_mode<synchronous>, transform_indices = @transform_2, window_bounds = array<i64: 1, 512>}, {pipeline_mode = #tpu.pipeline_mode<synchronous>, transform_indices = @transform_3, window_bounds = array<i64: 4, 128>}, {pipeline_mode = #tpu.pipeline_mode<synchronous>, transform_indices = @transform_4, window_bounds = array<i64: 1, 128>}, {pipeline_mode = #tpu.pipeline_mode<synchronous>, transform_indices = @transform_5, window_bounds = array<i64: 128, 512>}, {pipeline_mode = #tpu.pipeline_mode<synchronous>, transform_indices = @transform_6, window_bounds = array<i64: 1, 512>}, {pipeline_mode = #tpu.pipeline_mode<synchronous>, transform_indices = @transform_7, window_bounds = array<i64: 4, 128>}, {pipeline_mode = #tpu.pipeline_mode<synchronous>, transform_indices = @transform_8, window_bounds = array<i64: 1, 128>}, {pipeline_mode = #tpu.pipeline_mode<synchronous>, transform_indices = @transform_9, window_bounds = array<i64: 128, 128>}, {pipeline_mode = #tpu.pipeline_mode<synchronous>, transform_indices = @transform_10, window_bounds = array<i64: 1, 128>}, {transform_indices = @transform_11, window_bounds = array<i64: 8, 128>}]} {
    %c0 = arith.constant 0 : index
    %c0_0 = arith.constant 0 : index
    %0 = vector.load %arg1[%c0, %c0_0] : memref<64x32xbf16, #tpu.memory_space<vmem>>, vector<64x32xbf16>
    %c0_1 = arith.constant 0 : index
    %c0_2 = arith.constant 0 : index
    %1 = vector.load %arg2[%c0_1, %c0_2] : memref<32x512xbf16, #tpu.memory_space<vmem>>, vector<32x512xbf16>
    %cst = arith.constant dense<0.000000e+00> : vector<64x512xf32>
    %2 = tpu.matmul %0, %1, %cst {dimension_numbers = #tpu.dot_dimension_numbers<[1], [0], [0], [1], [0, 0, 1, 1], [], []>} : vector<64x32xbf16>, vector<32x512xbf16>, vector<64x512xf32> -> vector<64x512xf32>
    %c0_3 = arith.constant 0 : index
    %c0_4 = arith.constant 0 : index
    %3 = vector.load %arg3[%c0_3, %c0_4] : memref<1x512xf32, #tpu.memory_space<vmem>>, vector<1x512xf32>
    %4 = vector.broadcast %3 : vector<1x512xf32> to vector<64x512xf32>
    %5 = arith.addf %2, %4 : vector<64x512xf32>
    %cst_5 = arith.constant 0.000000e+00 : f32
    %6 = vector.broadcast %cst_5 : f32 to vector<64x512xf32>
    %7 = arith.maximumf %5, %6 : vector<64x512xf32>
    %8 = vector.shape_cast %7 : vector<64x512xf32> to vector<64x4x128xf32>
    %c0_6 = arith.constant 0 : index
    %c0_7 = arith.constant 0 : index
    %9 = vector.load %arg4[%c0_6, %c0_7] : memref<4x128xf32, #tpu.memory_space<vmem>>, vector<4x128xf32>
    %10 = vector.shape_cast %9 : vector<4x128xf32> to vector<1x4x128xf32>
    %11 = vector.broadcast %10 : vector<1x4x128xf32> to vector<64x4x128xf32>
    %12 = arith.mulf %8, %11 : vector<64x4x128xf32>
    %cst_8 = arith.constant dense<0.000000e+00> : vector<64x128xf32>
    %13 = vector.multi_reduction <add>, %12, %cst_8 [1] : vector<64x4x128xf32> to vector<64x128xf32>
    %c0_9 = arith.constant 0 : index
    %c0_10 = arith.constant 0 : index
    %14 = vector.load %arg5[%c0_9, %c0_10] : memref<1x128xf32, #tpu.memory_space<vmem>>, vector<1x128xf32>
    %15 = vector.broadcast %14 : vector<1x128xf32> to vector<64x128xf32>
    %16 = arith.addf %13, %15 : vector<64x128xf32>
    %cst_11 = arith.constant 0.000000e+00 : f32
    %17 = vector.broadcast %cst_11 : f32 to vector<64x128xf32>
    %18 = arith.maximumf %16, %17 : vector<64x128xf32>
    %19 = vector.shape_cast %18 : vector<64x128xf32> to vector<8x8x128xf32>
    %cst_12 = arith.constant dense<0xFF800000> : vector<8x128xf32>
    %20 = vector.multi_reduction <maximumf>, %19, %cst_12 [1] : vector<8x8x128xf32> to vector<8x128xf32>
    %21 = vector.shape_cast %20 : vector<8x128xf32> to vector<8x1x128xf32>
    %22 = vector.broadcast %21 : vector<8x1x128xf32> to vector<8x8x128xf32>
    %23 = arith.subf %19, %22 : vector<8x8x128xf32>
    %24 = math.exp %23 : vector<8x8x128xf32>
    %cst_13 = arith.constant dense<0.000000e+00> : vector<8x128xf32>
    %25 = vector.multi_reduction <add>, %24, %cst_13 [1] : vector<8x8x128xf32> to vector<8x128xf32>
    %26 = vector.shape_cast %25 : vector<8x128xf32> to vector<8x1x128xf32>
    %27 = tpu.reciprocal %26 {approx = true} : vector<8x1x128xf32> -> vector<8x1x128xf32>
    %28 = vector.broadcast %27 : vector<8x1x128xf32> to vector<8x8x128xf32>
    %29 = arith.mulf %24, %28 : vector<8x8x128xf32>
    %30 = arith.mulf %29, %19 : vector<8x8x128xf32>
    %cst_14 = arith.constant dense<0.000000e+00> : vector<8x128xf32>
    %31 = vector.multi_reduction <add>, %30, %cst_14 [1] : vector<8x8x128xf32> to vector<8x128xf32>
    %c0_15 = arith.constant 0 : index
    %c0_16 = arith.constant 0 : index
    %32 = vector.load %arg6[%c0_15, %c0_16] : memref<128x512xf32, #tpu.memory_space<vmem>>, vector<128x512xf32>
    %cst_17 = arith.constant dense<0.000000e+00> : vector<8x512xf32>
    %33 = tpu.matmul %31, %32, %cst_17 {dimension_numbers = #tpu.dot_dimension_numbers<[1], [0], [0], [1], [0, 0, 1, 1], [], []>} : vector<8x128xf32>, vector<128x512xf32>, vector<8x512xf32> -> vector<8x512xf32>
    %c0_18 = arith.constant 0 : index
    %c0_19 = arith.constant 0 : index
    %34 = vector.load %arg7[%c0_18, %c0_19] : memref<1x512xf32, #tpu.memory_space<vmem>>, vector<1x512xf32>
    %35 = vector.broadcast %34 : vector<1x512xf32> to vector<8x512xf32>
    %36 = arith.addf %33, %35 : vector<8x512xf32>
    %cst_20 = arith.constant 0.000000e+00 : f32
    %37 = vector.broadcast %cst_20 : f32 to vector<8x512xf32>
    %38 = arith.maximumf %36, %37 : vector<8x512xf32>
    %39 = vector.shape_cast %38 : vector<8x512xf32> to vector<8x4x128xf32>
    %c0_21 = arith.constant 0 : index
    %c0_22 = arith.constant 0 : index
    %40 = vector.load %arg8[%c0_21, %c0_22] : memref<4x128xf32, #tpu.memory_space<vmem>>, vector<4x128xf32>
    %41 = vector.shape_cast %40 : vector<4x128xf32> to vector<1x4x128xf32>
    %42 = vector.broadcast %41 : vector<1x4x128xf32> to vector<8x4x128xf32>
    %43 = arith.mulf %39, %42 : vector<8x4x128xf32>
    %cst_23 = arith.constant dense<0.000000e+00> : vector<8x128xf32>
    %44 = vector.multi_reduction <add>, %43, %cst_23 [1] : vector<8x4x128xf32> to vector<8x128xf32>
    %c0_24 = arith.constant 0 : index
    %c0_25 = arith.constant 0 : index
    %45 = vector.load %arg9[%c0_24, %c0_25] : memref<1x128xf32, #tpu.memory_space<vmem>>, vector<1x128xf32>
    %46 = vector.broadcast %45 : vector<1x128xf32> to vector<8x128xf32>
    %47 = arith.addf %44, %46 : vector<8x128xf32>
    %cst_26 = arith.constant 0.000000e+00 : f32
    %48 = vector.broadcast %cst_26 : f32 to vector<8x128xf32>
    %49 = arith.maximumf %47, %48 : vector<8x128xf32>
    %c0_27 = arith.constant 0 : index
    %c0_28 = arith.constant 0 : index
    %50 = vector.load %arg10[%c0_27, %c0_28] : memref<128x128xf32, #tpu.memory_space<vmem>>, vector<128x128xf32>
    %cst_29 = arith.constant dense<0.000000e+00> : vector<8x128xf32>
    %51 = tpu.matmul %49, %50, %cst_29 {dimension_numbers = #tpu.dot_dimension_numbers<[1], [0], [0], [1], [0, 0, 1, 1], [], []>} : vector<8x128xf32>, vector<128x128xf32>, vector<8x128xf32> -> vector<8x128xf32>
    %c0_30 = arith.constant 0 : index
    %c0_31 = arith.constant 0 : index
    %52 = vector.load %arg11[%c0_30, %c0_31] : memref<1x128xf32, #tpu.memory_space<vmem>>, vector<1x128xf32>
    %53 = vector.broadcast %52 : vector<1x128xf32> to vector<8x128xf32>
    %54 = arith.addf %51, %53 : vector<8x128xf32>
    %c0_32 = arith.constant 0 : index
    %c0_33 = arith.constant 0 : index
    %55 = vector.load %arg12[%c0_32, %c0_33] : memref<8x128xf32, #tpu.memory_space<vmem>>, vector<8x128xf32>
    tpu.vector_store %arg12[%c0_32, %c0_33], %54 {strides = array<i32>} : memref<8x128xf32, #tpu.memory_space<vmem>>, vector<8x128xf32>,
    return
  }
  func.func @transform_0(%arg0: i32) -> (i32, i32) {
    %c0_i32 = arith.constant 0 : i32
    %c0_i32_0 = arith.constant 0 : i32
    return %arg0, %c0_i32 : i32, i32
  }
  func.func @transform_1(%arg0: i32) -> (i32, i32) {
    %c0_i32 = arith.constant 0 : i32
    %c0_i32_0 = arith.constant 0 : i32
    %c0_i32_1 = arith.constant 0 : i32
    return %c0_i32, %c0_i32_0 : i32, i32
  }
  func.func @transform_2(%arg0: i32) -> (i32, i32) {
    %c0_i32 = arith.constant 0 : i32
    %c0_i32_0 = arith.constant 0 : i32
    %c0_i32_1 = arith.constant 0 : i32
    return %c0_i32, %c0_i32_0 : i32, i32
  }
  func.func @transform_3(%arg0: i32) -> (i32, i32) {
    %c0_i32 = arith.constant 0 : i32
    %c0_i32_0 = arith.constant 0 : i32
    %c0_i32_1 = arith.constant 0 : i32
    return %c0_i32, %c0_i32_0 : i32, i32
  }
  func.func @transform_4(%arg0: i32) -> (i32, i32) {
    %c0_i32 = arith.constant 0 : i32
    %c0_i32_0 = arith.constant 0 : i32
    %c0_i32_1 = arith.constant 0 : i32
    return %c0_i32, %c0_i32_0 : i32, i32
  }
  func.func @transform_5(%arg0: i32) -> (i32, i32) {
    %c0_i32 = arith.constant 0 : i32
    %c0_i32_0 = arith.constant 0 : i32
    %c0_i32_1 = arith.constant 0 : i32
    return %c0_i32, %c0_i32_0 : i32, i32
  }
  func.func @transform_6(%arg0: i32) -> (i32, i32) {
    %c0_i32 = arith.constant 0 : i32
    %c0_i32_0 = arith.constant 0 : i32
    %c0_i32_1 = arith.constant 0 : i32
    return %c0_i32, %c0_i32_0 : i32, i32
  }
  func.func @transform_7(%arg0: i32) -> (i32, i32) {
    %c0_i32 = arith.constant 0 : i32
    %c0_i32_0 = arith.constant 0 : i32
    %c0_i32_1 = arith.constant 0 : i32
    return %c0_i32, %c0_i32_0 : i32, i32
  }
  func.func @transform_8(%arg0: i32) -> (i32, i32) {
    %c0_i32 = arith.constant 0 : i32
    %c0_i32_0 = arith.constant 0 : i32
    %c0_i32_1 = arith.constant 0 : i32
    return %c0_i32, %c0_i32_0 : i32, i32
  }
  func.func @transform_9(%arg0: i32) -> (i32, i32) {
    %c0_i32 = arith.constant 0 : i32
    %c0_i32_0 = arith.constant 0 : i32
    %c0_i32_1 = arith.constant 0 : i32
    return %c0_i32, %c0_i32_0 : i32, i32
  }
  func.func @transform_10(%arg0: i32) -> (i32, i32) {
    %c0_i32 = arith.constant 0 : i32
    %c0_i32_0 = arith.constant 0 : i32
    %c0_i32_1 = arith.constant 0 : i32
    return %c0_i32, %c0_i32_0 : i32, i32
  }
  func.func @transform_11(%arg0: i32) -> (i32, i32) {
    %c0_i32 = arith.constant 0 : i32
    %c0_i32_0 = arith.constant 0 : i32
    return %arg0, %c0_i32 : i32, i32
  }
}

</mosaic_0001>

<bundles_post_ra>
// kernel: squeeze.3
= control target key start
LH: loop header
LB: loop body
LE: loop exit
PB: predicated region body
PF: predicated region fallthrough
CT: control target
= control target key end

     0   :  { %vm7_vm0 = vcmask 48128   ;;  %s39_s0 = inlined_call_operand.vmem [shape: f32[12], index: 0, kind: input, shape index: {}]   ;;  %s40_s1 = inlined_call_operand.vmem [shape: f32[2,6], index: 1, kind: output, shape index: {}]  }
   0x1   :  { %v4_v0 = vld [vmem:[%s39_s0] sm:$0x1]  ;;  %s22_s0 = smov 122  }
   0x2   :  { %5 = vst [vmem:[#allocation1] sm:$0x1] %v4_v0 }
   0x9   :  { %v9_v1 = vld [vmem:[#allocation1] sm:$0x1]  }
   0xa   :  { %v6_v2 = vld [vmem:[#allocation1] sm:$0x1]   ;;  %10 = vrot.lane.b32.xlu0 %v9_v1, %s22_s0 }
   0xb   :  { %8 = vst.msk [vmem:[#allocation0] sm:$0x1] %vm7_vm0, %v6_v2  }
  0x7c   :  { %v11_v3 = vpop.permute.xlu0 %10  }
  0x7d   :  { %14 = vst.msk [vmem:[#allocation0 + $0x1] sm:$0x1] %vm7_vm0, %v11_v3  }
  0x84   :  { %v17_v4 = vld [vmem:[#allocation0] sm:$0x3] }
  0x85   :  { %20 = vst [vmem:[%s40_s1] sm:$0x3] %v17_v4 }

// kernel: squeeze.2
= control target key start
LH: loop header
LB: loop body
LE: loop exit
PB: predicated region body
PF: predicated region fallthrough
CT: control target
= control target key end

     0   :  { %s80_s0 = inlined_call_operand.vmem [shape: f32[12], index: 0, kind: input, shape index: {}]   ;;  %s81_s1 = inlined_call_operand.hbm [shape: f32[2,6], index: 1, kind: output, shape index: {}]  }
   0x1   :  { %v5_v0 = vld [vmem:[%s80_s0] sm:$0x1] }
   0x2   :  { %2 = vsyncpa [#allocation1], 0  ;;  %6 = vst [vmem:[#allocation3] sm:$0x1] %v5_v0  ;;  %vm8_vm0 = vcmask 48128   ;;  %s62_s0 = smov 122  }
   0x3   :  { %s63_s8 = smov [#allocation0]   ;;  %s27_s1 = sshll.u32 %s81_s1, 4  ;;  %s28_s1 = int_to_ptr.hbm [resolvable:$true] %s27_s1 }
   0x4   :  { %s25_s9 = sshll.u32 %s63_s8, 4  ;;  %s26_s9 = int_to_ptr.vmem [resolvable:$true] %s25_s9 }
   0x9   :  { %v10_v1 = vld [vmem:[#allocation3] sm:$0x1]  }
   0xa   :  { %v7_v2 = vld [vmem:[#allocation3] sm:$0x1]   ;;  %11 = vrot.lane.b32.xlu0 %v10_v1, %s62_s0 }
   0xb   :  { %9 = vst.msk [vmem:[#allocation2] sm:$0x1] %vm8_vm0, %v7_v2  }
  0x7c   :  { %v12_v3 = vpop.permute.xlu0 %11  }
  0x7d   :  { %15 = vst.msk [vmem:[#allocation2 + $0x1] sm:$0x1] %vm8_vm0, %v12_v3  }
  0x84   :  { %v18_v4 = vld [vmem:[#allocation2] sm:$0x3] }
  0x85   :  { %21 = vst [vmem:[#allocation0] sm:$0x3] %v18_v4 }
  0x86   :  { %30 = dma.vmem_to_hbm [thread:$0]  %s26_s9, 32, %s28_s1, [#allocation1]  }
  0x87   :  { %60 = dma.done.wait [#allocation1], 32  }
  0x88   :  { %61 = vsyncadd [#allocation1], 4294967264 }
  0x89   :  { %33 = vsyncpa [#allocation1], 1 }

// kernel: block_mlp_forward.1
= control target key start
LH: loop header
LB: loop body
LE: loop exit
PB: predicated region body
PF: predicated region fallthrough
CT: control target
= control target key end

     0   :  { %16 = vsyncpa [#allocation3], 0  ;;  %s3505_s17 = smov 0   ;;  %s5385_s0 = inlined_call_operand.vmem [shape: bf16[128,32], index: 0, kind: input, shape index: {}]   ;;  %s5386_s1 = inlined_call_operand.vmem [shape: bf16[32,512], index: 1, kind: input, shape index: {}]   ;;  %s5387_s2 = inlined_call_operand.vmem [shape: f32[1,512], index: 2, kind: input, shape index: {}]   ;;  %s5388_s3 = inlined_call_operand.vmem [shape: f32[4,128], index: 3, kind: input, shape index: {}]   ;;  %s5389_s4 = inlined_call_operand.vmem [shape: f32[1,128], index: 4, kind: input, shape index: {}]   ;;  %s5390_s5 = inlined_call_operand.hbm [shape: f32[128,512], index: 5, kind: input, shape index: {}]   ;;  %s5391_s6 = inlined_call_operand.vmem [shape: f32[1,512], index: 6, kind: input, shape index: {}]   ;;  %s5392_s7 = inlined_call_operand.vmem [shape: f32[4,128], index: 7, kind: input, shape index: {}]   ;;  %s5393_s8 = inlined_call_operand.vmem [shape: f32[1,128], index: 8, kind: input, shape index: {}]   ;;  %s5394_s9 = inlined_call_operand.vmem [shape: f32[128,128], index: 9, kind: input, shape index: {}]   ;;  %s5395_s10 = inlined_call_operand.vmem [shape: f32[1,128], index: 10, kind: input, shape index: {}]   ;;  %s5396_s11 = inlined_call_operand.vmem [shape: f32[16,128], index: 11, kind: output, shape index: {}]  }
   0x1 LB: > { %s312_s20 = sshll.u32 %s5390_s5, 4  ;;  %s3514_s21 = sadd.s32 4294967295, %s3438_s17   ;;  %s3438_s17 = sphi %s3505_s17, %s22_s17   ;;  %s313_s20 = int_to_ptr.hbm [resolvable:$true] %s312_s20 }
   0x2   : > { %p3136_p0 = scmp.ge.s32.totalorder %s3438_s17, 1  ;;  %p289_p1 = scmp.lt.s32.totalorder %s3438_s17, 3 }
   0x3   : > { %p3232_p2 = scmp.eq.s32.totalorder %s3514_s21, 0  ;;  %s3440_s22 = smov [#allocation2]  }
   0x4   : > { %p290_p3 = pnand %p3136_p0, %p289_p1  ;;  %s314_s23 = sshll.u32 %s3440_s22, 4  ;;  %s315_s23 = int_to_ptr.vmem [resolvable:$true] %s314_s23 }
   0x5   : > { %s3441_s24 = smov 512   ;;  %s3442_s25 = smov 32  }
   0x6   : > { %p3228_p4 = pneg %p290_p3  ;;  %354 = sbr.rel (%p290_p3) target bundleno = 926 (0x39e), region = 64 }
   0x8   : > { %p3229_p5 = pnand %p3232_p2, %p3228_p4 }
   0xa   : > { %3231 = dma.hbm_to_vmem [thread:$0]  (!%p3229_p5), %s313_s20, 8192, %s315_s23, [#allocation3], %s3441_s24, %s3441_s24, %s3442_s25  }
   0xb   : > { %3433 = dma.done.wait (%p3232_p2), [#allocation3], 8192  }
   0xc   : > { %3435 = vsyncadd (%p3232_p2), [#allocation3], 4294959104  ;;  %s3141_s26 = sshll.u32 %s3514_s21, 3  ;;  %v3178_v0 = vld [vmem:[%s5386_s1 + $0x20] sm:$0xf]  ;;  %vm491_vm0 = vcmask 261120  }
   0xd   : > { %p395_p6 = scmp.lt.s32.totalorder %s3141_s26, 15  ;;  %v3220_v1 = vld [vmem:[%s5386_s1 + $0x2c] sm:$0xf0]  ;;  %v3186_v2 = vld [vmem:[%s5386_s1 + $0x28] sm:$0xf]  ;;  %vm653_vm1 = vcmask 1047556  }
   0xe   : > { %v3179_v3 = vor.u32 %v3220_v1, %v3178_v0  ;;  %v3221_v4 = vld [vmem:[%s5386_s1 + $0x34] sm:$0xf0]  ;;  %v3219_v5 = vld [vmem:[%s5386_s1 + $0x2c] sm:$0xf]  ;;  %v3188_v6 = vld [vmem:[%s5386_s1 + $0x38] sm:$0xf0] }
   0xf   : > { %s5619_s26 = smov (!%p395_p6, %s3141_s26), 15  ;;  %v3187_v7 = vor.u32 %v3221_v4, %v3186_v2  ;;  %v3191_v8 = vor.u32 %v3219_v5, %v3188_v6  ;;  %v3162_v9 = vld [vmem:[%s5386_s1] sm:$0xf]  ;;  %v3216_v10 = vld [vmem:[%s5386_s1 + $0xc] sm:$0xf0]  ;;  %vm1166_vm2 = vcmask 1043456  }
  0x10   : > { %s3142_s27 = sshll.u32 %s5619_s26, 2  ;;  %v3170_v11 = vld [vmem:[%s5386_s1 + $0x8] sm:$0xf]  ;;  %3222 = vmatpush.bf16.msra.mxu1 %v3179_v3  ;;  %v3163_v12 = vor.u32 %v3216_v10, %v3162_v9  ;;  %v3217_v13 = vld [vmem:[%s5386_s1 + $0x14] sm:$0xf0]  ;;  %510 = vmatpush.bf16.msra.mxu0 %v3179_v3  ;;  %vm1747_vm3 = vcmask 1040384  }
  0x11   : > { %s3550_s13 = scalar_lea.vmem %s5385_s0, %s3142_s27  ;;  %v3215_v14 = vld [vmem:[%s5386_s1 + $0xc] sm:$0xf]  ;;  %v3172_v15 = vld [vmem:[%s5386_s1 + $0x18] sm:$0xf0]  ;;  %568 = vmatpush.bf16.msra.mxu2 %v3187_v7  ;;  %597 = vmatpush.bf16.msra.mxu3 %v3191_v8  ;;  %v3171_v16 = vor.u32 %v3217_v13, %v3170_v11  ;;  %v3218_v18 = vld [vmem:[%s5386_s1 + $0x24] sm:$0xf] }
  0x12   : > { %v3175_v17 = vor.u32 %v3215_v14, %v3172_v15  ;;  %v3180_v19 = vld [vmem:[%s5386_s1 + $0x30] sm:$0xf0]  ;;  %v3213_v20 = vld [vmem:[%s3550_s13 + $0x18] sm:$0xff]  ;;  %v3214_v22 = vld [vmem:[%s5386_s1 + $0x4] sm:$0xf]  ;;  %vm2133_vm4 = vcmask 1041409  }
  0x13   : > { %v3183_v21 = vor.u32 %v3218_v18, %v3180_v19  ;;  %v3164_v23 = vld [vmem:[%s5386_s1 + $0x10] sm:$0xf0]  ;;  %v3210_v24 = vld [vmem:[%s3550_s13] sm:$0xff]  ;;  %v3211_v26 = vld [vmem:[%s3550_s13 + $0x8] sm:$0xff]  ;;  %v3443_v38 = vmov 1983009808  }
  0x14   : > { %3223 = vmatpush.bf16.msra.mxu1 %v3163_v12  ;;  %511 = vmatpush.bf16.msra.mxu0 %v3163_v12  ;;  %v3167_v25 = vor.u32 %v3214_v22, %v3164_v23  ;;  %v3212_v27 = vld [vmem:[%s3550_s13 + $0x10] sm:$0xff]  ;;  %v421_v28 = vld [vmem:[%s5387_s2] sm:$0xf]  ;;  %v658_v39 = vunpack.c.l.s4 %v3443_v38  ;;  %v3444_v56 = vmov 1934713408   ;;  %vm2136_vm5 = vcmask 1042434  }
  0x15   : > { %569 = vmatpush.bf16.msra.mxu2 %v3171_v16  ;;  %598 = vmatpush.bf16.msra.mxu3 %v3175_v17  ;;  %v3598_v30 = vperm.slane %v421_v28, 0  ;;  %v3601_v33 = vperm.slane %v421_v28, 2  ;;  %v3603_v34 = vperm.slane %v421_v28, 3  ;;  %v3611_v48 = vperm.slane %v421_v28, 1  ;;  %v3635_v10 = vld [vmem:[%s5388_s3] sm:$0xf] }
  0x16   : > { %v3609_v46 = vunpack.c.0.s8 %v658_v39  ;;  %v682_v57 = vunpack.c.l.s4 %v3444_v56  ;;  %vm2139_vm6 = vcmask 1043459   ;;  %vm2142_vm7 = vcmask 1044484   ;;  %p400_p7 = scmp.lt.s32.totalorder %s3514_s21, 1 }
  0x17   : > { %3195 = vmatmul.msk.bf16.vlgmr.msra.gmra.mxu1 %vm491_vm0, %v3213_v20  ;;  %3192 = vmatmul.msk.bf16.vlgmr.msra.gmra.mxu0 %vm491_vm0, %v3210_v24  ;;  %vm2145_vm8 = vcmask 1045509   ;;  %vm2148_vm9 = vcmask 1046534   ;;  %vm2151_vm10 = vcmask 1047559  }
  0x18   : > { %539 = vmatpush.bf16.msrb.mxu1 %v3183_v21  ;;  %3200 = vmatmul.msk.bf16.vlgmr.msra.gmra.mxu2 %vm491_vm0, %v3210_v24  ;;  %5460 = vst [vmem:[#allocation5_spill] sm:$0xff] %v3609_v46  ;;  %v3622_v0 = vunpack.c.0.s8 %v682_v57  ;;  %s5621_s21 = smov (!%p400_p7, %s3514_s21), 1 }
  0x19   : > { %3204 = vmatmul.msk.bf16.vlgmr.msra.gmra.mxu3 %vm491_vm0, %v3210_v24  ;;  %s3143_s12 = sshll.u32 %s5621_s21, 3 }
  0x1a   : > { %5461 = vst [vmem:[#allocation6_spill] sm:$0xff] %v3622_v0  ;;  %s403_s18 = scalar_lea.vmem %s5396_s11, %s3143_s12 }
  0x1c   : > { %540 = vmatpush.bf16.msrb.mxu1 %v3167_v25 }
  0x27   : > { %3196 = vmatmul.msk.bf16.vlgmr.msrb.gmra.mxu1 %vm491_vm0, %v3210_v24  ;;  %3193 = vmatmul.msk.bf16.gmra.mxu0 %vm491_vm0, %v3211_v26 }
  0x28   : > { %3201 = vmatmul.msk.bf16.gmra.mxu2 %vm491_vm0, %v3211_v26 }
  0x29   : > { %3205 = vmatmul.msk.bf16.gmra.mxu3 %vm491_vm0, %v3211_v26 }
  0x37   : > { %3197 = vmatmul.msk.bf16.gmra.mxu1 %vm491_vm0, %v3211_v26  ;;  %3194 = vmatmul.msk.bf16.gmra.mxu0 %vm491_vm0, %v3212_v27 }
  0x38   : > { %3202 = vmatmul.msk.bf16.gmra.mxu2 %vm491_vm0, %v3212_v27 }
  0x39   : > { %3206 = vmatmul.msk.bf16.gmra.mxu3 %vm491_vm0, %v3212_v27 }
  0x47   : > { %3198 = vmatmul.msk.bf16.gmra.mxu1 %vm491_vm0, %v3212_v27 }
  0x48   : > { %3203 = vmatmul.msk.bf16.gmra.mxu2 %vm491_vm0, %v3213_v20 }
  0x49   : > { %3207 = vmatmul.msk.bf16.gmra.mxu3 %vm491_vm0, %v3213_v20 }
  0x57   : > { %3199 = vmatmul.msk.bf16.gmra.mxu1 %vm491_vm0, %v3213_v20 }
  0x94   : > { %v3596_v29 = vpop.f32.mrf.mxu1  ;;  %v513_v31 = vpop.f32.mrf.mxu0 }
  0x95   : > { %v514_v32 = vadd.f32 %v513_v31, %v3598_v30 }
  0x97   : > { %v620_v35 = vmax.f32 %v514_v32, 0.0 }
  0x99   : > { %v655_v44 = vrot.slane %v620_v35, 4 }
  0x9b   : > { %v571_v36 = vpop.f32.mrf.mxu2 }
  0x9c   : > { %v572_v37 = vadd.f32 %v571_v36, %v3601_v33  ;;  %v600_v40 = vpop.f32.mrf.mxu3  ;;  %v3606_v41 = vpop.f32.mrf.mxu1 }
  0x9d   : > { %v601_v42 = vadd.f32 %v600_v40, %v3603_v34  ;;  %v515_v52 = vpop.f32.mrf.mxu0 }
  0x9e   : > { %v622_v43 = vmax.f32 %v572_v37, 0.0  ;;  %v3619_v59 = vadd.f32 %v515_v52, %v3598_v30 }
  0x9f   : > { %v623_v47 = vmax.f32 %v601_v42, 0.0 }
  0xa0   : > { %v652_v45 = vrot.slane %v622_v43, 4  ;;  %v656_v50 = vsel %vm653_vm1, %v622_v43, %v655_v44  ;;  %v624_v3 = vmax.f32 %v3619_v59, 0.0 }
  0xa1   : > { %v665_v54 = vrot.slane %v623_v47, 4  ;;  %v664_v58 = vperm.slane %v656_v50, %v3609_v46 }
  0xa2   : > { %v654_v49 = vsel %vm653_vm1, %v652_v45, %v620_v35  ;;  %v3645_v20 = vrot.slane %v624_v3, 4 }
  0xa3   : > { %v660_v51 = vperm.slane %v654_v49, %v3609_v46  ;;  %v691_v1 = vrot.slane %v664_v58, 4  ;;  %v573_v4 = vpop.f32.mrf.mxu2 }
  0xa4   : > { %v542_v53 = vpop.f32.mrf.mxu1  ;;  %v3628_v6 = vadd.f32 %v573_v4, %v3601_v33  ;;  %v602_v11 = vpop.f32.mrf.mxu3 }
  0xa5   : > { %v543_v55 = vadd.f32 %v542_v53, %v3611_v48  ;;  %v679_v61 = vrot.slane %v660_v51, 4  ;;  %v3649_v22 = vadd.f32 %v602_v11, %v3603_v34 }
  0xa6   : > { %v626_v21 = vmax.f32 %v3628_v6, 0.0 }
  0xa7   : > { %v621_v60 = vmax.f32 %v543_v55, 0.0 }
  0xa9   : > { %v666_v62 = vsel %vm653_vm1, %v665_v54, %v621_v60  ;;  %v667_v63 = vrot.slane %v621_v60, 4 }
  0xaa   : > { %v672_v2 = vperm.slane %v666_v62, %v3609_v46 }
  0xab   : > { %v668_v5 = vsel %vm653_vm1, %v623_v47, %v667_v63 }
  0xac   : > { %v676_v7 = vperm.slane %v668_v5, %v3609_v46  ;;  %v677_v8 = vrot.slane %v672_v2, 4  ;;  %v680_v9 = vsel %vm653_vm1, %v672_v2, %v679_v61 }
  0xad   : > { %v688_v12 = vperm.slane %v680_v9, %v3622_v0 }
  0xae   : > { %v678_v13 = vsel %vm653_vm1, %v677_v8, %v660_v51  ;;  %v689_v14 = vrot.slane %v676_v7, 4  ;;  %v692_v15 = vsel %vm653_vm1, %v676_v7, %v691_v1 }
  0xaf   : > { %v684_v16 = vperm.slane %v678_v13, %v3622_v0  ;;  %v700_v17 = vperm.slane %v692_v15, %v3622_v0  ;;  %v703_v18 = vrot.slane %v688_v12, 4  ;;  %v1104_v19 = vmul.f32 %v3635_v10, %v688_v12 }
  0xb0   : > { %v690_v23 = vsel %vm653_vm1, %v689_v14, %v664_v58 }
  0xb1   : > { %v696_v24 = vperm.slane %v690_v23, %v3622_v0  ;;  %v701_v25 = vrot.slane %v684_v16, 4  ;;  %v704_v26 = vsel %vm653_vm1, 0.0, %v703_v18  ;;  %v707_v27 = vrot.slane %v700_v17, 4  ;;  %v3675_v23 = vld [vmem:[%s5389_s4] ss:$0 sm:$0xff] }
  0xb2   : > { %v1102_v28 = vmul.f32 %v3635_v10, %v684_v16  ;;  %v1105_v31 = vmul.f32 %v3635_v10, %v704_v26  ;;  %v1108_v32 = vmul.f32 %v3635_v10, %v700_v17  ;;  %v1181_v35 = vsel %vm1166_vm2, %v1104_v19, 0.0 }
  0xb3   : > { %v702_v36 = vsel %vm653_vm1, 0.0, %v701_v25  ;;  %v705_v37 = vrot.slane %v696_v24, 4  ;;  %v708_v38 = vsel %vm653_vm1, 0.0, %v707_v27  ;;  %v1106_v39 = vmul.f32 %v3635_v10, %v696_v24 }
  0xb4   : > { %v1103_v40 = vmul.f32 %v3635_v10, %v702_v36  ;;  %v1109_v42 = vmul.f32 %v3635_v10, %v708_v38  ;;  %v1167_v43 = vsel %vm1166_vm2, %v1102_v28, 0.0  ;;  %v1182_v44 = vrot.slane %v1181_v35, 4 }
  0xb5   : > { %v706_v45 = vsel %vm653_vm1, 0.0, %v705_v37  ;;  %v1168_v47 = vrot.slane %v1167_v43, 4  ;;  %v1188_v49 = vsel %vm1166_vm2, %v1105_v31, 0.0  ;;  %v1195_v50 = vsel %vm1166_vm2, %v1106_v39, 0.0 }
  0xb6   : > { %v1107_v51 = vmul.f32 %v3635_v10, %v706_v45  ;;  %v1174_v52 = vsel %vm1166_vm2, %v1103_v40, 0.0  ;;  %v1183_v53 = vadd.f32 %v1182_v44, %v1181_v35  ;;  %v1189_v54 = vrot.slane %v1188_v49, 4 }
  0xb7   : > { %v1169_v55 = vadd.f32 %v1168_v47, %v1167_v43  ;;  %v1175_v56 = vrot.slane %v1174_v52, 4  ;;  %v1196_v57 = vrot.slane %v1195_v50, 4  ;;  %v1209_v58 = vsel %vm1166_vm2, %v1108_v32, 0.0 }
  0xb8   : > { %v1184_v60 = vrot.slane %v1183_v53, 2  ;;  %v1190_v61 = vadd.f32 %v1189_v54, %v1188_v49  ;;  %v1202_v62 = vsel %vm1166_vm2, %v1107_v51, 0.0  ;;  %v1210_v63 = vrot.slane %v1209_v58, 4 }
  0xb9   : > { %v1170_v1 = vrot.slane %v1169_v55, 2  ;;  %v1176_v2 = vadd.f32 %v1175_v56, %v1174_v52  ;;  %v1197_v4 = vadd.f32 %v1196_v57, %v1195_v50  ;;  %v1203_v5 = vrot.slane %v1202_v62, 4 }
  0xba   : > { %v1185_v7 = vadd.f32 %v1184_v60, %v1183_v53  ;;  %v1191_v8 = vrot.slane %v1190_v61, 2  ;;  %v1211_v9 = vadd.f32 %v1210_v63, %v1209_v58  ;;  %v1216_v11 = vsel %vm1166_vm2, %v1109_v42, 0.0 }
  0xbb   : > { %v1171_v12 = vadd.f32 %v1170_v1, %v1169_v55  ;;  %v1177_v13 = vrot.slane %v1176_v2, 2  ;;  %v1198_v14 = vrot.slane %v1197_v4, 2  ;;  %v1204_v15 = vadd.f32 %v1203_v5, %v1202_v62  ;;  %v518_v55 = vpop.f32.mrf.mxu0 }
  0xbc   : > { %v1186_v16 = vrot.slane %v1185_v7, 1  ;;  %v1192_v17 = vadd.f32 %v1191_v8, %v1190_v61  ;;  %v1212_v18 = vrot.slane %v1211_v9, 2  ;;  %v1217_v19 = vrot.slane %v1216_v11, 4  ;;  %v544_v61 = vpop.f32.mrf.mxu1 }
  0xbd   : > { %v1172_v24 = vrot.slane %v1171_v12, 1  ;;  %v1178_v25 = vadd.f32 %v1177_v13, %v1176_v2  ;;  %v1199_v26 = vadd.f32 %v1198_v14, %v1197_v4  ;;  %v1205_v27 = vrot.slane %v1204_v15, 2 }
  0xbe   : > { %v1187_v28 = vadd.f32 %v1186_v16, %v1185_v7  ;;  %v1193_v31 = vrot.slane %v1192_v17, 1  ;;  %v1213_v32 = vadd.f32 %v1212_v18, %v1211_v9  ;;  %v1218_v35 = vadd.f32 %v1217_v19, %v1216_v11  ;;  %v576_v7 = vpop.f32.mrf.mxu2 }
  0xbf   : > { %v1173_v36 = vadd.f32 %v1172_v24, %v1171_v12  ;;  %v1179_v37 = vrot.slane %v1178_v25, 1  ;;  %v1200_v38 = vrot.slane %v1199_v26, 1  ;;  %v1206_v39 = vadd.f32 %v1205_v27, %v1204_v15 }
  0xc0   : > { %v1194_v40 = vadd.f32 %v1193_v31, %v1192_v17  ;;  %v1214_v42 = vrot.slane %v1213_v32, 1  ;;  %v1219_v43 = vrot.slane %v1218_v35, 2  ;;  %v1621_v44 = vadd.f32 %v3675_v23, %v1187_v28  ;;  %v605_v31 = vpop.f32.mrf.mxu3 }
  0xc1   : > { %v1180_v45 = vadd.f32 %v1179_v37, %v1178_v25  ;;  %v1201_v47 = vadd.f32 %v1200_v38, %v1199_v26  ;;  %v1207_v49 = vrot.slane %v1206_v39, 1  ;;  %v1619_v50 = vadd.f32 %v3675_v23, %v1173_v36 }
  0xc2   : > { %v3681_v51 = vadd.f32 %v3596_v29, %v3598_v30  ;;  %v709_v52 = vrot.slane %v626_v21, 4  ;;  %v1220_v53 = vadd.f32 %v1219_v43, %v1218_v35  ;;  %v1622_v54 = vadd.f32 %v3675_v23, %v1194_v40 }
  0xc3   : > { %v1208_v56 = vadd.f32 %v1207_v49, %v1206_v39  ;;  %v1620_v57 = vadd.f32 %v3675_v23, %v1180_v45  ;;  %v3687_v58 = vmax.f32 %v1619_v50, 0.0  ;;  %v3690_v60 = vadd.f32 %v518_v55, %v3598_v30 }
  0xc4   : > { %5462 = vst [vmem:[#allocation7_spill] sm:$0xff] %v3681_v51  ;;  %v712_v29 = vsel %vm653_vm1, %v626_v21, %v3645_v20  ;;  %v627_v62 = vmax.f32 %v3649_v22, 0.0  ;;  %v1221_v63 = vrot.slane %v1220_v53, 1  ;;  %v1215_v1 = vadd.f32 %v1214_v42, %v1213_v32 }
  0xc5   : > { %v1623_v2 = vadd.f32 %v3675_v23, %v1201_v47  ;;  %v3698_v4 = vmax.f32 %v1620_v57, 0.0  ;;  %v3700_v5 = vmax.f32 %v1621_v44, 0.0  ;;  %v710_v8 = vsel %vm653_vm1, %v709_v52, %v624_v3 }
  0xc6   : > { %v3705_v9 = vmax.f32 %v1622_v54, 0.0  ;;  %v577_v6 = vadd.f32 %v576_v7, %v3601_v33  ;;  %v545_v20 = vadd.f32 %v544_v61, %v3611_v48  ;;  %v1222_v21 = vadd.f32 %v1221_v63, %v1220_v53 }
  0xc7   : > { %v1624_v22 = vadd.f32 %v3675_v23, %v1208_v56  ;;  %v1748_v11 = vsel %vm1747_vm3, %v3687_v58, -inf  ;;  %v1749_v12 = vsel %vm1747_vm3, %v3698_v4, -inf  ;;  %v5398_v13 = vmax.f32 %v3681_v51, 0.0 }
  0xc8   : > { %v1750_v59 = vmax.f32 %v1748_v11, %v1749_v12  ;;  %v628_v3 = vmax.f32 %v3690_v60, 0.0  ;;  %v721_v14 = vrot.slane %v627_v62, 4  ;;  %v1625_v15 = vadd.f32 %v3675_v23, %v1215_v1  ;;  %v578_v11 = vpop.f32.mrf.mxu2 }
  0xc9   : > { %v3717_v16 = vmax.f32 %v1623_v2, 0.0  ;;  %v1751_v17 = vsel %vm1747_vm3, %v3700_v5, -inf  ;;  %v716_v18 = vperm.slane %v710_v8, %v3609_v46  ;;  %v720_v19 = vperm.slane %v712_v29, %v3609_v46 }
  0xca   : > { %v1752_v24 = vmax.f32 %v1750_v59, %v1751_v17  ;;  %v630_v25 = vmax.f32 %v577_v6, 0.0  ;;  %v1626_v26 = vadd.f32 %v3675_v23, %v1222_v21  ;;  %v3724_v27 = vmax.f32 %v1624_v22, 0.0 }
  0xcb   : > { %v1753_v28 = vsel %vm1747_vm3, %v3705_v9, -inf  ;;  %v625_v32 = vmax.f32 %v545_v20, 0.0  ;;  %v3730_v35 = vadd.f32 %v3606_v41, %v3598_v30  ;;  %v767_v37 = vrot.slane %v628_v3, 4 }
  0xcc   : > { %v1754_v36 = vmax.f32 %v1752_v24, %v1753_v28  ;;  %v3735_v38 = vadd.f32 %v605_v31, %v3603_v34  ;;  %v3737_v39 = vmax.f32 %v1625_v15, 0.0  ;;  %v1755_v40 = vsel %vm1747_vm3, %v3717_v16, -inf }
  0xcd   : > { %5463 = vst [vmem:[#allocation8_spill] sm:$0xff] %v3730_v35  ;;  %v722_v42 = vsel %vm653_vm1, %v721_v14, %v625_v32  ;;  %v723_v43 = vrot.slane %v625_v32, 4  ;;  %v735_v44 = vrot.slane %v716_v18, 4  ;;  %v747_v45 = vrot.slane %v720_v19, 4 }
  0xce   : > { %v1756_v47 = vmax.f32 %v1754_v36, %v1755_v40  ;;  %v728_v41 = vperm.slane %v722_v42, %v3609_v46  ;;  %v3743_v49 = vmax.f32 %v1626_v26, 0.0  ;;  %v1757_v50 = vsel %vm1747_vm3, %v3724_v27, -inf }
  0xcf   : > { %v3747_v52 = vrot.slane %v630_v25, 4  ;;  %v724_v53 = vsel %vm653_vm1, %v627_v62, %v723_v43  ;;  %v1759_v61 = vsel %vm1747_vm3, %v3737_v39, -inf  ;;  %v3755_v29 = vsel %vm653_vm1, %v630_v25, %v767_v37 }
  0xd0   : > { %5464 = vst [vmem:[#allocation9_spill] sm:$0xff] %v3743_v49  ;;  %v1758_v54 = vmax.f32 %v1756_v47, %v1757_v50  ;;  %v732_v55 = vperm.slane %v724_v53, %v3609_v46  ;;  %v733_v56 = vrot.slane %v728_v41, 4  ;;  %v736_v57 = vsel %vm653_vm1, %v728_v41, %v735_v44 }
  0xd1   : > { %v631_v63 = vmax.f32 %v3735_v38, 0.0  ;;  %v744_v1 = vperm.slane %v736_v57, %v3622_v0  ;;  %v1761_v6 = vsel %vm1747_vm3, %v3743_v49, -inf  ;;  %v3768_v15 = vadd.f32 %v578_v11, %v3601_v33 }
  0xd2   : > { %v1760_v2 = vmax.f32 %v1758_v54, %v1759_v61  ;;  %v734_v7 = vsel %vm653_vm1, %v733_v56, %v716_v18  ;;  %v745_v62 = vrot.slane %v732_v55, 4  ;;  %v748_v8 = vsel %vm653_vm1, %v732_v55, %v747_v45 }
  0xd3   : > { %v740_v20 = vperm.slane %v734_v7, %v3622_v0  ;;  %v756_v21 = vperm.slane %v748_v8, %v3622_v0  ;;  %v759_v22 = vrot.slane %v744_v1, 4  ;;  %v1112_v14 = vmul.f32 %v3635_v10, %v744_v1 }
  0xd4   : > { %v1762_v12 = vmax.f32 %v1760_v2, %v1761_v6  ;;  %v746_v59 = vsel %vm653_vm1, %v745_v62, %v720_v19 }
  0xd5   : > { %v752_v17 = vperm.slane %v746_v59, %v3622_v0  ;;  %v757_v18 = vrot.slane %v740_v20, 4  ;;  %v760_v24 = vsel %vm653_vm1, 0.0, %v759_v22  ;;  %v763_v25 = vrot.slane %v756_v21, 4 }
  0xd6   : > { %v1868_v26 = vperm.slane %v1762_v12, 0  ;;  %v1110_v28 = vmul.f32 %v3635_v10, %v740_v20  ;;  %v1113_v31 = vmul.f32 %v3635_v10, %v760_v24  ;;  %v3775_v32 = vmul.f32 %v3635_v10, %v756_v21 }
  0xd7   : > { %v758_v19 = vsel %vm653_vm1, 0.0, %v757_v18  ;;  %v761_v36 = vrot.slane %v752_v17, 4  ;;  %v764_v37 = vsel %vm653_vm1, 0.0, %v763_v25  ;;  %v1114_v40 = vmul.f32 %v3635_v10, %v752_v17 }
  0xd8   : > { %v1876_v42 = vsub.f32 %v3687_v58, %v1868_v26  ;;  %v1877_v43 = vsub.f32 %v3698_v4, %v1868_v26  ;;  %v1878_v44 = vsub.f32 %v3700_v5, %v1868_v26  ;;  %v1879_v45 = vsub.f32 %v3705_v9, %v1868_v26 }
  0xd9   : > { %v1880_v47 = vsub.f32 %v3717_v16, %v1868_v26  ;;  %v1881_v41 = vsub.f32 %v3724_v27, %v1868_v26  ;;  %v1882_v50 = vsub.f32 %v3737_v39, %v1868_v26  ;;  %v1883_v53 = vsub.f32 %v3743_v49, %v1868_v26 }
  0xda   : > { %v1940_v54 = vmul.f32 1.442695, %v1876_v42  ;;  %v1942_v55 = vmul.f32 1.442695, %v1877_v43  ;;  %v1944_v56 = vmul.f32 1.442695, %v1878_v44  ;;  %v1111_v57 = vmul.f32 %v3635_v10, %v758_v19 }
  0xdb   : > { %v1946_v61 = vmul.f32 1.442695, %v1879_v45  ;;  %v1948_v1 = vmul.f32 1.442695, %v1880_v47  ;;  %v1950_v2 = vmul.f32 1.442695, %v1881_v41  ;;  %v3790_v7 = vmul.f32 %v3635_v10, %v764_v37 }
  0xdc   : > { %3250 = vpow2.f32 %v1940_v54  ;;  %v1952_v62 = vmul.f32 1.442695, %v1882_v50  ;;  %v1954_v8 = vmul.f32 1.442695, %v1883_v53  ;;  %v762_v6 = vsel %vm653_vm1, 0.0, %v761_v36 }
  0xdd   : > { %3252 = vpow2.f32 %v1942_v55  ;;  %v1115_v20 = vmul.f32 %v3635_v10, %v762_v6  ;;  %v1223_v21 = vsel %vm1166_vm2, %v1110_v28, 0.0  ;;  %v1230_v22 = vsel %vm1166_vm2, %v1111_v57, 0.0 }
  0xde   : > { %3254 = vpow2.f32 %v1944_v56  ;;  %v1224_v11 = vrot.slane %v1223_v21, 4  ;;  %v1231_v12 = vrot.slane %v1230_v22, 4  ;;  %v1237_v59 = vsel %vm1166_vm2, %v1112_v14, 0.0 }
  0xdf   : > { %3256 = vpow2.f32 %v1946_v61  ;;  %v1238_v17 = vrot.slane %v1237_v59, 4  ;;  %v1244_v18 = vsel %vm1166_vm2, %v1113_v31, 0.0  ;;  %v1251_v24 = vsel %vm1166_vm2, %v1114_v40, 0.0 }
  0xe0   : > { %3258 = vpow2.f32 %v1948_v1  ;;  %v1225_v25 = vadd.f32 %v1224_v11, %v1223_v21  ;;  %v1232_v26 = vadd.f32 %v1231_v12, %v1230_v22  ;;  %v1245_v28 = vrot.slane %v1244_v18, 4 }
  0xe1   : > { %3260 = vpow2.f32 %v1950_v2  ;;  %v1239_v19 = vadd.f32 %v1238_v17, %v1237_v59  ;;  %v1252_v36 = vrot.slane %v1251_v24, 4  ;;  %v1258_v37 = vsel %vm1166_vm2, %v1115_v20, 0.0 }
  0xe2   : > { %v3800_v42 = vpop.eup %3250  ;;  %3262 = vpow2.f32 %v1952_v62  ;;  %v1226_v14 = vrot.slane %v1225_v25, 2  ;;  %v1233_v43 = vrot.slane %v1232_v26, 2  ;;  %v1246_v44 = vadd.f32 %v1245_v28, %v1244_v18 }
  0xe3   : > { %v3802_v31 = vpop.eup %3252  ;;  %3264 = vpow2.f32 %v1954_v8  ;;  %v1240_v40 = vrot.slane %v1239_v19, 2  ;;  %v1253_v45 = vadd.f32 %v1252_v36, %v1251_v24  ;;  %v1259_v47 = vrot.slane %v1258_v37, 4 }
  0xe4   : > { %v3804_v41 = vpop.eup %3254  ;;  %v2132_v50 = vrot.slane %v3802_v31, 7  ;;  %v1227_v53 = vadd.f32 %v1226_v14, %v1225_v25  ;;  %v1234_v54 = vadd.f32 %v1233_v43, %v1232_v26  ;;  %v1247_v55 = vrot.slane %v1246_v44, 2 }
  0xe5   : > { %v3807_v56 = vpop.eup %3256  ;;  %v2135_v57 = vrot.slane %v3804_v41, 6  ;;  %v1241_v61 = vadd.f32 %v1240_v40, %v1239_v19  ;;  %v1254_v1 = vrot.slane %v1253_v45, 2  ;;  %v1260_v2 = vadd.f32 %v1259_v47, %v1258_v37 }
  0xe6   : > { %v3810_v62 = vpop.eup %3258  ;;  %v2134_v8 = vsel %vm2133_vm4, %v2132_v50, %v3800_v42  ;;  %v2138_v6 = vrot.slane %v3807_v56, 5  ;;  %v1228_v20 = vrot.slane %v1227_v53, 1  ;;  %v1235_v21 = vrot.slane %v1234_v54, 1 }
  0xe7   : > { %v3815_v22 = vpop.eup %3260  ;;  %v2137_v11 = vsel %vm2136_vm5, %v2135_v57, %v2134_v8  ;;  %v2141_v12 = vrot.slane %v3810_v62, 4  ;;  %v1242_v59 = vrot.slane %v1241_v61, 1  ;;  %v1248_v17 = vadd.f32 %v1247_v55, %v1246_v44 }
  0xe8   : > { %v3819_v18 = vpop.eup %3262  ;;  %v2140_v24 = vsel %vm2139_vm6, %v2138_v6, %v2137_v11  ;;  %v2144_v25 = vrot.slane %v3815_v22, 3  ;;  %v1229_v26 = vadd.f32 %v1228_v20, %v1227_v53  ;;  %v1236_v28 = vadd.f32 %v1235_v21, %v1234_v54 }
  0xe9   : > { %v3823_v19 = vpop.eup %3264  ;;  %v2143_v36 = vsel %vm2142_vm7, %v2141_v12, %v2140_v24  ;;  %v2147_v37 = vrot.slane %v3819_v18, 2  ;;  %v1243_v14 = vadd.f32 %v1242_v59, %v1241_v61  ;;  %v1249_v43 = vrot.slane %v1248_v17, 1 }
  0xea   : > { %5465 = vst [vmem:[#allocation10_spill] sm:$0xff] %v3823_v19  ;;  %v2146_v40 = vsel %vm2145_vm8, %v2144_v25, %v2143_v36  ;;  %v2150_v44 = vrot.slane %v3823_v19, 1  ;;  %v1255_v47 = vadd.f32 %v1254_v1, %v1253_v45  ;;  %v1261_v50 = vrot.slane %v1260_v2, 2  ;;  %v520_v1 = vpop.f32.mrf.mxu0 }
  0xeb   : > { %v2149_v55 = vsel %vm2148_vm9, %v2147_v37, %v2146_v40  ;;  %v1250_v57 = vadd.f32 %v1249_v43, %v1248_v17  ;;  %v1265_v53 = vsel %vm1166_vm2, %v3775_v32, 0.0  ;;  %v1272_v54 = vsel %vm1166_vm2, %v3790_v7, 0.0 }
  0xec   : > { %v2152_v8 = vsel %vm2151_vm10, %v2150_v44, %v2149_v55  ;;  %v1256_v6 = vrot.slane %v1255_v47, 1  ;;  %v1262_v61 = vadd.f32 %v1261_v50, %v1260_v2  ;;  %v1266_v20 = vrot.slane %v1265_v53, 4 }
  0xed   : > { %v2259_v21 = vrot.slane %v2152_v8, 4  ;;  %v1273_v11 = vrot.slane %v1272_v54, 4  ;;  %v1627_v12 = vadd.f32 %v3675_v23, %v1229_v26  ;;  %v1628_v45 = vadd.f32 %v3675_v23, %v1236_v28 }
  0xee   : > { %v1257_v59 = vadd.f32 %v1256_v6, %v1255_v47  ;;  %v1263_v17 = vrot.slane %v1262_v61, 1  ;;  %v1267_v24 = vadd.f32 %v1266_v20, %v1265_v53  ;;  %v1629_v32 = vadd.f32 %v3675_v23, %v1243_v14 }
  0xef   : > { %v2260_v25 = vadd.f32 %v2259_v21, %v2152_v8  ;;  %v1274_v36 = vadd.f32 %v1273_v11, %v1272_v54  ;;  %v1630_v7 = vadd.f32 %v3675_v23, %v1250_v57  ;;  %v3839_v37 = vmax.f32 %v1627_v12, 0.0 }
  0xf0   : > { %v1264_v2 = vadd.f32 %v1263_v17, %v1262_v61  ;;  %v1268_v43 = vrot.slane %v1267_v24, 2  ;;  %v3841_v40 = vmax.f32 %v1628_v45, 0.0  ;;  %v521_v26 = vadd.f32 %v520_v1, %v3598_v30  ;;  %v547_v17 = vpop.f32.mrf.mxu1 }
  0xf1   : > { %v2261_v44 = vrot.slane %v2260_v25, 2  ;;  %v1275_v28 = vrot.slane %v1274_v36, 2  ;;  %v1631_v47 = vadd.f32 %v3675_v23, %v1257_v59  ;;  %v3845_v50 = vmax.f32 %v1629_v32, 0.0 }
  0xf2   : > { %v1269_v55 = vadd.f32 %v1268_v43, %v1267_v24  ;;  %v1632_v14 = vadd.f32 %v3675_v23, %v1264_v2  ;;  %v3848_v53 = vmax.f32 %v1630_v7, 0.0  ;;  %v634_v57 = vmax.f32 %v3768_v15, 0.0  ;;  %v607_v2 = vpop.f32.mrf.mxu3 }
  0xf3   : > { %v2262_v54 = vadd.f32 %v2261_v44, %v2260_v25  ;;  %v1276_v8 = vadd.f32 %v1275_v28, %v1274_v36  ;;  %v1763_v6 = vsel %vm1747_vm3, %v3839_v37, -inf  ;;  %v1764_v61 = vsel %vm1747_vm3, %v3841_v40, -inf }
  0xf4   : > { %v766_v20 = vsel %vm653_vm1, %v3747_v52, %v628_v3  ;;  %v1270_v21 = vrot.slane %v1269_v55, 1  ;;  %v1765_v11 = vmax.f32 %v1763_v6, %v1764_v61  ;;  %v632_v12 = vmax.f32 %v521_v26, 0.0 }
  0xf5   : > { %v2263_v45 = vrot.slane %v2262_v54, 1  ;;  %v1277_v1 = vrot.slane %v1276_v8, 1  ;;  %v3859_v59 = vmax.f32 %v1631_v47, 0.0  ;;  %v1766_v15 = vsel %vm1747_vm3, %v3845_v50, -inf }
  0xf6   : > { %v777_v24 = vrot.slane %v631_v63, 4  ;;  %v1271_v32 = vadd.f32 %v1270_v21, %v1269_v55  ;;  %v1767_v25 = vmax.f32 %v1765_v11, %v1766_v15  ;;  %v821_v60 = vrot.slane %v634_v57, 4 }
  0xf7   : > { %v2264_v36 = vadd.f32 %v2263_v45, %v2262_v54  ;;  %v1278_v7 = vadd.f32 %v1277_v1, %v1276_v8  ;;  %v3865_v3 = vmax.f32 %v1632_v14, 0.0  ;;  %v1768_v52 = vsel %vm1747_vm3, %v3848_v53, -inf }
  0xf8   : > { %v1633_v43 = vadd.f32 %v3675_v23, %v1271_v32  ;;  %v1769_v26 = vmax.f32 %v1767_v25, %v1768_v52  ;;  %v823_v44 = vrot.slane %v632_v12, 4  ;;  %v548_v28 = vadd.f32 %v547_v17, %v3611_v48 }
  0xf9   : > { %3266 = vrcp.f32 %v2264_v36  ;;  %v772_v47 = vperm.slane %v766_v20, %v3609_v46  ;;  %v1634_v55 = vadd.f32 %v3675_v23, %v1278_v7  ;;  %v1770_v54 = vsel %vm1747_vm3, %v3859_v59, -inf }
  0xfa   : > { %v3875_v14 = vmax.f32 %v1633_v43, 0.0  ;;  %v1771_v8 = vmax.f32 %v1769_v26, %v1770_v54  ;;  %v3878_v6 = vadd.f32 %v607_v2, %v3603_v34  ;;  %v629_v61 = vmax.f32 %v548_v28, 0.0 }
  0xfb   : > { %v5397_v21 = vmax.f32 %v3730_v35, 0.0  ;;  %v3881_v11 = vmax.f32 %v1634_v55, 0.0  ;;  %v1772_v45 = vsel %vm1747_vm3, %v3865_v3, -inf  ;;  %v822_v20 = vsel %vm653_vm1, %v821_v60, %v632_v12 }
  0xfc   : > { %v1773_v1 = vmax.f32 %v1771_v8, %v1772_v45  ;;  %v824_v15 = vsel %vm653_vm1, %v634_v57, %v823_v44  ;;  %v778_v17 = vsel %vm653_vm1, %v777_v24, %v629_v61  ;;  %v779_v32 = vrot.slane %v629_v61, 4 }
  0xfd   : > { %5466 = vst [vmem:[#allocation11_spill] sm:$0xff] %v3881_v11  ;;  %v776_v25 = vperm.slane %v3755_v29, %v3609_v46  ;;  %v791_v36 = vrot.slane %v772_v47, 4  ;;  %v1774_v7 = vsel %vm1747_vm3, %v3875_v14, -inf  ;;  %v784_v52 = vperm.slane %v778_v17, %v3609_v46 }
  0xfe   : > { %v1775_v2 = vmax.f32 %v1773_v1, %v1774_v7  ;;  %v3894_v43 = vperm.slane %v822_v20, %v3609_v46  ;;  %v5399_v12 = vmax.f32 %v3878_v6, 0.0  ;;  %v780_v57 = vsel %vm653_vm1, %v631_v63, %v779_v32 }
  0xff   : > { %v3267_v24 = vpop.eup %3266  ;;  %v1776_v29 = vsel %vm1747_vm3, %v3881_v11, -inf  ;;  %v3903_v60 = vperm.slane %v824_v15, %v3609_v46  ;;  %v789_v28 = vrot.slane %v784_v52, 4  ;;  %v3909_v55 = vrot.slane %v5398_v13, 4 }
 0x100   : > { %v3905_v26 = vperm.slane %v3267_v24, 0  ;;  %v1777_v44 = vmax.f32 %v1775_v2, %v1776_v29  ;;  %v803_v54 = vrot.slane %v776_v25, 4  ;;  %v788_v38 = vperm.slane %v780_v57, %v3609_v46 }
 0x101   : > { %5467 = vst [vmem:[#allocation12_spill] sm:$0xff] %v3903_v60  ;;  %v792_v63 = vsel %vm653_vm1, %v784_v52, %v791_v36  ;;  %v3915_v8 = vrot.slane %v5397_v21, 4  ;;  %v3922_v20 = vrot.slane %v5399_v12, 4  ;;  %v523_v36 = vpop.f32.mrf.mxu0 }
 0x102   : > { %5468 = vst [vmem:[#allocation13_spill] sm:$0xff] %v3905_v26  ;;  %v2324_v61 = vmul.f32 %v3802_v31, %v3905_v26  ;;  %v2323_v1 = vmul.f32 %v3800_v42, %v3905_v26  ;;  %v2325_v15 = vmul.f32 %v3804_v41, %v3905_v26  ;;  %v1869_v17 = vperm.slane %v1777_v44, 0 }
 0x103   : > { %5469 = vst [vmem:[#allocation14_spill] sm:$0xff] %v3909_v55  ;;  %v2326_v7 = vmul.f32 %v3807_v56, %v3905_v26  ;;  %v790_v31 = vsel %vm653_vm1, %v789_v28, %v772_v47  ;;  %v800_v52 = vperm.slane %v792_v63, %v3622_v0  ;;  %v3934_v2 = vadd.f32 %v523_v36, %v3598_v30 }
 0x104   : > { %5470 = vst [vmem:[#allocation15_spill] sm:$0xff] %v3915_v8  ;;  %v3937_v57 = vmul.f32 %v2324_v61, %v3698_v4  ;;  %v1884_v42 = vsub.f32 %v3839_v37, %v1869_v17  ;;  %v801_v41 = vrot.slane %v788_v38, 4  ;;  %v804_v24 = vsel %vm653_vm1, %v788_v38, %v803_v54 }
 0x105   : > { %v2327_v29 = vmul.f32 %v3810_v62, %v3905_v26  ;;  %v3945_v56 = vmul.f32 %v3815_v22, %v3905_v26  ;;  %v3949_v47 = vmul.f32 %v3819_v18, %v3905_v26  ;;  %v1885_v44 = vsub.f32 %v3841_v40, %v1869_v17 }
 0x106   : > { %v3953_v4 = vmul.f32 %v2323_v1, %v3687_v58  ;;  %v3956_v28 = vmul.f32 %v2325_v15, %v3700_v5  ;;  %v1886_v54 = vsub.f32 %v3845_v50, %v1869_v17  ;;  %v1887_v62 = vsub.f32 %v3848_v53, %v1869_v17 }
 0x107   : > { %v3961_v38 = vmul.f32 %v2326_v7, %v3705_v9  ;;  %v1888_v22 = vsub.f32 %v3859_v59, %v1869_v17  ;;  %v1889_v18 = vsub.f32 %v3865_v3, %v1869_v17  ;;  %v1890_v63 = vsub.f32 %v3875_v14, %v1869_v17 }
 0x108   : > { %v1891_v58 = vsub.f32 %v3881_v11, %v1869_v17  ;;  %v1956_v1 = vmul.f32 1.442695, %v1884_v42  ;;  %v1958_v5 = vmul.f32 1.442695, %v1885_v44  ;;  %v3969_v15 = vmul.f32 %v2327_v29, %v3717_v16 }
 0x109   : > { %v1960_v36 = vmul.f32 1.442695, %v1886_v54  ;;  %v1962_v21 = vmul.f32 1.442695, %v1887_v62  ;;  %v1964_v13 = vmul.f32 1.442695, %v1888_v22  ;;  %v796_v45 = vperm.slane %v790_v31, %v3622_v0 }
 0x10a   : > { %5471 = vst [vmem:[#allocation16_spill] sm:$0xff] %v3969_v15  ;;  %3268 = vpow2.f32 %v1956_v1  ;;  %v1966_v9 = vmul.f32 1.442695, %v1889_v18  ;;  %v1968_v7 = vmul.f32 1.442695, %v1890_v63  ;;  %v802_v12 = vsel %vm653_vm1, %v801_v41, %v776_v25 }
 0x10b   : > { %v1970_v32 = vmul.f32 1.442695, %v1891_v58  ;;  %3270 = vpow2.f32 %v1958_v5  ;;  %v812_v61 = vperm.slane %v804_v24, %v3622_v0  ;;  %v808_v17 = vperm.slane %v802_v12, %v3622_v0 }
 0x10c   : > { %3272 = vpow2.f32 %v1960_v36  ;;  %v815_v42 = vrot.slane %v800_v52, 4  ;;  %v1120_v16 = vmul.f32 %v3635_v10, %v800_v52  ;;  %v813_v29 = vrot.slane %v796_v45, 4 }
 0x10d   : > { %3274 = vpow2.f32 %v1962_v21  ;;  %v819_v44 = vrot.slane %v812_v61, 4  ;;  %v1118_v54 = vmul.f32 %v3635_v10, %v796_v45  ;;  %v817_v22 = vrot.slane %v808_v17, 4 }
 0x10e   : > { %3276 = vpow2.f32 %v1964_v13  ;;  %v816_v62 = vsel %vm653_vm1, 0.0, %v815_v42  ;;  %v1122_v31 = vmul.f32 %v3635_v10, %v808_v17  ;;  %v814_v25 = vsel %vm653_vm1, 0.0, %v813_v29 }
 0x10f   : > { %3278 = vpow2.f32 %v1966_v9  ;;  %v820_v41 = vsel %vm653_vm1, 0.0, %v819_v44  ;;  %v1121_v12 = vmul.f32 %v3635_v10, %v816_v62  ;;  %v818_v21 = vsel %vm653_vm1, 0.0, %v817_v22 }
 0x110   : > { %v3982_v24 = vpop.eup %3268  ;;  %3280 = vpow2.f32 %v1968_v7  ;;  %v1119_v45 = vmul.f32 %v3635_v10, %v814_v25  ;;  %v1124_v13 = vmul.f32 %v3635_v10, %v812_v61  ;;  %v1123_v18 = vmul.f32 %v3635_v10, %v818_v21 }
 0x111   : > { %v3987_v52 = vpop.eup %3270  ;;  %3282 = vpow2.f32 %v1970_v32  ;;  %v1125_v63 = vmul.f32 %v3635_v10, %v820_v41  ;;  %v1279_v58 = vsel %vm1166_vm2, %v1118_v54, 0.0  ;;  %v1293_v7 = vsel %vm1166_vm2, %v1120_v16, 0.0 }
 0x112   : > { %v3992_v1 = vpop.eup %3272  ;;  %v2153_v5 = vrot.slane %v3987_v52, 7  ;;  %v1280_v36 = vrot.slane %v1279_v58, 4  ;;  %v1286_v9 = vsel %vm1166_vm2, %v1119_v45, 0.0  ;;  %v1294_v42 = vrot.slane %v1293_v7, 4 }
 0x113   : > { %v3997_v17 = vpop.eup %3274  ;;  %v2155_v61 = vrot.slane %v3992_v1, 6  ;;  %v1287_v32 = vrot.slane %v1286_v9, 4  ;;  %v1300_v29 = vsel %vm1166_vm2, %v1121_v12, 0.0 }
 0x114   : > { %v4001_v10 = vpop.eup %3276  ;;  %v2154_v44 = vsel %vm2133_vm4, %v2153_v5, %v3982_v24  ;;  %v2157_v54 = vrot.slane %v3997_v17, 5  ;;  %v1281_v62 = vadd.f32 %v1280_v36, %v1279_v58  ;;  %v1301_v22 = vrot.slane %v1300_v29, 4 }
 0x115   : > { %v4006_v25 = vpop.eup %3278  ;;  %v2156_v16 = vsel %vm2136_vm5, %v2155_v61, %v2154_v44  ;;  %v2159_v41 = vrot.slane %v4001_v10, 4  ;;  %v1288_v21 = vadd.f32 %v1287_v32, %v1286_v9  ;;  %v1295_v45 = vadd.f32 %v1294_v42, %v1293_v7 }
 0x116   : > { %v4010_v11 = vpop.eup %3280  ;;  %v2158_v12 = vsel %vm2139_vm6, %v2157_v54, %v2156_v16  ;;  %v2161_v49 = vrot.slane %v4006_v25, 3  ;;  %v1282_v19 = vrot.slane %v1281_v62, 2  ;;  %v1302_v5 = vadd.f32 %v1301_v22, %v1300_v29 }
 0x117   : > { %v4014_v26 = vpop.eup %3282  ;;  %v2160_v58 = vsel %vm2142_vm7, %v2159_v41, %v2158_v12  ;;  %v2163_v36 = vrot.slane %v4010_v11, 2  ;;  %v1289_v35 = vrot.slane %v1288_v21, 2  ;;  %v1296_v61 = vrot.slane %v1295_v45, 2 }
 0x118   : > { %5472 = vst [vmem:[#allocation17_spill] sm:$0xff] %v4014_v26  ;;  %v2162_v44 = vsel %vm2145_vm8, %v2161_v49, %v2160_v58  ;;  %v2165_v9 = vrot.slane %v4014_v26, 1  ;;  %v1283_v7 = vadd.f32 %v1282_v19, %v1281_v62  ;;  %v1303_v32 = vrot.slane %v1302_v5, 2 }
 0x119   : > { %v2164_v42 = vsel %vm2148_vm9, %v2163_v36, %v2162_v44  ;;  %v1290_v54 = vadd.f32 %v1289_v35, %v1288_v21  ;;  %v1297_v16 = vadd.f32 %v1296_v61, %v1295_v45  ;;  %v1307_v29 = vsel %vm1166_vm2, %v1122_v31, 0.0 }
 0x11a   : > { %v2166_v22 = vsel %vm2151_vm10, %v2165_v9, %v2164_v42  ;;  %v1284_v8 = vrot.slane %v1283_v7, 1  ;;  %v1304_v41 = vadd.f32 %v1303_v32, %v1302_v5  ;;  %v1308_v12 = vrot.slane %v1307_v29, 4 }
 0x11b   : > { %v2265_v51 = vrot.slane %v2166_v22, 4  ;;  %v1291_v55 = vrot.slane %v1290_v54, 1  ;;  %v1298_v60 = vrot.slane %v1297_v16, 1  ;;  %v1314_v49 = vsel %vm1166_vm2, %v1123_v18, 0.0 }
 0x11c   : > { %v1285_v58 = vadd.f32 %v1284_v8, %v1283_v7  ;;  %v1305_v26 = vrot.slane %v1304_v41, 1  ;;  %v1309_v19 = vadd.f32 %v1308_v12, %v1307_v29  ;;  %v1315_v62 = vrot.slane %v1314_v49, 4 }
 0x11d   : > { %v2266_v0 = vadd.f32 %v2265_v51, %v2166_v22  ;;  %v1292_v36 = vadd.f32 %v1291_v55, %v1290_v54  ;;  %v1299_v35 = vadd.f32 %v1298_v60, %v1297_v16  ;;  %v1321_v21 = vsel %vm1166_vm2, %v1124_v13, 0.0 }
 0x11e   : > { %v1306_v31 = vadd.f32 %v1305_v26, %v1304_v41  ;;  %v1310_v45 = vrot.slane %v1309_v19, 2  ;;  %v1316_v61 = vadd.f32 %v1315_v62, %v1314_v49  ;;  %v1322_v44 = vrot.slane %v1321_v21, 4 }
 0x11f   : > { %v2267_v5 = vrot.slane %v2266_v0, 2  ;;  %v1328_v9 = vsel %vm1166_vm2, %v1125_v63, 0.0  ;;  %v1635_v32 = vadd.f32 %v3675_v23, %v1285_v58  ;;  %v1636_v18 = vadd.f32 %v3675_v23, %v1292_v36 }
 0x120   : > { %v1311_v8 = vadd.f32 %v1310_v45, %v1309_v19  ;;  %v1317_v7 = vrot.slane %v1316_v61, 2  ;;  %v1323_v42 = vadd.f32 %v1322_v44, %v1321_v21  ;;  %v1329_v29 = vrot.slane %v1328_v9, 4 }
 0x121   : > { %v2268_v51 = vadd.f32 %v2267_v5, %v2266_v0  ;;  %v1637_v60 = vadd.f32 %v3675_v23, %v1299_v35  ;;  %v1638_v55 = vadd.f32 %v3675_v23, %v1306_v31  ;;  %v4030_v26 = vmax.f32 %v1635_v32, 0.0 }
 0x122   : > { %v1312_v13 = vrot.slane %v1311_v8, 1  ;;  %v1318_v54 = vadd.f32 %v1317_v7, %v1316_v61  ;;  %v1324_v16 = vrot.slane %v1323_v42, 2  ;;  %v1330_v22 = vadd.f32 %v1329_v29, %v1328_v9 }
 0x123   : > { %v2517_v63 = vrot.slane %v3956_v28, 6  ;;  %v2269_v41 = vrot.slane %v2268_v51, 1  ;;  %v4033_v12 = vmax.f32 %v1636_v18, 0.0  ;;  %v4035_v49 = vmax.f32 %v1637_v60, 0.0 }
 0x124   : > { %v1313_v58 = vadd.f32 %v1312_v13, %v1311_v8  ;;  %v1319_v19 = vrot.slane %v1318_v54, 1  ;;  %v1325_v0 = vadd.f32 %v1324_v16, %v1323_v42  ;;  %v1331_v62 = vrot.slane %v1330_v22, 2  ;;  %v610_v13 = vpop.f32.mrf.mxu3 }
 0x125   : > { %v2270_v36 = vadd.f32 %v2269_v41, %v2268_v51  ;;  %v4037_v35 = vmax.f32 %v1638_v55, 0.0  ;;  %v1778_v21 = vsel %vm1747_vm3, %v4030_v26, -inf  ;;  %v1779_v31 = vsel %vm1747_vm3, %v4033_v12, -inf  ;;  %v581_v51 = vpop.f32.mrf.mxu2 }
 0x126   : > { %v1320_v45 = vadd.f32 %v1319_v19, %v1318_v54  ;;  %v1326_v28 = vrot.slane %v1325_v0, 1  ;;  %v1332_v61 = vadd.f32 %v1331_v62, %v1330_v22  ;;  %v1639_v44 = vadd.f32 %v3675_v23, %v1313_v58  ;;  %v549_v62 = vpop.f32.mrf.mxu1 }
 0x127   : > { %v5473_v5 = vrot.slane %v3937_v57, 7  ;;  %3284 = vrcp.f32 %v2270_v36  ;;  %v1780_v32 = vmax.f32 %v1778_v21, %v1779_v31  ;;  %v1781_v18 = vsel %vm1747_vm3, %v4035_v49, -inf }
 0x128   : > { %v1327_v8 = vadd.f32 %v1326_v28, %v1325_v0  ;;  %v1333_v7 = vrot.slane %v1332_v61, 1  ;;  %v1640_v42 = vadd.f32 %v3675_v23, %v1320_v45  ;;  %v4051_v29 = vmax.f32 %v1639_v44, 0.0  ;;  %v525_v28 = vpop.f32.mrf.mxu0 }
 0x129   : > { %v2516_v9 = vsel %vm2133_vm4, %v5473_v5, %v3953_v4  ;;  %v1782_v60 = vmax.f32 %v1780_v32, %v1781_v18  ;;  %v1783_v55 = vsel %vm1747_vm3, %v4037_v35, -inf  ;;  %v636_v57 = vmax.f32 %v3934_v2, 0.0 }
 0x12a   : > { %v582_v4 = vadd.f32 %v581_v51, %v3601_v33  ;;  %v1334_v54 = vadd.f32 %v1333_v7, %v1332_v61  ;;  %v1641_v16 = vadd.f32 %v3675_v23, %v1327_v8  ;;  %v4058_v22 = vmax.f32 %v1640_v42, 0.0 }
 0x12b   : > { %v4061_v41 = vadd.f32 %v610_v13, %v3603_v34  ;;  %v4065_v58 = vmul.f32 %v3945_v56, %v3724_v27  ;;  %v4069_v19 = vmul.f32 %v3949_v47, %v3737_v39  ;;  %v1784_v2 = vmax.f32 %v1782_v60, %v1783_v55 }
 0x12c   : > { %5474 = vst [vmem:[#allocation18_spill] sm:$0xff] %v4058_v22  ;;  %v638_v0 = vmax.f32 %v582_v4, 0.0  ;;  %v2519_v36 = vrot.slane %v3961_v38, 5  ;;  %v1642_v21 = vadd.f32 %v3675_v23, %v1334_v54  ;;  %v4073_v31 = vmax.f32 %v1641_v16, 0.0 }
 0x12d   : > { %5475 = vst [vmem:[#allocation19_spill] sm:$0xff] %v4065_v58  ;;  %v1785_v45 = vsel %vm1747_vm3, %v4051_v29, -inf  ;;  %v3285_v61 = vpop.eup %3284  ;;  %v2518_v27 = vsel %vm2136_vm5, %v2517_v63, %v2516_v9  ;;  %v879_v47 = vrot.slane %v636_v57, 4  ;;  %v1787_v38 = vsel %vm1747_vm3, %v4058_v22, -inf }
 0x12e   : > { %5476 = vst [vmem:[#allocation20_spill] sm:$0xff] %v4069_v19  ;;  %v1786_v39 = vmax.f32 %v1784_v2, %v1785_v45  ;;  %v4079_v44 = vperm.slane %v3285_v61, 0  ;;  %v5411_v23 = vmax.f32 %v4061_v41, 0.0  ;;  %v550_v5 = vadd.f32 %v549_v62, %v3611_v48 }
 0x12f   : > { %v4085_v32 = vmax.f32 %v1642_v21, 0.0  ;;  %v877_v8 = vrot.slane %v638_v0, 4  ;;  %v4088_v7 = vadd.f32 %v525_v28, %v3598_v30  ;;  %v1789_v51 = vsel %vm1747_vm3, %v4073_v31, -inf }
 0x130   : > { %v1788_v18 = vmax.f32 %v1786_v39, %v1787_v38  ;;  %v2332_v63 = vmul.f32 %v3987_v52, %v4079_v44  ;;  %v2333_v9 = vmul.f32 %v3992_v1, %v4079_v44  ;;  %v2334_v42 = vmul.f32 %v3997_v17, %v4079_v44 }
 0x131   : > { %5477 = vst [vmem:[#allocation21_spill] sm:$0xff] %v4085_v32  ;;  %v2331_v60 = vmul.f32 %v3982_v24, %v4079_v44  ;;  %v2335_v55 = vmul.f32 %v4001_v10, %v4079_v44  ;;  %v880_v4 = vsel %vm653_vm1, %v638_v0, %v879_v47  ;;  %v2336_v1 = vmul.f32 %v4006_v25, %v4079_v44 }
 0x132   : > { %v1790_v30 = vmax.f32 %v1788_v18, %v1789_v51  ;;  %v4107_v13 = vmul.f32 %v2332_v63, %v3841_v40  ;;  %v633_v17 = vmax.f32 %v550_v5, 0.0  ;;  %v4110_v54 = vmul.f32 %v2333_v9, %v3845_v50 }
 0x133   : > { %v4113_v24 = vmul.f32 %v2334_v42, %v3848_v53  ;;  %v4116_v10 = vmul.f32 %v2335_v55, %v3859_v59  ;;  %v1791_v16 = vsel %vm1747_vm3, %v4085_v32, -inf  ;;  %v4121_v2 = vsel %vm2139_vm6, %v2519_v36, %v2518_v27 }
 0x134   : > { %5479 = vst [vmem:[#allocation23_spill] sm:$0xff] %v4121_v2  ;;  %v1792_v25 = vmax.f32 %v1790_v30, %v1791_v16  ;;  %v4124_v40 = vperm.slane %v880_v4, %v3609_v46  ;;  %v4128_v50 = vrot.slane %v5411_v23, 4  ;;  %v2337_v53 = vmul.f32 %v4010_v11, %v4079_v44 }
 0x135   : > { %5478 = vst [vmem:[#allocation22_spill] sm:$0xff] %v4116_v10  ;;  %v4133_v59 = vmul.f32 %v2331_v60, %v3839_v37  ;;  %v4136_v0 = vsel %vm653_vm1, %v877_v8, %v636_v57  ;;  %v4140_v36 = vmul.f32 %v2336_v1, %v3865_v3  ;;  %v834_v28 = vsel %vm653_vm1, %v3922_v20, %v633_v17 }
 0x136   : > { %v1870_v45 = vperm.slane %v1792_v25, 0  ;;  %v835_v27 = vrot.slane %v633_v17, 4  ;;  %v840_v47 = vperm.slane %v834_v28, %v3609_v46  ;;  %v4157_v8 = vmul.f32 %v2337_v53, %v3875_v14 }
 0x137   : > { %5480 = vst [vmem:[#allocation24_spill] sm:$0xff] %v4140_v36  ;;  %v5482_v30 = vmax.f32 %v3878_v6, 0.0  ;;  %v5483_v53 = vrot.slane %v3894_v43, 4 }
 0x138   : > { %v1892_v57 = vsub.f32 %v4030_v26, %v1870_v45  ;;  %v1893_v39 = vsub.f32 %v4033_v12, %v1870_v45  ;;  %v1894_v3 = vsub.f32 %v4035_v49, %v1870_v45  ;;  %v1895_v38 = vsub.f32 %v4037_v35, %v1870_v45  ;;  %5481 = vst [vmem:[#allocation25_spill] sm:$0xff] %v4157_v8 }
 0x139   : > { %v1896_v5 = vsub.f32 %v4051_v29, %v1870_v45  ;;  %v1897_v20 = vsub.f32 %v4058_v22, %v1870_v45  ;;  %v1898_v18 = vsub.f32 %v4073_v31, %v1870_v45  ;;  %v1899_v60 = vsub.f32 %v4085_v32, %v1870_v45 }
 0x13a   : > { %v1972_v63 = vmul.f32 1.442695, %v1892_v57  ;;  %v1974_v9 = vmul.f32 1.442695, %v1893_v39  ;;  %v1976_v42 = vmul.f32 1.442695, %v1894_v3  ;;  %v836_v4 = vsel %vm653_vm1, %v5482_v30, %v835_v27 }
 0x13b   : > { %v1978_v55 = vmul.f32 1.442695, %v1895_v38  ;;  %v1980_v1 = vmul.f32 1.442695, %v1896_v5  ;;  %v1982_v17 = vmul.f32 1.442695, %v1897_v20  ;;  %v844_v16 = vperm.slane %v836_v4, %v3609_v46 }
 0x13c   : > { %3286 = vpow2.f32 %v1972_v63  ;;  %v1984_v14 = vmul.f32 1.442695, %v1898_v18  ;;  %v845_v25 = vrot.slane %v840_v47, 4  ;;  %v848_v28 = vsel %vm653_vm1, %v840_v47, %v5483_v53  ;;  %v5484_v57 = vld [vmem:[#allocation6_spill] sm:$0xff]  ;;  %v5485_v3 = vld [vmem:[#allocation12_spill] sm:$0xff] }
 0x13d   : > { %3288 = vpow2.f32 %v1974_v9  ;;  %v856_v45 = vperm.slane %v848_v28, %v5484_v57  ;;  %v857_v39 = vrot.slane %v844_v16, 4  ;;  %v5486_v6 = vrot.slane %v5485_v3, 4 }
 0x13e   : > { %3290 = vpow2.f32 %v1976_v42  ;;  %v1986_v38 = vmul.f32 1.442695, %v1899_v60  ;;  %v846_v5 = vsel %vm653_vm1, %v845_v25, %v3894_v43  ;;  %v4182_v60 = vld [vmem:[%s5388_s3] sm:$0xf] }
 0x13f   : > { %v860_v27 = vsel %vm653_vm1, %v844_v16, %v5486_v6  ;;  %3292 = vpow2.f32 %v1978_v55  ;;  %v852_v18 = vperm.slane %v846_v5, %v5484_v57  ;;  %v858_v47 = vsel %vm653_vm1, %v857_v39, %v5485_v3 }
 0x140   : > { %v868_v20 = vperm.slane %v860_v27, %v5484_v57  ;;  %3294 = vpow2.f32 %v1980_v1  ;;  %v871_v63 = vrot.slane %v856_v45, 4  ;;  %v864_v9 = vperm.slane %v858_v47, %v5484_v57 }
 0x141   : > { %3296 = vpow2.f32 %v1982_v17  ;;  %v1128_v43 = vmul.f32 %v4182_v60, %v856_v45  ;;  %v869_v30 = vrot.slane %v852_v18, 4  ;;  %v1126_v1 = vmul.f32 %v4182_v60, %v852_v18 }
 0x142   : > { %v875_v42 = vrot.slane %v868_v20, 4  ;;  %v4185_v55 = vpop.eup %3286  ;;  %3298 = vpow2.f32 %v1984_v14  ;;  %v872_v4 = vsel %vm653_vm1, 0.0, %v871_v63  ;;  %v873_v17 = vrot.slane %v864_v9, 4 }
 0x143   : > { %v4189_v16 = vpop.eup %3288  ;;  %3300 = vpow2.f32 %v1986_v38  ;;  %v1129_v53 = vmul.f32 %v4182_v60, %v872_v4  ;;  %v870_v39 = vsel %vm653_vm1, 0.0, %v869_v30  ;;  %v1130_v14 = vmul.f32 %v4182_v60, %v864_v9 }
 0x144   : > { %v876_v25 = vsel %vm653_vm1, 0.0, %v875_v42  ;;  %v4193_v28 = vpop.eup %3290  ;;  %v2167_v45 = vrot.slane %v4189_v16, 7  ;;  %v1132_v3 = vmul.f32 %v4182_v60, %v868_v20  ;;  %v874_v38 = vsel %vm653_vm1, 0.0, %v873_v17 }
 0x145   : > { %v4199_v6 = vpop.eup %3292  ;;  %v2169_v27 = vrot.slane %v4193_v28, 6  ;;  %v1127_v5 = vmul.f32 %v4182_v60, %v870_v39  ;;  %v1133_v18 = vmul.f32 %v4182_v60, %v876_v25  ;;  %v1131_v9 = vmul.f32 %v4182_v60, %v874_v38 }
 0x146   : > { %v4205_v47 = vpop.eup %3294  ;;  %v2168_v63 = vsel %vm2133_vm4, %v2167_v45, %v4185_v55  ;;  %v2171_v42 = vrot.slane %v4199_v6, 5  ;;  %v1335_v20 = vsel %vm1166_vm2, %v1126_v1, 0.0  ;;  %v1349_v38 = vsel %vm1166_vm2, %v1128_v43, 0.0 }
 0x147   : > { %v4212_v30 = vpop.eup %3296  ;;  %v2170_v4 = vsel %vm2136_vm5, %v2169_v27, %v2168_v63  ;;  %v2173_v17 = vrot.slane %v4205_v47, 4  ;;  %v1336_v39 = vrot.slane %v1335_v20, 4  ;;  %v1342_v25 = vsel %vm1166_vm2, %v1127_v5, 0.0 }
 0x148   : > { %v4217_v51 = vpop.eup %3298  ;;  %v2172_v37 = vsel %vm2139_vm6, %v2171_v42, %v2170_v4  ;;  %v2175_v45 = vrot.slane %v4212_v30, 3  ;;  %v1343_v52 = vrot.slane %v1342_v25, 4  ;;  %v1350_v23 = vrot.slane %v1349_v38, 4 }
 0x149   : > { %v4222_v56 = vpop.eup %3300  ;;  %v2174_v1 = vsel %vm2142_vm7, %v2173_v17, %v2172_v37  ;;  %v2177_v27 = vrot.slane %v4217_v51, 2  ;;  %v1337_v63 = vadd.f32 %v1336_v39, %v1335_v20  ;;  %v1356_v42 = vsel %vm1166_vm2, %v1129_v53, 0.0 }
 0x14a   : > { %v2176_v11 = vsel %vm2145_vm8, %v2175_v45, %v2174_v1  ;;  %v2179_v5 = vrot.slane %v4222_v56, 1  ;;  %v1344_v62 = vadd.f32 %v1343_v52, %v1342_v25  ;;  %v1351_v21 = vadd.f32 %v1350_v23, %v1349_v38 }
 0x14b   : > { %v2178_v4 = vsel %vm2148_vm9, %v2177_v27, %v2176_v11  ;;  %v1338_v61 = vrot.slane %v1337_v63, 2  ;;  %v1357_v43 = vrot.slane %v1356_v42, 4  ;;  %v1363_v37 = vsel %vm1166_vm2, %v1130_v14, 0.0 }
 0x14c   : > { %v2180_v36 = vsel %vm2151_vm10, %v2179_v5, %v2178_v4  ;;  %v1345_v10 = vrot.slane %v1344_v62, 2  ;;  %v1370_v20 = vsel %vm1166_vm2, %v1131_v9, 0.0  ;;  %v1352_v45 = vrot.slane %v1351_v21, 2 }
 0x14d   : > { %v2271_v17 = vrot.slane %v2180_v36, 4  ;;  %v1339_v39 = vadd.f32 %v1338_v61, %v1337_v63  ;;  %v1358_v1 = vadd.f32 %v1357_v43, %v1356_v42  ;;  %v1364_v52 = vrot.slane %v1363_v37, 4 }
 0x14e   : > { %v1346_v19 = vadd.f32 %v1345_v10, %v1344_v62  ;;  %v1371_v25 = vrot.slane %v1370_v20, 4  ;;  %v1377_v53 = vsel %vm1166_vm2, %v1132_v3, 0.0  ;;  %v1353_v23 = vadd.f32 %v1352_v45, %v1351_v21 }
 0x14f   : > { %v2272_v11 = vadd.f32 %v2271_v17, %v2180_v36  ;;  %v1340_v27 = vrot.slane %v1339_v39, 1  ;;  %v1359_v38 = vrot.slane %v1358_v1, 2  ;;  %v1365_v5 = vadd.f32 %v1364_v52, %v1363_v37 }
 0x150   : > { %v1347_v15 = vrot.slane %v1346_v19, 1  ;;  %v1372_v4 = vadd.f32 %v1371_v25, %v1370_v20  ;;  %v1378_v2 = vrot.slane %v1377_v53, 4  ;;  %v1354_v9 = vrot.slane %v1353_v23, 1 }
 0x151   : > { %v2273_v14 = vrot.slane %v2272_v11, 2  ;;  %v1341_v32 = vadd.f32 %v1340_v27, %v1339_v39  ;;  %v1360_v22 = vadd.f32 %v1359_v38, %v1358_v1  ;;  %v1366_v63 = vrot.slane %v1365_v5, 2  ;;  %v4238_v39 = vld [vmem:[%s5389_s4] ss:$0 sm:$0xff] }
 0x152   : > { %v1348_v61 = vadd.f32 %v1347_v15, %v1346_v19  ;;  %v1373_v42 = vrot.slane %v1372_v4, 2  ;;  %v1379_v10 = vadd.f32 %v1378_v2, %v1377_v53  ;;  %v1355_v43 = vadd.f32 %v1354_v9, %v1353_v23 }
 0x153   : > { %v2274_v62 = vadd.f32 %v2273_v14, %v2272_v11  ;;  %v1361_v58 = vrot.slane %v1360_v22, 1  ;;  %v1384_v36 = vsel %vm1166_vm2, %v1133_v18, 0.0  ;;  %v1367_v3 = vadd.f32 %v1366_v63, %v1365_v5  ;;  %v583_v5 = vpop.f32.mrf.mxu2 }
 0x154   : > { %v1374_v21 = vadd.f32 %v1373_v42, %v1372_v4  ;;  %v1380_v17 = vrot.slane %v1379_v10, 2  ;;  %v1385_v45 = vrot.slane %v1384_v36, 4  ;;  %v1643_v15 = vadd.f32 %v4238_v39, %v1341_v32 }
 0x155   : > { %v2275_v37 = vrot.slane %v2274_v62, 1  ;;  %v1362_v20 = vadd.f32 %v1361_v58, %v1360_v22  ;;  %v1644_v19 = vadd.f32 %v4238_v39, %v1348_v61  ;;  %v1368_v2 = vrot.slane %v1367_v3, 1 }
 0x156   : > { %v1375_v1 = vrot.slane %v1374_v21, 1  ;;  %v1381_v52 = vadd.f32 %v1380_v17, %v1379_v10  ;;  %v1386_v25 = vadd.f32 %v1385_v45, %v1384_v36  ;;  %v1645_v53 = vadd.f32 %v4238_v39, %v1355_v43 }
 0x157   : > { %v2276_v18 = vadd.f32 %v2275_v37, %v2274_v62  ;;  %v1646_v11 = vadd.f32 %v4238_v39, %v1362_v20  ;;  %v4244_v27 = vmax.f32 %v1643_v15, 0.0  ;;  %v1369_v22 = vadd.f32 %v1368_v2, %v1367_v3 }
 0x158   : > { %v1376_v58 = vadd.f32 %v1375_v1, %v1374_v21  ;;  %v1382_v23 = vrot.slane %v1381_v52, 1  ;;  %v1387_v38 = vrot.slane %v1386_v25, 2  ;;  %v4247_v4 = vmax.f32 %v1644_v19, 0.0  ;;  %v552_v19 = vpop.f32.mrf.mxu1 }
 0x159   : > { %3302 = vrcp.f32 %v2276_v18  ;;  %v584_v14 = vadd.f32 %v583_v5, %v3601_v33  ;;  %v1647_v63 = vadd.f32 %v4238_v39, %v1369_v22  ;;  %v4251_v42 = vmax.f32 %v1645_v53, 0.0 }
 0x15a   : > { %v1383_v9 = vadd.f32 %v1382_v23, %v1381_v52  ;;  %v1388_v61 = vadd.f32 %v1387_v38, %v1386_v25  ;;  %v5487_v10 = vrot.slane %v4107_v13, 7  ;;  %v4259_v43 = vperm.slane %v4136_v0, %v3609_v46  ;;  %v612_v13 = vpop.f32.mrf.mxu3 }
 0x15b   : > { %v4261_v36 = vmax.f32 %v1646_v11, 0.0  ;;  %v1794_v3 = vsel %vm1747_vm3, %v4247_v4, -inf  ;;  %v915_v21 = vrot.slane %v4124_v40, 4  ;;  %v1648_v45 = vadd.f32 %v4238_v39, %v1376_v58 }
 0x15c   : > { %v2530_v62 = vsel %vm2133_vm4, %v5487_v10, %v4133_v59  ;;  %v1389_v17 = vrot.slane %v1388_v61, 1  ;;  %v1793_v37 = vsel %vm1747_vm3, %v4244_v27, -inf  ;;  %v1649_v59 = vadd.f32 %v4238_v39, %v1383_v9 }
 0x15d   : > { %v4270_v20 = vmax.f32 %v1647_v63, 0.0  ;;  %v1795_v0 = vmax.f32 %v1793_v37, %v1794_v3  ;;  %v642_v15 = vmax.f32 %v584_v14, 0.0  ;;  %v5488_v2 = vrot.slane %v4110_v54, 6 }
 0x15e   : > { %v1390_v52 = vadd.f32 %v1389_v17, %v1388_v61  ;;  %v1796_v25 = vsel %vm1747_vm3, %v4251_v42, -inf  ;;  %v5489_v18 = vmax.f32 %v4088_v7, 0.0  ;;  %v903_v22 = vrot.slane %v4259_v43, 4 }
 0x15f   : > { %v2532_v1 = vsel %vm2136_vm5, %v5488_v2, %v2530_v62  ;;  %v3303_v11 = vpop.eup %3302  ;;  %v1797_v58 = vmax.f32 %v1795_v0, %v1796_v25  ;;  %v1798_v23 = vsel %vm1747_vm3, %v4261_v36, -inf  ;;  %v4283_v38 = vadd.f32 %v612_v13, %v3603_v34 }
 0x160   : > { %v935_v53 = vrot.slane %v5489_v18, 4  ;;  %v4285_v54 = vperm.slane %v3303_v11, 0  ;;  %v1650_v5 = vadd.f32 %v4238_v39, %v1390_v52  ;;  %v4288_v14 = vmax.f32 %v1648_v45, 0.0  ;;  %v586_v11 = vpop.f32.mrf.mxu2 }
 0x161   : > { %v553_v9 = vadd.f32 %v552_v19, %v3611_v48  ;;  %v4291_v61 = vmax.f32 %v1649_v59, 0.0  ;;  %v1799_v63 = vmax.f32 %v1797_v58, %v1798_v23  ;;  %v1800_v10 = vsel %vm1747_vm3, %v4270_v20, -inf }
 0x162   : > { %5490 = vst [vmem:[#allocation12_spill] sm:$0xff] %v4288_v14  ;;  %v933_v62 = vrot.slane %v642_v15, 4  ;;  %v2340_v3 = vmul.f32 %v4189_v16, %v4285_v54  ;;  %v2341_v17 = vmul.f32 %v4193_v28, %v4285_v54  ;;  %v2342_v37 = vmul.f32 %v4199_v6, %v4285_v54 }
 0x163   : > { %5491 = vst [vmem:[#allocation26_spill] sm:$0xff] %v4291_v61  ;;  %v936_v45 = vsel %vm653_vm1, %v642_v15, %v935_v53  ;;  %v2339_v13 = vmul.f32 %v4185_v55, %v4285_v54  ;;  %v2343_v59 = vmul.f32 %v4205_v47, %v4285_v54  ;;  %v1801_v0 = vmax.f32 %v1799_v63, %v1800_v10 }
 0x164   : > { %v5419_v19 = vmax.f32 %v4283_v38, 0.0  ;;  %v2345_v16 = vmul.f32 %v4217_v51, %v4285_v54  ;;  %v4309_v2 = vmax.f32 %v1650_v5, 0.0  ;;  %v1802_v28 = vsel %vm1747_vm3, %v4288_v14, -inf }
 0x165   : > { %v637_v6 = vmax.f32 %v553_v9, 0.0  ;;  %v5493_v15 = vrot.slane %v4113_v24, 5  ;;  %v4319_v55 = vmul.f32 %v2340_v3, %v4033_v12  ;;  %v1803_v47 = vmax.f32 %v1801_v0, %v1802_v28 }
 0x166   : > { %5492 = vst [vmem:[#allocation27_spill] sm:$0xff] %v4309_v2  ;;  %v1804_v25 = vsel %vm1747_vm3, %v4291_v61, -inf  ;;  %v4324_v51 = vmul.f32 %v2341_v17, %v4035_v49  ;;  %v4327_v18 = vmul.f32 %v2342_v37, %v4037_v35  ;;  %v5496_v53 = vmax.f32 %v4088_v7, 0.0 }
 0x167   : > { %v4316_v52 = vsel %vm2139_vm6, %v5493_v15, %v2532_v1  ;;  %v4333_v1 = vperm.slane %v936_v45, %v3609_v46  ;;  %v4336_v12 = vmul.f32 %v2339_v13, %v4030_v26  ;;  %v4339_v58 = vmul.f32 %v2343_v59, %v4051_v29 }
 0x168   : > { %5494 = vst [vmem:[#allocation28_spill] sm:$0xff] %v4316_v52  ;;  %v934_v24 = vsel %vm653_vm1, %v933_v62, %v5496_v53  ;;  %v1805_v23 = vmax.f32 %v1803_v47, %v1804_v25  ;;  %v4343_v49 = vrot.slane %v5419_v19, 4  ;;  %v4346_v35 = vmul.f32 %v2345_v16, %v4073_v31 }
 0x169   : > { %5495 = vst [vmem:[#allocation29_spill] sm:$0xff] %v4327_v18  ;;  %v1806_v7 = vsel %vm1747_vm3, %v4309_v2, -inf  ;;  %v890_v5 = vsel %vm653_vm1, %v4128_v50, %v637_v6  ;;  %v891_v9 = vrot.slane %v637_v6, 4  ;;  %v4355_v10 = vadd.f32 %v586_v11, %v3601_v33 }
 0x16a   : > { %5497 = vst [vmem:[#allocation30_spill] sm:$0xff] %v4339_v58  ;;  %v1807_v63 = vmax.f32 %v1805_v23, %v1806_v7  ;;  %v896_v29 = vperm.slane %v890_v5, %v3609_v46  ;;  %v4360_v3 = vperm.slane %v934_v24, %v3609_v46  ;;  %v5499_v17 = vmax.f32 %v4061_v41, 0.0 }
 0x16b   : > { %5498 = vst [vmem:[#allocation31_spill] sm:$0xff] %v4346_v35 }
 0x16c   : > { %v892_v50 = vsel %vm653_vm1, %v5499_v17, %v891_v9  ;;  %v1871_v45 = vperm.slane %v1807_v63, 0  ;;  %v901_v13 = vrot.slane %v896_v29, 4  ;;  %v904_v59 = vsel %vm653_vm1, %v896_v29, %v903_v22 }
 0x16d   : > { %v900_v16 = vperm.slane %v892_v50, %v3609_v46  ;;  %v912_v28 = vperm.slane %v904_v59, %v5484_v57 }
 0x16e   : > { %v1900_v15 = vsub.f32 %v4244_v27, %v1871_v45  ;;  %v1901_v41 = vsub.f32 %v4247_v4, %v1871_v45  ;;  %v1902_v47 = vsub.f32 %v4251_v42, %v1871_v45  ;;  %v1903_v25 = vsub.f32 %v4261_v36, %v1871_v45 }
 0x16f   : > { %v1904_v53 = vsub.f32 %v4270_v20, %v1871_v45  ;;  %v1905_v22 = vsub.f32 %v4288_v14, %v1871_v45  ;;  %v1906_v24 = vsub.f32 %v4291_v61, %v1871_v45  ;;  %v1907_v11 = vsub.f32 %v4309_v2, %v1871_v45 }
 0x170   : > { %v1988_v23 = vmul.f32 1.442695, %v1900_v15  ;;  %v1990_v7 = vmul.f32 1.442695, %v1901_v41  ;;  %v1992_v5 = vmul.f32 1.442695, %v1902_v47  ;;  %v902_v9 = vsel %vm653_vm1, %v901_v13, %v4259_v43 }
 0x171   : > { %v1994_v63 = vmul.f32 1.442695, %v1903_v25  ;;  %v1996_v29 = vmul.f32 1.442695, %v1904_v53  ;;  %v1998_v17 = vmul.f32 1.442695, %v1905_v22  ;;  %v908_v50 = vperm.slane %v902_v9, %v5484_v57 }
 0x172   : > { %3304 = vpow2.f32 %v1988_v23  ;;  %v2000_v59 = vmul.f32 1.442695, %v1906_v24  ;;  %v2002_v0 = vmul.f32 1.442695, %v1907_v11  ;;  %v913_v37 = vrot.slane %v900_v16, 4 }
 0x173   : > { %3306 = vpow2.f32 %v1990_v7  ;;  %v916_v45 = vsel %vm653_vm1, %v900_v16, %v915_v21  ;;  %v925_v15 = vrot.slane %v908_v50, 4  ;;  %v927_v41 = vrot.slane %v912_v28, 4 }
 0x174   : > { %3308 = vpow2.f32 %v1992_v5  ;;  %v914_v43 = vsel %vm653_vm1, %v913_v37, %v4124_v40  ;;  %v924_v13 = vperm.slane %v916_v45, %v5484_v57  ;;  %v1134_v47 = vmul.f32 %v4182_v60, %v908_v50 }
 0x175   : > { %3310 = vpow2.f32 %v1994_v63  ;;  %v920_v25 = vperm.slane %v914_v43, %v5484_v57  ;;  %v926_v53 = vsel %vm653_vm1, 0.0, %v925_v15  ;;  %v928_v22 = vsel %vm653_vm1, 0.0, %v927_v41 }
 0x176   : > { %3312 = vpow2.f32 %v1996_v29  ;;  %v931_v24 = vrot.slane %v924_v13, 4  ;;  %v1135_v21 = vmul.f32 %v4182_v60, %v926_v53  ;;  %v1136_v16 = vmul.f32 %v4182_v60, %v912_v28 }
 0x177   : > { %3314 = vpow2.f32 %v1998_v17  ;;  %v929_v11 = vrot.slane %v920_v25, 4  ;;  %v1137_v40 = vmul.f32 %v4182_v60, %v928_v22  ;;  %v1138_v37 = vmul.f32 %v4182_v60, %v920_v25 }
 0x178   : > { %v4396_v23 = vpop.eup %3304  ;;  %3316 = vpow2.f32 %v2000_v59  ;;  %v932_v7 = vsel %vm653_vm1, 0.0, %v931_v24  ;;  %v1140_v5 = vmul.f32 %v4182_v60, %v924_v13  ;;  %v1391_v9 = vsel %vm1166_vm2, %v1134_v47, 0.0 }
 0x179   : > { %v4401_v63 = vpop.eup %3306  ;;  %3318 = vpow2.f32 %v2002_v0  ;;  %v930_v28 = vsel %vm653_vm1, 0.0, %v929_v11  ;;  %v1141_v29 = vmul.f32 %v4182_v60, %v932_v7  ;;  %v1392_v17 = vrot.slane %v1391_v9, 4 }
 0x17a   : > { %v4405_v50 = vpop.eup %3308  ;;  %v2181_v45 = vrot.slane %v4401_v63, 7  ;;  %v1139_v59 = vmul.f32 %v4182_v60, %v930_v28  ;;  %v1398_v15 = vsel %vm1166_vm2, %v1135_v21, 0.0  ;;  %v1405_v41 = vsel %vm1166_vm2, %v1136_v16, 0.0 }
 0x17b   : > { %v4411_v43 = vpop.eup %3310  ;;  %v2183_v13 = vrot.slane %v4405_v50, 6  ;;  %v1393_v0 = vadd.f32 %v1392_v17, %v1391_v9  ;;  %v1399_v47 = vrot.slane %v1398_v15, 4  ;;  %v1406_v25 = vrot.slane %v1405_v41, 4 }
 0x17c   : > { %v4414_v53 = vpop.eup %3312  ;;  %v2182_v22 = vsel %vm2133_vm4, %v2181_v45, %v4396_v23  ;;  %v2185_v24 = vrot.slane %v4411_v43, 5  ;;  %v1412_v11 = vsel %vm1166_vm2, %v1137_v40, 0.0  ;;  %v1419_v21 = vsel %vm1166_vm2, %v1138_v37, 0.0 }
 0x17d   : > { %v4421_v7 = vpop.eup %3314  ;;  %v2184_v16 = vsel %vm2136_vm5, %v2183_v13, %v2182_v22  ;;  %v2187_v28 = vrot.slane %v4414_v53, 4  ;;  %v1394_v9 = vrot.slane %v1393_v0, 2  ;;  %v1400_v17 = vadd.f32 %v1399_v47, %v1398_v15 }
 0x17e   : > { %v4425_v31 = vpop.eup %3316  ;;  %v2186_v32 = vsel %vm2139_vm6, %v2185_v24, %v2184_v16  ;;  %v2189_v45 = vrot.slane %v4421_v7, 3  ;;  %v1407_v19 = vadd.f32 %v1406_v25, %v1405_v41  ;;  %v1413_v62 = vrot.slane %v1412_v11, 4 }
 0x17f   : > { %v4429_v6 = vpop.eup %3318  ;;  %v2188_v40 = vsel %vm2142_vm7, %v2187_v28, %v2186_v32  ;;  %v2191_v37 = vrot.slane %v4425_v31, 2  ;;  %v1395_v26 = vadd.f32 %v1394_v9, %v1393_v0  ;;  %v1401_v13 = vrot.slane %v1400_v17, 2 }
 0x180   : > { %v2190_v22 = vsel %vm2145_vm8, %v2189_v45, %v2188_v40  ;;  %v2193_v15 = vrot.slane %v4429_v6, 1  ;;  %v1408_v47 = vrot.slane %v1407_v19, 2  ;;  %v1414_v35 = vadd.f32 %v1413_v62, %v1412_v11 }
 0x181   : > { %v2192_v24 = vsel %vm2148_vm9, %v2191_v37, %v2190_v22  ;;  %v1396_v16 = vrot.slane %v1395_v26, 1  ;;  %v1402_v58 = vadd.f32 %v1401_v13, %v1400_v17  ;;  %v1420_v41 = vrot.slane %v1419_v21, 4 }
 0x182   : > { %v2194_v25 = vsel %vm2151_vm10, %v2193_v15, %v2192_v24  ;;  %v1409_v18 = vadd.f32 %v1408_v47, %v1407_v19  ;;  %v1415_v8 = vrot.slane %v1414_v35, 2  ;;  %v1426_v32 = vsel %vm1166_vm2, %v1139_v59, 0.0 }
 0x183   : > { %v2277_v28 = vrot.slane %v2194_v25, 4  ;;  %v1397_v0 = vadd.f32 %v1396_v16, %v1395_v26  ;;  %v1403_v9 = vrot.slane %v1402_v58, 1  ;;  %v1421_v52 = vadd.f32 %v1420_v41, %v1419_v21 }
 0x184   : > { %v1410_v45 = vrot.slane %v1409_v18, 1  ;;  %v1416_v40 = vadd.f32 %v1415_v8, %v1414_v35  ;;  %v1427_v2 = vrot.slane %v1426_v32, 4  ;;  %v1433_v62 = vsel %vm1166_vm2, %v1140_v5, 0.0 }
 0x185   : > { %v2278_v11 = vadd.f32 %v2277_v28, %v2194_v25  ;;  %v1404_v37 = vadd.f32 %v1403_v9, %v1402_v58  ;;  %v1422_v22 = vrot.slane %v1421_v52, 2  ;;  %v1434_v17 = vrot.slane %v1433_v62, 4 }
 0x186   : > { %v1411_v13 = vadd.f32 %v1410_v45, %v1409_v18  ;;  %v1417_v61 = vrot.slane %v1416_v40, 1  ;;  %v1428_v15 = vadd.f32 %v1427_v2, %v1426_v32  ;;  %v1440_v19 = vsel %vm1166_vm2, %v1141_v29, 0.0 }
 0x187   : > { %v2279_v47 = vrot.slane %v2278_v11, 2  ;;  %v1423_v59 = vadd.f32 %v1422_v22, %v1421_v52  ;;  %v1435_v24 = vadd.f32 %v1434_v17, %v1433_v62  ;;  %v1441_v26 = vrot.slane %v1440_v19, 4 }
 0x188   : > { %v1418_v16 = vadd.f32 %v1417_v61, %v1416_v40  ;;  %v1429_v21 = vrot.slane %v1428_v15, 2  ;;  %v1651_v8 = vadd.f32 %v4238_v39, %v1397_v0  ;;  %v1652_v35 = vadd.f32 %v4238_v39, %v1404_v37 }
 0x189   : > { %v2280_v5 = vadd.f32 %v2279_v47, %v2278_v11  ;;  %v1424_v41 = vrot.slane %v1423_v59, 1  ;;  %v1436_v58 = vrot.slane %v1435_v24, 2  ;;  %v1442_v25 = vadd.f32 %v1441_v26, %v1440_v19 }
 0x18a   : > { %v1430_v28 = vadd.f32 %v1429_v21, %v1428_v15  ;;  %v1653_v18 = vadd.f32 %v4238_v39, %v1411_v13  ;;  %v1654_v2 = vadd.f32 %v4238_v39, %v1418_v16  ;;  %v4444_v29 = vmax.f32 %v1651_v8, 0.0 }
 0x18b   : > { %v2281_v52 = vrot.slane %v2280_v5, 1  ;;  %v1425_v32 = vadd.f32 %v1424_v41, %v1423_v59  ;;  %v1437_v9 = vadd.f32 %v1436_v58, %v1435_v24  ;;  %v1443_v61 = vrot.slane %v1442_v25, 2 }
 0x18c   : > { %v1431_v45 = vrot.slane %v1430_v28, 1  ;;  %v4446_v40 = vmax.f32 %v1652_v35, 0.0  ;;  %v4448_v0 = vmax.f32 %v1653_v18, 0.0  ;;  %v4450_v62 = vmax.f32 %v1654_v2, 0.0  ;;  %v554_v2 = vpop.f32.mrf.mxu1 }
 0x18d   : > { %v2282_v11 = vadd.f32 %v2281_v52, %v2280_v5  ;;  %v1438_v37 = vrot.slane %v1437_v9, 1  ;;  %v1444_v22 = vadd.f32 %v1443_v61, %v1442_v25  ;;  %v1655_v17 = vadd.f32 %v4238_v39, %v1425_v32  ;;  %v5503_v25 = vld [vmem:[#allocation14_spill] sm:$0xff] }
 0x18e   : > { %v5500_v13 = vrot.slane %v4319_v55, 7  ;;  %v1432_v19 = vadd.f32 %v1431_v45, %v1430_v28  ;;  %v1808_v47 = vsel %vm1747_vm3, %v4444_v29, -inf  ;;  %v1809_v59 = vsel %vm1747_vm3, %v4446_v40, -inf }
 0x18f   : > { %3320 = vrcp.f32 %v2282_v11  ;;  %v1439_v24 = vadd.f32 %v1438_v37, %v1437_v9  ;;  %v1445_v26 = vrot.slane %v1444_v22, 1  ;;  %v1811_v16 = vsel %vm1747_vm3, %v4448_v0, -inf  ;;  %v5506_v9 = vld [vmem:[#allocation7_spill] sm:$0xff]  ;;  %v615_v37 = vpop.f32.mrf.mxu3 }
 0x190   : > { %v2544_v15 = vsel %vm2133_vm4, %v5500_v13, %v4336_v12  ;;  %v1656_v21 = vadd.f32 %v4238_v39, %v1432_v19  ;;  %v4464_v8 = vmax.f32 %v1655_v17, 0.0  ;;  %v1810_v55 = vmax.f32 %v1808_v47, %v1809_v59 }
 0x191   : > { %v5502_v12 = vmax.f32 %v4355_v10, 0.0  ;;  %v1446_v5 = vadd.f32 %v1445_v26, %v1444_v22  ;;  %v1657_v41 = vadd.f32 %v4238_v39, %v1439_v24  ;;  %v1813_v58 = vsel %vm1747_vm3, %v4450_v62, -inf  ;;  %v588_v26 = vpop.f32.mrf.mxu2 }
 0x192   : > { %5501 = vst [vmem:[#allocation32_spill] sm:$0xff] %v4464_v8  ;;  %v4475_v52 = vmax.f32 %v1656_v21, 0.0  ;;  %v1812_v32 = vmax.f32 %v1810_v55, %v1811_v16  ;;  %v5507_v61 = vmax.f32 %v5506_v9, 0.0  ;;  %v4490_v13 = vadd.f32 %v615_v37, %v3603_v34 }
 0x193   : > { %v989_v35 = vrot.slane %v5502_v12, 4  ;;  %v5504_v28 = vmov %v5502_v12  ;;  %v1658_v22 = vadd.f32 %v4238_v39, %v1446_v5  ;;  %v4484_v17 = vmax.f32 %v1657_v41, 0.0 }
 0x194   : > { %v992_v18 = vsel %vm653_vm1, %v5504_v28, %v5503_v25  ;;  %5505 = vst [vmem:[#allocation14_spill] sm:$0xff] %v4475_v52  ;;  %v959_v19 = vrot.slane %v4360_v3, 4  ;;  %v971_v47 = vrot.slane %v4333_v1, 4  ;;  %v1814_v59 = vmax.f32 %v1812_v32, %v1813_v58 }
 0x195   : > { %v990_v45 = vsel %vm653_vm1, %v989_v35, %v5507_v61  ;;  %v4481_v11 = vperm.slane %v992_v18, %v3609_v46  ;;  %5508 = vst [vmem:[#allocation7_spill] sm:$0xff] %v4484_v17  ;;  %v555_v24 = vadd.f32 %v554_v2, %v3611_v48  ;;  %v3321_v16 = vpop.eup %3320  ;;  %v5509_v21 = vrot.slane %v4324_v51, 6 }
 0x196   : > { %v4487_v10 = vperm.slane %v990_v45, %v3609_v46  ;;  %v1815_v12 = vsel %vm1747_vm3, %v4464_v8, -inf  ;;  %v1817_v35 = vsel %vm1747_vm3, %v4475_v52, -inf  ;;  %v4505_v41 = vperm.slane %v3321_v16, 0 }
 0x197   : > { %v4498_v55 = vsel %vm2136_vm5, %v5509_v21, %v2544_v15  ;;  %v4507_v58 = vmax.f32 %v1658_v22, 0.0  ;;  %v1816_v25 = vmax.f32 %v1814_v59, %v1815_v12  ;;  %v641_v28 = vmax.f32 %v555_v24, 0.0 }
 0x198   : > { %5510 = vst [vmem:[#allocation33_spill] sm:$0xff] %v4498_v55  ;;  %v1819_v51 = vsel %vm1747_vm3, %v4484_v17, -inf  ;;  %v5426_v18 = vmax.f32 %v4490_v13, 0.0  ;;  %v4514_v2 = vadd.f32 %v588_v26, %v3601_v33  ;;  %v2347_v32 = vmul.f32 %v4396_v23, %v4505_v41 }
 0x199   : > { %5511 = vst [vmem:[#allocation34_spill] sm:$0xff] %v4507_v58  ;;  %v2348_v9 = vmul.f32 %v4401_v63, %v4505_v41  ;;  %v2349_v61 = vmul.f32 %v4405_v50, %v4505_v41  ;;  %v2350_v45 = vmul.f32 %v4411_v43, %v4505_v41  ;;  %v2351_v37 = vmul.f32 %v4414_v53, %v4505_v41 }
 0x19a   : > { %v1818_v22 = vmax.f32 %v1816_v25, %v1817_v35  ;;  %v946_v33 = vsel %vm653_vm1, %v4343_v49, %v641_v28  ;;  %v947_v59 = vrot.slane %v641_v28, 4  ;;  %v1821_v50 = vsel %vm1747_vm3, %v4507_v58, -inf }
 0x19b   : > { %v2412_v24 = vmul.f32 %v2348_v9, %v4247_v4  ;;  %v4530_v23 = vmul.f32 %v2349_v61, %v4251_v42  ;;  %v4533_v63 = vmul.f32 %v2350_v45, %v4261_v36  ;;  %v4539_v53 = vrot.slane %v5426_v18, 4 }
 0x19c   : > { %v1820_v43 = vmax.f32 %v1818_v22, %v1819_v51  ;;  %v5513_v26 = vmax.f32 %v4283_v38, 0.0  ;;  %v952_v4 = vperm.slane %v946_v33, %v3609_v46  ;;  %v2411_v42 = vmul.f32 %v2347_v32, %v4244_v27 }
 0x19d   : > { %5512 = vst [vmem:[#allocation35_spill] sm:$0xff] %v4533_v63  ;;  %v4547_v16 = vmul.f32 %v2351_v37, %v4270_v20  ;;  %v2557_v36 = vrot.slane %v2412_v24, 7 }
 0x19e   : > { %v948_v49 = vsel %vm653_vm1, %v5513_v26, %v947_v59  ;;  %v1822_v35 = vmax.f32 %v1820_v43, %v1821_v50  ;;  %v957_v25 = vrot.slane %v952_v4, 4  ;;  %v960_v28 = vsel %vm653_vm1, %v952_v4, %v959_v19 }
 0x19f   : > { %5514 = vst [vmem:[#allocation36_spill] sm:$0xff] %v4547_v16  ;;  %v956_v21 = vperm.slane %v948_v49, %v3609_v46  ;;  %v968_v51 = vperm.slane %v960_v28, %v5484_v57  ;;  %v4556_v27 = vsel %vm2133_vm4, %v2557_v36, %v2411_v42 }
 0x1a0   : > { %v1872_v20 = vperm.slane %v1822_v35, 0  ;;  %v958_v32 = vsel %vm653_vm1, %v957_v25, %v4360_v3 }
 0x1a1   : > { %v969_v9 = vrot.slane %v956_v21, 4  ;;  %v972_v61 = vsel %vm653_vm1, %v956_v21, %v971_v47  ;;  %v964_v37 = vperm.slane %v958_v32, %v5484_v57  ;;  %v983_v22 = vrot.slane %v968_v51, 4 }
 0x1a2   : > { %v980_v45 = vperm.slane %v972_v61, %v5484_v57  ;;  %v1144_v33 = vmul.f32 %v4182_v60, %v968_v51  ;;  %v1908_v59 = vsub.f32 %v4444_v29, %v1872_v20  ;;  %v1909_v47 = vsub.f32 %v4446_v40, %v1872_v20 }
 0x1a3   : > { %v970_v19 = vsel %vm653_vm1, %v969_v9, %v4333_v1  ;;  %v1910_v24 = vsub.f32 %v4448_v0, %v1872_v20  ;;  %v1911_v50 = vsub.f32 %v4450_v62, %v1872_v20  ;;  %v1912_v3 = vsub.f32 %v4464_v8, %v1872_v20 }
 0x1a4   : > { %v1913_v43 = vsub.f32 %v4475_v52, %v1872_v20  ;;  %v1914_v26 = vsub.f32 %v4484_v17, %v1872_v20  ;;  %v1915_v49 = vsub.f32 %v4507_v58, %v1872_v20  ;;  %v2004_v1 = vmul.f32 1.442695, %v1908_v59 }
 0x1a5   : > { %v2006_v4 = vmul.f32 1.442695, %v1909_v47  ;;  %v2008_v42 = vmul.f32 1.442695, %v1910_v24  ;;  %v976_v36 = vperm.slane %v970_v19, %v5484_v57  ;;  %v2010_v21 = vmul.f32 1.442695, %v1911_v50 }
 0x1a6   : > { %v2012_v35 = vmul.f32 1.442695, %v1912_v3  ;;  %v2014_v25 = vmul.f32 1.442695, %v1913_v43  ;;  %v1142_v28 = vmul.f32 %v4182_v60, %v964_v37  ;;  %3322 = vpow2.f32 %v2004_v1 }
 0x1a7   : > { %v2016_v51 = vmul.f32 1.442695, %v1914_v26  ;;  %v2018_v9 = vmul.f32 1.442695, %v1915_v49  ;;  %v981_v61 = vrot.slane %v964_v37, 4  ;;  %3324 = vpow2.f32 %v2006_v4 }
 0x1a8   : > { %v984_v32 = vsel %vm653_vm1, 0.0, %v983_v22  ;;  %v985_v38 = vrot.slane %v976_v36, 4  ;;  %v987_v5 = vrot.slane %v980_v45, 4  ;;  %3326 = vpow2.f32 %v2008_v42 }
 0x1a9   : > { %v982_v20 = vsel %vm653_vm1, 0.0, %v981_v61  ;;  %v1145_v59 = vmul.f32 %v4182_v60, %v984_v32  ;;  %v1146_v19 = vmul.f32 %v4182_v60, %v976_v36  ;;  %3328 = vpow2.f32 %v2010_v21 }
 0x1aa   : > { %v986_v47 = vsel %vm653_vm1, 0.0, %v985_v38  ;;  %v988_v24 = vsel %vm653_vm1, 0.0, %v987_v5  ;;  %v1143_v50 = vmul.f32 %v4182_v60, %v982_v20  ;;  %3330 = vpow2.f32 %v2012_v35 }
 0x1ab   : > { %v1147_v37 = vmul.f32 %v4182_v60, %v986_v47  ;;  %v4584_v22 = vmul.f32 %v4182_v60, %v980_v45  ;;  %v4587_v3 = vmul.f32 %v4182_v60, %v988_v24  ;;  %3332 = vpow2.f32 %v2014_v25 }
 0x1ac   : > { %v1447_v43 = vsel %vm1166_vm2, %v1142_v28, 0.0  ;;  %v1454_v26 = vsel %vm1166_vm2, %v1143_v50, 0.0  ;;  %v1461_v38 = vsel %vm1166_vm2, %v1144_v33, 0.0  ;;  %v4592_v49 = vpop.eup %3322  ;;  %3334 = vpow2.f32 %v2016_v51 }
 0x1ad   : > { %v1448_v5 = vrot.slane %v1447_v43, 4  ;;  %v1455_v1 = vrot.slane %v1454_v26, 4  ;;  %v1462_v4 = vrot.slane %v1461_v38, 4  ;;  %v4594_v42 = vpop.eup %3324  ;;  %3336 = vpow2.f32 %v2018_v9 }
 0x1ae   : > { %v1468_v45 = vsel %vm1166_vm2, %v1145_v59, 0.0  ;;  %v1475_v60 = vsel %vm1166_vm2, %v1146_v19, 0.0  ;;  %v1482_v36 = vsel %vm1166_vm2, %v1147_v37, 0.0  ;;  %v4599_v21 = vpop.eup %3326  ;;  %v2195_v35 = vrot.slane %v4594_v42, 7 }
 0x1af   : > { %v1449_v33 = vadd.f32 %v1448_v5, %v1447_v43  ;;  %v1456_v25 = vadd.f32 %v1455_v1, %v1454_v26  ;;  %v1463_v28 = vadd.f32 %v1462_v4, %v1461_v38  ;;  %v4602_v51 = vpop.eup %3328  ;;  %v2197_v61 = vrot.slane %v4599_v21, 6 }
 0x1b0   : > { %v1469_v32 = vrot.slane %v1468_v45, 4  ;;  %v1476_v20 = vrot.slane %v1475_v60, 4  ;;  %v1483_v9 = vrot.slane %v1482_v36, 4  ;;  %v4605_v47 = vpop.eup %3330  ;;  %v2196_v59 = vsel %vm2133_vm4, %v2195_v35, %v4592_v49 }
 0x1b1   : > { %5515 = vst [vmem:[#allocation37_spill] sm:$0xff] %v4605_v47  ;;  %v2199_v19 = vrot.slane %v4602_v51, 5  ;;  %v1450_v24 = vrot.slane %v1449_v33, 2  ;;  %v1457_v50 = vrot.slane %v1456_v25, 2  ;;  %v4610_v37 = vpop.eup %3332  ;;  %v2198_v43 = vsel %vm2136_vm5, %v2197_v61, %v2196_v59 }
 0x1b2   : > { %5516 = vst [vmem:[#allocation38_spill] sm:$0xff] %v4610_v37  ;;  %v2201_v26 = vrot.slane %v4605_v47, 4  ;;  %v1464_v38 = vrot.slane %v1463_v28, 2  ;;  %v1470_v5 = vadd.f32 %v1469_v32, %v1468_v45  ;;  %v4614_v1 = vpop.eup %3334  ;;  %v2203_v15 = vrot.slane %v4610_v37, 3 }
 0x1b3   : > { %5517 = vst [vmem:[#allocation39_spill] sm:$0xff] %v4614_v1  ;;  %v2200_v4 = vsel %vm2139_vm6, %v2199_v19, %v2198_v43  ;;  %v1451_v18 = vadd.f32 %v1450_v24, %v1449_v33  ;;  %v1458_v35 = vadd.f32 %v1457_v50, %v1456_v25  ;;  %v4618_v12 = vpop.eup %3336  ;;  %v2205_v55 = vrot.slane %v4614_v1, 2  ;;  %v2712_v1 = vld [vmem:[#allocation2 + $0xe8] sm:$0xff] }
 0x1b4   : > { %5518 = vst [vmem:[#allocation40_spill] sm:$0xff] %v4618_v12  ;;  %v2202_v63 = vsel %vm2142_vm7, %v2201_v26, %v2200_v4  ;;  %v1465_v58 = vadd.f32 %v1464_v38, %v1463_v28  ;;  %v1471_v61 = vrot.slane %v1470_v5, 2  ;;  %v2207_v45 = vrot.slane %v4618_v12, 1 }
 0x1b5   : > { %v2204_v59 = vsel %vm2145_vm8, %v2203_v15, %v2202_v63  ;;  %v1452_v32 = vrot.slane %v1451_v18, 1  ;;  %v1459_v17 = vrot.slane %v1458_v35, 1  ;;  %v1477_v33 = vadd.f32 %v1476_v20, %v1475_v60 }
 0x1b6   : > { %v2206_v19 = vsel %vm2148_vm9, %v2205_v55, %v2204_v59  ;;  %v1466_v43 = vrot.slane %v1465_v58, 1  ;;  %v1472_v52 = vadd.f32 %v1471_v61, %v1470_v5  ;;  %v1484_v26 = vadd.f32 %v1483_v9, %v1482_v36 }
 0x1b7   : > { %v2208_v25 = vsel %vm2151_vm10, %v2207_v45, %v2206_v19  ;;  %v1453_v24 = vadd.f32 %v1452_v32, %v1451_v18  ;;  %v1460_v50 = vadd.f32 %v1459_v17, %v1458_v35  ;;  %v1478_v38 = vrot.slane %v1477_v33, 2  ;;  %v557_v18 = vpop.f32.mrf.mxu1 }
 0x1b8   : > { %v2283_v4 = vrot.slane %v2208_v25, 4  ;;  %v1467_v8 = vadd.f32 %v1466_v43, %v1465_v58  ;;  %v1473_v28 = vrot.slane %v1472_v52, 1  ;;  %v1485_v14 = vrot.slane %v1484_v26, 2 }
 0x1b9   : > { %v1489_v15 = vsel %vm1166_vm2, %v4584_v22, 0.0  ;;  %v1496_v63 = vsel %vm1166_vm2, %v4587_v3, 0.0  ;;  %v1659_v55 = vadd.f32 %v4238_v39, %v1453_v24  ;;  %v1479_v20 = vadd.f32 %v1478_v38, %v1477_v33 }
 0x1ba   : > { %v2284_v5 = vadd.f32 %v2283_v4, %v2208_v25  ;;  %v1474_v60 = vadd.f32 %v1473_v28, %v1472_v52  ;;  %v1490_v61 = vrot.slane %v1489_v15, 4  ;;  %v1486_v17 = vadd.f32 %v1485_v14, %v1484_v26 }
 0x1bb   : > { %v1497_v36 = vrot.slane %v1496_v63, 4  ;;  %v1660_v58 = vadd.f32 %v4238_v39, %v1460_v50  ;;  %v1661_v9 = vadd.f32 %v4238_v39, %v1467_v8  ;;  %v1480_v59 = vrot.slane %v1479_v20, 1 }
 0x1bc   : > { %v2285_v35 = vrot.slane %v2284_v5, 2  ;;  %v1491_v45 = vadd.f32 %v1490_v61, %v1489_v15  ;;  %v1662_v22 = vadd.f32 %v4238_v39, %v1474_v60  ;;  %v1487_v32 = vrot.slane %v1486_v17, 1 }
 0x1bd   : > { %v1498_v3 = vadd.f32 %v1497_v36, %v1496_v63  ;;  %v4634_v19 = vmax.f32 %v1659_v55, 0.0  ;;  %v4636_v43 = vmax.f32 %v1660_v58, 0.0  ;;  %v1481_v33 = vadd.f32 %v1480_v59, %v1479_v20  ;;  %v617_v20 = vpop.f32.mrf.mxu3 }
 0x1be   : > { %v2286_v52 = vadd.f32 %v2285_v35, %v2284_v5  ;;  %v1492_v25 = vrot.slane %v1491_v45, 2  ;;  %v4638_v14 = vmax.f32 %v1661_v9, 0.0  ;;  %v1488_v24 = vadd.f32 %v1487_v32, %v1486_v17 }
 0x1bf   : > { %v1499_v50 = vrot.slane %v1498_v3, 2  ;;  %v4640_v26 = vmax.f32 %v1662_v22, 0.0  ;;  %v1823_v8 = vsel %vm1747_vm3, %v4634_v19, -inf  ;;  %v1663_v38 = vadd.f32 %v4238_v39, %v1481_v33  ;;  %v559_v33 = vpop.f32.mrf.mxu1 }
 0x1c0   : > { %v2287_v4 = vrot.slane %v2286_v52, 1  ;;  %v1493_v28 = vadd.f32 %v1492_v25, %v1491_v45  ;;  %v1824_v15 = vsel %vm1747_vm3, %v4636_v43, -inf  ;;  %v1664_v5 = vadd.f32 %v4238_v39, %v1488_v24 }
 0x1c1   : > { %v1500_v55 = vadd.f32 %v1499_v50, %v1498_v3  ;;  %v1825_v60 = vmax.f32 %v1823_v8, %v1824_v15  ;;  %v4649_v36 = vmax.f32 %v1663_v38, 0.0  ;;  %v1826_v58 = vsel %vm1747_vm3, %v4638_v14, -inf  ;;  %v5521_v8 = vld [vmem:[#allocation15_spill] sm:$0xff]  ;;  %v5522_v15 = vld [vmem:[#allocation8_spill] sm:$0xff] }
 0x1c2   : > { %v2288_v61 = vadd.f32 %v2287_v4, %v2286_v52  ;;  %v1494_v17 = vrot.slane %v1493_v28, 1  ;;  %v5519_v9 = vrot.slane %v4530_v23, 6  ;;  %v1828_v45 = vsel %vm1747_vm3, %v4640_v26, -inf }
 0x1c3   : > { %v1827_v59 = vmax.f32 %v1825_v60, %v1826_v58  ;;  %v650_v22 = vmax.f32 %v4514_v2, 0.0  ;;  %v4662_v3 = vmax.f32 %v1664_v5, 0.0  ;;  %v618_v52 = vadd.f32 %v617_v20, %v3603_v34 }
 0x1c4   : > { %v4657_v35 = vsel %vm2136_vm5, %v5519_v9, %v4556_v27  ;;  %3338 = vrcp.f32 %v2288_v61  ;;  %v1495_v32 = vadd.f32 %v1494_v17, %v1493_v28  ;;  %v1501_v25 = vrot.slane %v1500_v55, 1 }
 0x1c5   : > { %5520 = vst [vmem:[#allocation41_spill] sm:$0xff] %v4657_v35  ;;  %v1829_v24 = vmax.f32 %v1827_v59, %v1828_v45  ;;  %v1830_v23 = vsel %vm1747_vm3, %v4649_v36, -inf  ;;  %v1045_v27 = vrot.slane %v650_v22, 4  ;;  %v1048_v4 = vsel %vm653_vm1, %v650_v22, %v5521_v8 }
 0x1c6   : > { %v1665_v50 = vadd.f32 %v4238_v39, %v1495_v32  ;;  %v651_v38 = vmax.f32 %v618_v52, 0.0  ;;  %v558_v2 = vadd.f32 %v557_v18, %v3611_v48  ;;  %v5523_v5 = vmax.f32 %v5522_v15, 0.0 }
 0x1c7   : > { %v1831_v28 = vmax.f32 %v1829_v24, %v1830_v23  ;;  %v4675_v60 = vperm.slane %v1048_v4, %v3609_v46  ;;  %v560_v20 = vadd.f32 %v559_v33, %v3611_v48  ;;  %v1832_v39 = vsel %vm1747_vm3, %v4662_v3, -inf }
 0x1c8   : > { %v1046_v34 = vsel %vm653_vm1, %v1045_v27, %v5523_v5  ;;  %v4678_v61 = vmax.f32 %v1665_v50, 0.0  ;;  %v645_v58 = vmax.f32 %v558_v2, 0.0  ;;  %v4685_v18 = vadd.f32 %v1501_v25, %v1500_v55 }
 0x1c9   : > { %v4683_v17 = vperm.slane %v1046_v34, %v3609_v46  ;;  %v1833_v9 = vmax.f32 %v1831_v28, %v1832_v39  ;;  %v1057_v59 = vrot.slane %v651_v38, 4  ;;  %v649_v45 = vmax.f32 %v560_v20, 0.0 }
 0x1ca   : > { %v3339_v22 = vpop.eup %3338  ;;  %v1834_v32 = vsel %vm1747_vm3, %v4678_v61, -inf  ;;  %v1002_v52 = vsel %vm653_vm1, %v4539_v53, %v645_v58  ;;  %v1003_v33 = vrot.slane %v645_v58, 4  ;;  %v5524_v50 = vmax.f32 %v4490_v13, 0.0 }
 0x1cb   : > { %v4692_v24 = vperm.slane %v3339_v22, 0  ;;  %v1008_v55 = vperm.slane %v1002_v52, %v3609_v46  ;;  %v1058_v25 = vsel %vm653_vm1, %v1057_v59, %v649_v45  ;;  %v4697_v27 = vmax.f32 %v1833_v9, %v1834_v32 }
 0x1cc   : > { %v1004_v8 = vsel %vm653_vm1, %v5524_v50, %v1003_v33  ;;  %v1059_v4 = vrot.slane %v649_v45, 4  ;;  %v4703_v2 = vperm.slane %v1058_v25, %v3609_v46  ;;  %v5525_v20 = vrot.slane %v4487_v10, 4  ;;  %v4746_v33 = vld [vmem:[%s5388_s3] sm:$0xf] }
 0x1cd   : > { %v2355_v53 = vmul.f32 %v4592_v49, %v4692_v24  ;;  %v2356_v28 = vmul.f32 %v4594_v42, %v4692_v24  ;;  %v2357_v15 = vmul.f32 %v4599_v21, %v4692_v24  ;;  %v2358_v5 = vmul.f32 %v4602_v51, %v4692_v24 }
 0x1ce   : > { %v1012_v13 = vperm.slane %v1004_v8, %v3609_v46  ;;  %v1013_v34 = vrot.slane %v1008_v55, 4  ;;  %v1016_v39 = vsel %vm653_vm1, %v1008_v55, %v5525_v20  ;;  %v1060_v58 = vsel %vm653_vm1, %v651_v38, %v1059_v4 }
 0x1cf   : > { %v4719_v49 = vmul.f32 %v2355_v53, %v4444_v29  ;;  %v4722_v42 = vmul.f32 %v2356_v28, %v4446_v40  ;;  %v4725_v21 = vmul.f32 %v2357_v15, %v4448_v0  ;;  %v4728_v51 = vmul.f32 %v2358_v5, %v4450_v62 }
 0x1d0   : > { %v1014_v9 = vsel %vm653_vm1, %v1013_v34, %v4487_v10  ;;  %v1024_v59 = vperm.slane %v1016_v39, %v5484_v57  ;;  %v1025_v45 = vrot.slane %v1012_v13, 4  ;;  %v5530_v38 = vrot.slane %v4481_v11, 4 }
 0x1d1   : > { %5526 = vst [vmem:[#allocation15_spill] sm:$0xff] %v4719_v49  ;;  %v1020_v32 = vperm.slane %v1014_v9, %v5484_v57  ;;  %v4752_v4 = vperm.slane %v1060_v58, %v3609_v46 }
 0x1d2   : > { %5527 = vst [vmem:[#allocation8_spill] sm:$0xff] %v4722_v42  ;;  %v1028_v29 = vsel %vm653_vm1, %v1012_v13, %v5530_v38  ;;  %v1026_v62 = vsel %vm653_vm1, %v1025_v45, %v4481_v11  ;;  %v1039_v52 = vrot.slane %v1024_v59, 4  ;;  %v1152_v55 = vmul.f32 %v4746_v33, %v1024_v59 }
 0x1d3   : > { %5528 = vst [vmem:[#allocation42_spill] sm:$0xff] %v4725_v21  ;;  %v1036_v10 = vperm.slane %v1028_v29, %v5484_v57  ;;  %v1032_v25 = vperm.slane %v1026_v62, %v5484_v57  ;;  %v1037_v50 = vrot.slane %v1020_v32, 4  ;;  %v1150_v8 = vmul.f32 %v4746_v33, %v1020_v32 }
 0x1d4   : > { %5529 = vst [vmem:[#allocation43_spill] sm:$0xff] %v4728_v51  ;;  %v1040_v11 = vsel %vm653_vm1, 0.0, %v1039_v52  ;;  %v1517_v15 = vsel %vm1166_vm2, %v1152_v55, 0.0 }
 0x1d5   : > { %v1043_v53 = vrot.slane %v1036_v10, 4  ;;  %v1156_v28 = vmul.f32 %v4746_v33, %v1036_v10  ;;  %v1038_v5 = vsel %vm653_vm1, 0.0, %v1037_v50  ;;  %v1041_v13 = vrot.slane %v1032_v25, 4 }
 0x1d6   : > { %v1153_v34 = vmul.f32 %v4746_v33, %v1040_v11  ;;  %v1154_v20 = vmul.f32 %v4746_v33, %v1032_v25  ;;  %v1151_v9 = vmul.f32 %v4746_v33, %v1038_v5  ;;  %v1503_v58 = vsel %vm1166_vm2, %v1150_v8, 0.0 }
 0x1d7   : > { %v1044_v39 = vsel %vm653_vm1, 0.0, %v1043_v53  ;;  %v1518_v59 = vrot.slane %v1517_v15, 4  ;;  %v1042_v45 = vsel %vm653_vm1, 0.0, %v1041_v13  ;;  %v1504_v29 = vrot.slane %v1503_v58, 4 }
 0x1d8   : > { %v1157_v38 = vmul.f32 %v4746_v33, %v1044_v39  ;;  %v1524_v32 = vsel %vm1166_vm2, %v1153_v34, 0.0  ;;  %v1155_v62 = vmul.f32 %v4746_v33, %v1042_v45  ;;  %v1510_v10 = vsel %vm1166_vm2, %v1151_v9, 0.0 }
 0x1d9   : > { %v1519_v52 = vadd.f32 %v1518_v59, %v1517_v15  ;;  %v1525_v55 = vrot.slane %v1524_v32, 4  ;;  %v1505_v25 = vadd.f32 %v1504_v29, %v1503_v58  ;;  %v1511_v50 = vrot.slane %v1510_v10, 4 }
 0x1da   : > { %v1531_v11 = vsel %vm1166_vm2, %v1154_v20, 0.0  ;;  %v1545_v8 = vsel %vm1166_vm2, %v1156_v28, 0.0  ;;  %v1538_v39 = vsel %vm1166_vm2, %v1155_v62, 0.0  ;;  %v1552_v15 = vsel %vm1166_vm2, %v1157_v38, 0.0 }
 0x1db   : > { %v1520_v53 = vrot.slane %v1519_v52, 2  ;;  %v1526_v5 = vadd.f32 %v1525_v55, %v1524_v32  ;;  %v1532_v13 = vrot.slane %v1531_v11, 4  ;;  %v1506_v0 = vrot.slane %v1505_v25, 2 }
 0x1dc   : > { %v1512_v40 = vadd.f32 %v1511_v50, %v1510_v10  ;;  %v1539_v34 = vrot.slane %v1538_v39, 4  ;;  %v1546_v22 = vrot.slane %v1545_v8, 4  ;;  %v1553_v32 = vrot.slane %v1552_v15, 4 }
 0x1dd   : > { %v1521_v45 = vadd.f32 %v1520_v53, %v1519_v52  ;;  %v1527_v63 = vrot.slane %v1526_v5, 2  ;;  %v1533_v9 = vadd.f32 %v1532_v13, %v1531_v11  ;;  %v1507_v58 = vadd.f32 %v1506_v0, %v1505_v25 }
 0x1de   : > { %v1513_v59 = vrot.slane %v1512_v40, 2  ;;  %v1540_v29 = vadd.f32 %v1539_v34, %v1538_v39  ;;  %v1547_v20 = vadd.f32 %v1546_v22, %v1545_v8  ;;  %v1554_v52 = vadd.f32 %v1553_v32, %v1552_v15 }
 0x1df   : > { %v1522_v48 = vrot.slane %v1521_v45, 1  ;;  %v1528_v28 = vadd.f32 %v1527_v63, %v1526_v5  ;;  %v1534_v23 = vrot.slane %v1533_v9, 2  ;;  %v1508_v55 = vrot.slane %v1507_v58, 1  ;;  %v4775_v63 = vld [vmem:[%s5389_s4] ss:$0 sm:$0xff] }
 0x1e0   : > { %v1514_v46 = vadd.f32 %v1513_v59, %v1512_v40  ;;  %v1541_v62 = vrot.slane %v1540_v29, 2  ;;  %v1548_v51 = vrot.slane %v1547_v20, 2  ;;  %v1555_v39 = vrot.slane %v1554_v52, 2 }
 0x1e1   : > { %v1523_v10 = vadd.f32 %v1522_v48, %v1521_v45  ;;  %v1529_v50 = vrot.slane %v1528_v28, 1  ;;  %v1535_v21 = vadd.f32 %v1534_v23, %v1533_v9  ;;  %v1509_v53 = vadd.f32 %v1508_v55, %v1507_v58 }
 0x1e2   : > { %v1515_v11 = vrot.slane %v1514_v46, 1  ;;  %v1542_v13 = vadd.f32 %v1541_v62, %v1540_v29  ;;  %v1549_v38 = vadd.f32 %v1548_v51, %v1547_v20  ;;  %v1556_v34 = vadd.f32 %v1555_v39, %v1554_v52 }
 0x1e3   : > { %v1530_v0 = vadd.f32 %v1529_v50, %v1528_v28  ;;  %v1536_v25 = vrot.slane %v1535_v21, 1  ;;  %v1669_v22 = vadd.f32 %v4775_v63, %v1523_v10  ;;  %v1667_v23 = vadd.f32 %v4775_v63, %v1509_v53 }
 0x1e4   : > { %v1516_v40 = vadd.f32 %v1515_v11, %v1514_v46  ;;  %v1543_v8 = vrot.slane %v1542_v13, 1  ;;  %v1550_v48 = vrot.slane %v1549_v38, 1  ;;  %v1557_v29 = vrot.slane %v1556_v34, 1 }
 0x1e5   : > { %v1537_v5 = vadd.f32 %v1536_v25, %v1535_v21  ;;  %v1670_v45 = vadd.f32 %v4775_v63, %v1530_v0  ;;  %v4780_v51 = vmax.f32 %v1669_v22, 0.0  ;;  %v4783_v59 = vmax.f32 %v1667_v23, 0.0  ;;  %v2745_v23 = vld [vmem:[#allocation2 + $0x1f0] sm:$0xff] }
 0x1e6   : > { %v1544_v9 = vadd.f32 %v1543_v8, %v1542_v13  ;;  %v1551_v15 = vadd.f32 %v1550_v48, %v1549_v38  ;;  %v1668_v58 = vadd.f32 %v4775_v63, %v1516_v40  ;;  %v4798_v10 = vadd.f32 %v1557_v29, %v1556_v34  ;;  %v2746_v48 = vld [vmem:[#allocation2 + $0x1f8] sm:$0xff]  ;;  %2820 = vmatpush.msrb.mxu2 %v2745_v23 }
 0x1e7   : > { %v1671_v20 = vadd.f32 %v4775_v63, %v1537_v5  ;;  %v4786_v46 = vmax.f32 %v1670_v45, 0.0  ;;  %v1841_v28 = vsel %vm1747_vm3, %v4780_v51, -inf  ;;  %v1838_v62 = vsel %vm1747_vm3, %v4783_v59, -inf  ;;  %v2742_v5 = vld [vmem:[#allocation2 + $0x1d8] sm:$0xff]  ;;  %2840 = vmatpush.msrb.mxu3 %v2746_v48 }
 0x1e8   : > { %v4791_v21 = vadd.f32 %v4775_v63, %v1544_v9  ;;  %v1673_v32 = vadd.f32 %v4775_v63, %v1551_v15  ;;  %v4794_v55 = vmax.f32 %v1668_v58, 0.0  ;;  %v1069_v53 = vrot.slane %v4703_v2, 4  ;;  %v2744_v58 = vld [vmem:[#allocation2 + $0x1e8] sm:$0xff] }
 0x1e9   : > { %v4800_v50 = vmax.f32 %v1671_v20, 0.0  ;;  %v1843_v52 = vsel %vm1747_vm3, %v4786_v46, -inf  ;;  %v5532_v38 = vrot.slane %v4683_v17, 4  ;;  %v1081_v25 = vrot.slane %v4752_v4, 4  ;;  %2800 = vmatpush.msra.mxu1 %v2744_v58  ;;  %2841 = vmatpush.msrb.mxu3 %v2742_v5 }
 0x1ea   : > { %v4805_v11 = vmax.f32 %v1673_v32, 0.0  ;;  %v1839_v13 = vsel %vm1747_vm3, %v4794_v55, -inf  ;;  %v1070_v40 = vsel %vm653_vm1, %v1069_v53, %v4683_v17  ;;  %v5533_v9 = vrot.slane %v4675_v60, 4  ;;  %v2741_v17 = vld [vmem:[#allocation2 + $0x1d0] sm:$0xff]  ;;  %v2738_v53 = vld [vmem:[#allocation2 + $0x1b8] sm:$0xff] }
 0x1eb   : > { %v1072_v0 = vsel %vm653_vm1, %v4703_v2, %v5532_v38  ;;  %v1840_v39 = vmax.f32 %v1838_v62, %v1839_v13  ;;  %v1845_v22 = vsel %vm1747_vm3, %v4800_v50, -inf  ;;  %v1076_v2 = vperm.slane %v1070_v40, %v5484_v57  ;;  %v2737_v13 = vld [vmem:[#allocation2 + $0x1b0] sm:$0xff]  ;;  %v2740_v38 = vld [vmem:[#allocation2 + $0x1c8] sm:$0xff]  ;;  %2821 = vmatpush.msrb.mxu2 %v2741_v17  ;;  %2842 = vmatpush.msrb.mxu3 %v2738_v53 }
 0x1ec   : > { %5531 = vst [vmem:[#allocation44_spill] sm:$0xff] %v4805_v11  ;;  %v1080_v8 = vperm.slane %v1072_v0, %v5484_v57  ;;  %v4821_v34 = vsel %vm1747_vm3, %v4805_v11, -inf  ;;  %v1082_v45 = vsel %vm653_vm1, %v1081_v25, %v4675_v60  ;;  %v1084_v15 = vsel %vm653_vm1, %v4752_v4, %v5533_v9  ;;  %v2736_v4 = vld [vmem:[#allocation2 + $0x1a8] sm:$0xff]  ;;  %2801 = vmatpush.msra.mxu1 %v2740_v38  ;;  %v2733_v9 = vld [vmem:[#allocation2 + $0x190] sm:$0xff] }
 0x1ed   : > { %v1842_v29 = vmax.f32 %v1840_v39, %v1841_v28  ;;  %v1088_v20 = vperm.slane %v1082_v45, %v5484_v57  ;;  %v1092_v32 = vperm.slane %v1084_v15, %v5484_v57  ;;  %v1093_v0 = vrot.slane %v1076_v2, 4  ;;  %v2734_v45 = vld [vmem:[#allocation2 + $0x198] sm:$0xff]  ;;  %2822 = vmatpush.msrb.mxu2 %v2737_v13  ;;  %v2729_v38 = vld [vmem:[#allocation2 + $0x170] sm:$0xff]  ;;  %v2739_v13 = vld [vmem:[#allocation2 + $0x1c0] sm:$0xff] }
 0x1ee   : > { %v1095_v62 = vrot.slane %v1080_v8, 4  ;;  %v1158_v60 = vmul.f32 %v4746_v33, %v1076_v2  ;;  %v1160_v25 = vmul.f32 %v4746_v33, %v1080_v8  ;;  %v4836_v28 = vadd.f32 %v4775_v63, %v4685_v18  ;;  %v2732_v18 = vld [vmem:[#allocation2 + $0x188] sm:$0xff]  ;;  %2802 = vmatpush.msra.mxu1 %v2736_v4  ;;  %2843 = vmatpush.msrb.mxu3 %v2734_v45  ;;  %v2725_v57 = vld [vmem:[#allocation2 + $0x150] sm:$0xff] }
 0x1ef   : > { %v1844_v39 = vmax.f32 %v1842_v29, %v1843_v52  ;;  %v1097_v48 = vrot.slane %v1088_v20, 4  ;;  %v1099_v23 = vrot.slane %v1092_v32, 4  ;;  %v1094_v15 = vsel %vm653_vm1, 0.0, %v1093_v0  ;;  %v2743_v0 = vld [vmem:[#allocation2 + $0x1e0] sm:$0xff]  ;;  %2823 = vmatpush.msrb.mxu2 %v2733_v9  ;;  %v2724_v45 = vld [vmem:[#allocation2 + $0x148] sm:$0xff] }
 0x1f0   : > { %v1096_v40 = vsel %vm653_vm1, 0.0, %v1095_v62  ;;  %v1162_v8 = vmul.f32 %v4746_v33, %v1088_v20  ;;  %v1164_v5 = vmul.f32 %v4746_v33, %v1092_v32  ;;  %v1159_v29 = vmul.f32 %v4746_v33, %v1094_v15  ;;  %v2730_v62 = vld [vmem:[#allocation2 + $0x178] sm:$0xff]  ;;  %2803 = vmatpush.msra.mxu1 %v2732_v18  ;;  %2780 = vmatpush.msrb.mxu0 %v2743_v0  ;;  %v2735_v9 = vld [vmem:[#allocation2 + $0x1a0] sm:$0xff]  ;;  %v2721_v18 = vld [vmem:[#allocation2 + $0x130] sm:$0xff] }
 0x1f1   : > { %v1161_v2 = vmul.f32 %v4746_v33, %v1096_v40  ;;  %v4843_v17 = vmax.f32 %v1844_v39, %v1845_v22  ;;  %v1098_v52 = vsel %vm653_vm1, 0.0, %v1097_v48  ;;  %v1100_v58 = vsel %vm653_vm1, 0.0, %v1099_v23  ;;  %v2728_v22 = vld [vmem:[#allocation2 + $0x168] sm:$0xff]  ;;  %v2726_v15 = vld [vmem:[#allocation2 + $0x158] sm:$0xff]  ;;  %2844 = vmatpush.msrb.mxu3 %v2730_v62  ;;  %2824 = vmatpush.msrb.mxu2 %v2729_v38  ;;  %v2731_v38 = vld [vmem:[#allocation2 + $0x180] sm:$0xff] }
 0x1f2   : > { %v1163_v40 = vmul.f32 %v4746_v33, %v1098_v52  ;;  %v1165_v20 = vmul.f32 %v4746_v33, %v1100_v58  ;;  %v1559_v32 = vsel %vm1166_vm2, %v1158_v60, 0.0  ;;  %v1573_v53 = vsel %vm1166_vm2, %v1160_v25, 0.0  ;;  %2804 = vmatpush.msra.mxu1 %v2728_v22  ;;  %2781 = vmatpush.msrb.mxu0 %v2739_v13  ;;  %v2720_v62 = vld [vmem:[#allocation2 + $0x128] sm:$0xff] }
 0x1f3   : > { %v1560_v39 = vrot.slane %v1559_v32, 4  ;;  %v1566_v48 = vsel %vm1166_vm2, %v1159_v29, 0.0  ;;  %v1574_v23 = vrot.slane %v1573_v53, 4  ;;  %v1580_v4 = vsel %vm1166_vm2, %v1161_v2, 0.0  ;;  %v2722_v2 = vld [vmem:[#allocation2 + $0x138] sm:$0xff]  ;;  %2845 = vmatpush.msrb.mxu3 %v2726_v15  ;;  %2825 = vmatpush.msrb.mxu2 %v2725_v57 }
 0x1f4   : > { %v1567_v52 = vrot.slane %v1566_v48, 4  ;;  %v1581_v33 = vrot.slane %v1580_v4, 4  ;;  %v1587_v60 = vsel %vm1166_vm2, %v1162_v8, 0.0  ;;  %v1594_v25 = vsel %vm1166_vm2, %v1163_v40, 0.0  ;;  %2805 = vmatpush.msra.mxu1 %v2724_v45  ;;  %2782 = vmatpush.msrb.mxu0 %v2735_v9 }
 0x1f5   : > { %v1561_v58 = vadd.f32 %v1560_v39, %v1559_v32  ;;  %v1575_v42 = vadd.f32 %v1574_v23, %v1573_v53  ;;  %v1588_v29 = vrot.slane %v1587_v60, 4  ;;  %v1595_v49 = vrot.slane %v1594_v25, 4  ;;  %v2718_v39 = vld [vmem:[#allocation2 + $0x118] sm:$0xff]  ;;  %2846 = vmatpush.msrb.mxu3 %v2722_v2  ;;  %2826 = vmatpush.msrb.mxu2 %v2721_v18 }
 0x1f6   : > { %v1568_v16 = vadd.f32 %v1567_v52, %v1566_v48  ;;  %v1582_v0 = vadd.f32 %v1581_v33, %v1580_v4  ;;  %v1601_v35 = vsel %vm1166_vm2, %v1164_v5, 0.0  ;;  %v1608_v8 = vsel %vm1166_vm2, %v1165_v20, 0.0  ;;  %v2717_v5 = vld [vmem:[#allocation2 + $0x110] sm:$0xff]  ;;  %v2716_v4 = vld [vmem:[#allocation2 + $0x108] sm:$0xff]  ;;  %2806 = vmatpush.msra.mxu1 %v2720_v62  ;;  %v2714_v33 = vld [vmem:[#allocation2 + $0xf8] sm:$0xff]  ;;  %2783 = vmatpush.msrb.mxu0 %v2731_v38 }
 0x1f7   : > { %v1562_v40 = vrot.slane %v1561_v58, 2  ;;  %v1576_v12 = vrot.slane %v1575_v42, 2  ;;  %v1589_v32 = vadd.f32 %v1588_v29, %v1587_v60  ;;  %v1596_v53 = vadd.f32 %v1595_v49, %v1594_v25  ;;  %v2727_v60 = vld [vmem:[#allocation2 + $0x160] sm:$0xff]  ;;  %2847 = vmatpush.msrb.mxu3 %v2718_v39  ;;  %v2713_v29 = vld [vmem:[#allocation2 + $0xf0] sm:$0xff]  ;;  %2827 = vmatpush.msrb.mxu2 %v2717_v5  ;;  %v2706_v39 = vld [vmem:[#allocation2 + $0xb8] sm:$0xff] }
 0x1f8   : > { %v1569_v22 = vrot.slane %v1568_v16, 2  ;;  %v1583_v23 = vrot.slane %v1582_v0, 2  ;;  %v1602_v13 = vrot.slane %v1601_v35, 4  ;;  %v1609_v48 = vrot.slane %v1608_v8, 4  ;;  %2807 = vmatpush.msra.mxu1 %v2716_v4  ;;  %2784 = vmatpush.msrb.mxu0 %v2727_v60  ;;  %v2708_v5 = vld [vmem:[#allocation2 + $0xc8] sm:$0xff] }
 0x1f9   : > { %v1563_v20 = vadd.f32 %v1562_v40, %v1561_v58  ;;  %v1577_v15 = vadd.f32 %v1576_v12, %v1575_v42  ;;  %v1590_v57 = vrot.slane %v1589_v32, 2  ;;  %v1597_v52 = vrot.slane %v1596_v53, 2  ;;  %v2710_v12 = vld [vmem:[#allocation2 + $0xd8] sm:$0xff]  ;;  %2848 = vmatpush.msrb.mxu3 %v2714_v33  ;;  %2828 = vmatpush.msrb.mxu2 %v2713_v29 }
 0x1fa   : > { %v1570_v49 = vadd.f32 %v1569_v22, %v1568_v16  ;;  %v1584_v25 = vadd.f32 %v1583_v23, %v1582_v0  ;;  %v1603_v45 = vadd.f32 %v1602_v13, %v1601_v35  ;;  %v1610_v9 = vadd.f32 %v1609_v48, %v1608_v8  ;;  %v2709_v16 = vld [vmem:[#allocation2 + $0xd0] sm:$0xff]  ;;  %2808 = vmatpush.msra.mxu1 %v2712_v1  ;;  %v2723_v22 = vld [vmem:[#allocation2 + $0x140] sm:$0xff] }
 0x1fb   : > { %v1564_v37 = vrot.slane %v1563_v20, 1  ;;  %v1578_v2 = vrot.slane %v1577_v15, 1  ;;  %v1591_v18 = vadd.f32 %v1590_v57, %v1589_v32  ;;  %v1598_v47 = vadd.f32 %v1597_v52, %v1596_v53  ;;  %2849 = vmatpush.msrb.mxu3 %v2710_v12  ;;  %v2705_v48 = vld [vmem:[#allocation2 + $0xb0] sm:$0xff]  ;;  %2829 = vmatpush.msrb.mxu2 %v2709_v16  ;;  %v2700_v16 = vld [vmem:[#allocation2 + $0x88] sm:$0xff] }
 0x1fc   : > { %v1571_v42 = vrot.slane %v1570_v49, 1  ;;  %v1585_v58 = vrot.slane %v1584_v25, 1  ;;  %v1604_v62 = vrot.slane %v1603_v45, 2  ;;  %v1611_v40 = vrot.slane %v1610_v9, 2  ;;  %2785 = vmatpush.msrb.mxu0 %v2723_v22  ;;  %2809 = vmatpush.msra.mxu1 %v2708_v5 }
 0x1fd   : > { %v1565_v0 = vadd.f32 %v1564_v37, %v1563_v20  ;;  %v1579_v35 = vadd.f32 %v1578_v2, %v1577_v15  ;;  %v1592_v8 = vrot.slane %v1591_v18, 1  ;;  %v1599_v38 = vrot.slane %v1598_v47, 1  ;;  %v2719_v20 = vld [vmem:[#allocation2 + $0x120] sm:$0xff]  ;;  %v2702_v15 = vld [vmem:[#allocation2 + $0x98] sm:$0xff]  ;;  %2850 = vmatpush.msrb.mxu3 %v2706_v39  ;;  %2830 = vmatpush.msrb.mxu2 %v2705_v48  ;;  %v2696_v48 = vld [vmem:[#allocation2 + $0x68] sm:$0xff] }
 0x1fe   : > { %v1572_v32 = vadd.f32 %v1571_v42, %v1570_v49  ;;  %v1586_v53 = vadd.f32 %v1585_v58, %v1584_v25  ;;  %v1605_v23 = vadd.f32 %v1604_v62, %v1603_v45  ;;  %v1612_v13 = vadd.f32 %v1611_v40, %v1610_v9  ;;  %v2701_v25 = vld [vmem:[#allocation2 + $0x90] sm:$0xff]  ;;  %v2704_v45 = vld [vmem:[#allocation2 + $0xa8] sm:$0xff]  ;;  %v2715_v2 = vld [vmem:[#allocation2 + $0x100] sm:$0xff]  ;;  %2786 = vmatpush.msrb.mxu0 %v2719_v20 }
 0x1ff   : > { %v1593_v4 = vadd.f32 %v1592_v8, %v1591_v18  ;;  %v1600_v57 = vadd.f32 %v1599_v38, %v1598_v47  ;;  %v1675_v52 = vadd.f32 %v4775_v63, %v1565_v0  ;;  %v1677_v37 = vadd.f32 %v4775_v63, %v1579_v35  ;;  %v2698_v18 = vld [vmem:[#allocation2 + $0x78] sm:$0xff]  ;;  %2851 = vmatpush.msrb.mxu3 %v2702_v15  ;;  %v2697_v40 = vld [vmem:[#allocation2 + $0x70] sm:$0xff] }
 0x200   : > { %v1606_v33 = vrot.slane %v1605_v23, 1  ;;  %v1613_v1 = vrot.slane %v1612_v13, 1  ;;  %v1676_v60 = vadd.f32 %v4775_v63, %v1572_v32  ;;  %v1678_v49 = vadd.f32 %v4775_v63, %v1586_v53  ;;  %2831 = vmatpush.msrb.mxu2 %v2701_v25  ;;  %2810 = vmatpush.msra.mxu1 %v2704_v45  ;;  %v2694_v39 = vld [vmem:[#allocation2 + $0x58] sm:$0xff] }
 0x201   : > { %v1679_v9 = vadd.f32 %v4775_v63, %v1593_v4  ;;  %v4863_v47 = vmax.f32 %v1675_v52, 0.0  ;;  %v4865_v29 = vmax.f32 %v1677_v37, 0.0  ;;  %v1674_v12 = vadd.f32 %v4775_v63, %v4798_v10  ;;  %v2711_v10 = vld [vmem:[#allocation2 + $0xe0] sm:$0xff]  ;;  %2787 = vmatpush.msrb.mxu0 %v2715_v2  ;;  %2852 = vmatpush.msrb.mxu3 %v2698_v18  ;;  %v2690_v37 = vld [vmem:[#allocation2 + $0x38] sm:$0xff] }
 0x202   : > { %v1607_v42 = vadd.f32 %v1606_v33, %v1605_v23  ;;  %v4869_v58 = vmax.f32 %v1676_v60, 0.0  ;;  %v4871_v62 = vmax.f32 %v1678_v49, 0.0  ;;  %v1614_v0 = vadd.f32 %v1613_v1, %v1612_v13  ;;  %v2693_v13 = vld [vmem:[#allocation2 + $0x50] sm:$0xff]  ;;  %2832 = vmatpush.msrb.mxu2 %v2697_v40  ;;  %2811 = vmatpush.msra.mxu1 %v2700_v16  ;;  %v2692_v1 = vld [vmem:[#allocation2 + $0x48] sm:$0xff]  ;;  %v5543_v18 = vld [vmem:[#allocation13_spill] sm:$0xff] }
 0x203   : > { %5534 = vst [vmem:[#allocation45_spill] sm:$0xff] %v4863_v47  ;;  %v4873_v35 = vmax.f32 %v1679_v9, 0.0  ;;  %v1853_v8 = vsel %vm1747_vm3, %v4863_v47, -inf  ;;  %v1856_v38 = vsel %vm1747_vm3, %v4865_v29, -inf  ;;  %v1680_v22 = vadd.f32 %v4775_v63, %v1600_v57  ;;  %v2707_v57 = vld [vmem:[#allocation2 + $0xc0] sm:$0xff]  ;;  %2788 = vmatpush.msrb.mxu0 %v2711_v10  ;;  %2853 = vmatpush.msrb.mxu3 %v2694_v39  ;;  %v2689_v33 = vld [vmem:[#allocation2 + $0x30] sm:$0xff] }
 0x204   : > { %5535 = vst [vmem:[#allocation46_spill] sm:$0xff] %v4865_v29  ;;  %v1681_v32 = vadd.f32 %v4775_v63, %v1607_v42  ;;  %v1854_v53 = vsel %vm1747_vm3, %v4869_v58, -inf  ;;  %v1858_v23 = vsel %vm1747_vm3, %v4871_v62, -inf  ;;  %v1682_v5 = vadd.f32 %v4775_v63, %v1614_v0  ;;  %v2703_v9 = vld [vmem:[#allocation2 + $0xa0] sm:$0xff]  ;;  %2833 = vmatpush.msrb.mxu2 %v2693_v13  ;;  %2812 = vmatpush.msra.mxu1 %v2696_v48  ;;  %v2688_v40 = vld [vmem:[#allocation2 + $0x28] sm:$0xff]  ;;  %v2685_v16 = vld [vmem:[#allocation2 + $0x10] sm:$0xff] }
 0x205   : > { %5536 = vst [vmem:[#allocation47_spill] sm:$0xff] %v4869_v58  ;;  %v1855_v4 = vmax.f32 %v1853_v8, %v1854_v53  ;;  %v1860_v52 = vsel %vm1747_vm3, %v4873_v35, -inf  ;;  %v4889_v20 = vmax.f32 %v4836_v28, 0.0  ;;  %v4892_v15 = vmax.f32 %v4791_v21, 0.0  ;;  %v2686_v28 = vld [vmem:[#allocation2 + $0x18] sm:$0xff]  ;;  %2789 = vmatpush.msrb.mxu0 %v2707_v57  ;;  %2854 = vmatpush.msrb.mxu3 %v2690_v37  ;;  %v2695_v37 = vld [vmem:[#allocation2 + $0x60] sm:$0xff] }
 0x206   : > { %5537 = vst [vmem:[#allocation48_spill] sm:$0xff] %v4871_v62  ;;  %v4894_v60 = vmax.f32 %v1674_v12, 0.0  ;;  %v4896_v63 = vmax.f32 %v1680_v22, 0.0  ;;  %v4898_v49 = vmax.f32 %v1681_v32, 0.0  ;;  %v4900_v25 = vmax.f32 %v1682_v5, 0.0  ;;  %v5544_v12 = vld [vmem:[#allocation10_spill] sm:$0xff]  ;;  %2834 = vmatpush.msrb.mxu2 %v2689_v33  ;;  %2813 = vmatpush.msra.mxu1 %v2692_v1 }
 0x207   : > { %5538 = vst [vmem:[#allocation49_spill] sm:$0xff] %v4873_v35  ;;  %v1857_v45 = vmax.f32 %v1855_v4, %v1856_v38  ;;  %v1836_v21 = vsel %vm1747_vm3, %v4889_v20, -inf  ;;  %v1847_v2 = vsel %vm1747_vm3, %v4892_v15, -inf  ;;  %v2330_v42 = vmul.f32 %v5544_v12, %v5543_v18  ;;  %v2699_v22 = vld [vmem:[#allocation2 + $0x80] sm:$0xff]  ;;  %2790 = vmatpush.msrb.mxu0 %v2703_v9  ;;  %2855 = vmatpush.msrb.mxu3 %v2686_v28  ;;  %v5547_v1 = vld [vmem:[#allocation11_spill] sm:$0xff] }
 0x208   : > { %5539 = vst [vmem:[#allocation50_spill] sm:$0xff] %v4894_v60  ;;  %v1837_v0 = vmax.f32 %v4697_v27, %v1836_v21  ;;  %v1848_v8 = vmax.f32 %v4843_v17, %v1847_v2  ;;  %v1851_v38 = vsel %vm1747_vm3, %v4894_v60, -inf  ;;  %v1862_v10 = vsel %vm1747_vm3, %v4896_v63, -inf  ;;  %v5545_v27 = vld [vmem:[#allocation17_spill] sm:$0xff]  ;;  %v2684_v17 = vld [vmem:[#allocation2 + $0x8] sm:$0xff]  ;;  %2814 = vmatpush.msra.mxu1 %v2688_v40  ;;  %2835 = vmatpush.msrb.mxu2 %v2685_v16 }
 0x209   : > { %5540 = vst [vmem:[#allocation51_spill] sm:$0xff] %v4896_v63  ;;  %v1859_v39 = vmax.f32 %v1857_v45, %v1858_v23  ;;  %v1864_v32 = vsel %vm1747_vm3, %v4898_v49, -inf  ;;  %v1866_v53 = vsel %vm1747_vm3, %v4900_v25, -inf  ;;  %v2338_v13 = vmul.f32 %v5545_v27, %v4079_v44  ;;  %v5546_v33 = vld [vmem:[#allocation9_spill] sm:$0xff]  ;;  %2791 = vmatpush.msrb.mxu0 %v2699_v22 }
 0x20a   : > { %5541 = vst [vmem:[#allocation52_spill] sm:$0xff] %v4898_v49  ;;  %v1850_v48 = vmax.f32 %v1848_v8, %v4821_v34  ;;  %v1873_v5 = vperm.slane %v1837_v0, 0  ;;  %v4923_v23 = vmul.f32 %v4212_v30, %v4285_v54  ;;  %v4927_v4 = vmul.f32 %v4222_v56, %v4285_v54  ;;  %v5548_v34 = vld [vmem:[#allocation19_spill] sm:$0xff]  ;;  %v2691_v54 = vld [vmem:[#allocation2 + $0x40] sm:$0xff]  ;;  %2815 = vmatpush.msra.mxu1 %v2684_v17 }
 0x20b   : > { %5542 = vst [vmem:[#allocation53_spill] sm:$0xff] %v4900_v25  ;;  %v1861_v57 = vmax.f32 %v1859_v39, %v1860_v52  ;;  %v4930_v44 = vmul.f32 %v2330_v42, %v5546_v33  ;;  %v4933_v45 = vmul.f32 %v2338_v13, %v5547_v1  ;;  %2792 = vmatpush.msrb.mxu0 %v2695_v37  ;;  %v2687_v42 = vld [vmem:[#allocation2 + $0x20] sm:$0xff] }
 0x20c   : > { %v1852_v28 = vmax.f32 %v1850_v48, %v1851_v38  ;;  %v1916_v30 = vsub.f32 %v4634_v19, %v1873_v5  ;;  %v1917_v21 = vsub.f32 %v4636_v43, %v1873_v5  ;;  %v1918_v56 = vsub.f32 %v4638_v14, %v1873_v5 }
 0x20d   : > { %v1863_v52 = vmax.f32 %v1861_v57, %v1862_v10  ;;  %v1919_v2 = vsub.f32 %v4640_v26, %v1873_v5  ;;  %v1920_v18 = vsub.f32 %v4649_v36, %v1873_v5  ;;  %v1921_v12 = vsub.f32 %v4662_v3, %v1873_v5  ;;  %2793 = vmatpush.msrb.mxu0 %v2691_v54  ;;  %v2683_v57 = vld [vmem:[#allocation2] sm:$0xff] }
 0x20e   : > { %v1874_v40 = vperm.slane %v1852_v28, 0  ;;  %v1922_v16 = vsub.f32 %v4678_v61, %v1873_v5  ;;  %v1923_v0 = vsub.f32 %v4889_v20, %v1873_v5  ;;  %v2020_v8 = vmul.f32 1.442695, %v1916_v30 }
 0x20f   : > { %v1865_v38 = vmax.f32 %v1863_v52, %v1864_v32  ;;  %v2022_v39 = vmul.f32 1.442695, %v1917_v21  ;;  %v2024_v22 = vmul.f32 1.442695, %v1918_v56  ;;  %v2026_v27 = vmul.f32 1.442695, %v1919_v2  ;;  %2794 = vmatpush.msrb.mxu0 %v2687_v42 }
 0x210   : > { %v1924_v10 = vsub.f32 %v4783_v59, %v1874_v40  ;;  %v1925_v13 = vsub.f32 %v4794_v55, %v1874_v40  ;;  %v1926_v17 = vsub.f32 %v4780_v51, %v1874_v40  ;;  %v1927_v48 = vsub.f32 %v4786_v46, %v1874_v40 }
 0x211   : > { %v1867_v37 = vmax.f32 %v1865_v38, %v1866_v53  ;;  %v1928_v33 = vsub.f32 %v4800_v50, %v1874_v40  ;;  %v1929_v5 = vsub.f32 %v4892_v15, %v1874_v40  ;;  %v1930_v32 = vsub.f32 %v4805_v11, %v1874_v40  ;;  %2795 = vmatpush.msrb.mxu0 %v2683_v57 }
 0x212   : > { %v1931_v1 = vsub.f32 %v4894_v60, %v1874_v40  ;;  %3340 = vpow2.f32 %v2020_v8  ;;  %v2028_v28 = vmul.f32 1.442695, %v1920_v18  ;;  %v2030_v30 = vmul.f32 1.442695, %v1921_v12 }
 0x213   : > { %v1875_v21 = vperm.slane %v1867_v37, 0  ;;  %3342 = vpow2.f32 %v2022_v39  ;;  %v2032_v56 = vmul.f32 1.442695, %v1922_v16  ;;  %v2034_v54 = vmul.f32 1.442695, %v1923_v0 }
 0x214   : > { %3344 = vpow2.f32 %v2024_v22  ;;  %v2036_v52 = vmul.f32 1.442695, %v1924_v10  ;;  %v2038_v53 = vmul.f32 1.442695, %v1925_v13  ;;  %v2040_v2 = vmul.f32 1.442695, %v1926_v17 }
 0x215   : > { %v1932_v38 = vsub.f32 %v4863_v47, %v1875_v21  ;;  %v1933_v9 = vsub.f32 %v4869_v58, %v1875_v21  ;;  %v1934_v42 = vsub.f32 %v4865_v29, %v1875_v21  ;;  %v1935_v40 = vsub.f32 %v4871_v62, %v1875_v21 }
 0x216   : > { %v1936_v18 = vsub.f32 %v4873_v35, %v1875_v21  ;;  %v1937_v12 = vsub.f32 %v4896_v63, %v1875_v21  ;;  %v1938_v16 = vsub.f32 %v4898_v49, %v1875_v21  ;;  %v1939_v0 = vsub.f32 %v4900_v25, %v1875_v21 }
 0x217   : > { %3346 = vpow2.f32 %v2026_v27  ;;  %v2042_v8 = vmul.f32 1.442695, %v1927_v48  ;;  %v2044_v39 = vmul.f32 1.442695, %v1928_v33  ;;  %v2046_v22 = vmul.f32 1.442695, %v1929_v5 }
 0x218   : > { %v4960_v10 = vpop.eup %3340  ;;  %3348 = vpow2.f32 %v2028_v28  ;;  %v2048_v13 = vmul.f32 1.442695, %v1930_v32  ;;  %v2050_v17 = vmul.f32 1.442695, %v1931_v1  ;;  %v2052_v57 = vmul.f32 1.442695, %v1932_v38 }
 0x219   : > { %v4962_v37 = vpop.eup %3342  ;;  %3350 = vpow2.f32 %v2030_v30  ;;  %v2054_v35 = vmul.f32 1.442695, %v1933_v9  ;;  %v2056_v62 = vmul.f32 1.442695, %v1934_v42  ;;  %v4964_v63 = vmul.f32 1.442695, %v1935_v40 }
 0x21a   : > { %v4966_v49 = vpop.eup %3344  ;;  %3352 = vpow2.f32 %v2032_v56  ;;  %v4968_v27 = vmul.f32 1.442695, %v1936_v18  ;;  %v4970_v48 = vmul.f32 1.442695, %v1937_v12  ;;  %v4972_v33 = vmul.f32 1.442695, %v1938_v16 }
 0x21b   : > { %3354 = vpow2.f32 %v2034_v54  ;;  %v4974_v5 = vmul.f32 1.442695, %v1939_v0  ;;  %v2209_v32 = vrot.slane %v4962_v37, 7  ;;  %v2211_v1 = vrot.slane %v4966_v49, 6  ;;  %v5549_v54 = vld [vmem:[#allocation37_spill] sm:$0xff]  ;;  %v5552_v12 = vld [vmem:[#allocation40_spill] sm:$0xff] }
 0x21c   : > { %3356 = vpow2.f32 %v2036_v52  ;;  %v2352_v9 = vmul.f32 %v4421_v7, %v4505_v41  ;;  %v2353_v28 = vmul.f32 %v4425_v31, %v4505_v41  ;;  %v2354_v30 = vmul.f32 %v4429_v6, %v4505_v41  ;;  %v5550_v52 = vld [vmem:[#allocation38_spill] sm:$0xff]  ;;  %v5551_v6 = vld [vmem:[#allocation39_spill] sm:$0xff] }
 0x21d   : > { %v4984_v21 = vpop.eup %3346  ;;  %3358 = vpow2.f32 %v2038_v53  ;;  %v2210_v56 = vsel %vm2133_vm4, %v2209_v32, %v4960_v10  ;;  %v2359_v38 = vmul.f32 %v5549_v54, %v4692_v24  ;;  %v2360_v42 = vmul.f32 %v5550_v52, %v4692_v24  ;;  %v5553_v0 = vld [vmem:[#allocation18_spill] sm:$0xff]  ;;  %v5554_v54 = vld [vmem:[#allocation21_spill] sm:$0xff] }
 0x21e   : > { %v4992_v40 = vpop.eup %3348  ;;  %3360 = vpow2.f32 %v2040_v2  ;;  %v2212_v31 = vsel %vm2136_vm5, %v2211_v1, %v2210_v56  ;;  %v2213_v7 = vrot.slane %v4984_v21, 5  ;;  %v2361_v41 = vmul.f32 %v5551_v6, %v4692_v24 }
 0x21f   : > { %v4998_v53 = vpop.eup %3350  ;;  %3362 = vpow2.f32 %v2042_v8  ;;  %v2215_v18 = vrot.slane %v4992_v40, 4  ;;  %v2362_v16 = vmul.f32 %v5552_v12, %v4692_v24  ;;  %v5005_v32 = vmul.f32 %v4923_v23, %v5553_v0  ;;  %v5555_v23 = vld [vmem:[#allocation12_spill] sm:$0xff] }
 0x220   : > { %v5007_v2 = vpop.eup %3352  ;;  %3364 = vpow2.f32 %v2044_v39  ;;  %v2214_v1 = vsel %vm2139_vm6, %v2213_v7, %v2212_v31  ;;  %v2217_v56 = vrot.slane %v4998_v53, 3  ;;  %v5013_v52 = vmul.f32 %v4927_v4, %v5554_v54  ;;  %v5556_v7 = vld [vmem:[#allocation26_spill] sm:$0xff] }
 0x221   : > { %v5015_v8 = vpop.eup %3354  ;;  %3366 = vpow2.f32 %v2046_v22  ;;  %v2216_v24 = vsel %vm2142_vm7, %v2215_v18, %v2214_v1  ;;  %v2219_v6 = vrot.slane %v5007_v2, 2  ;;  %v5020_v12 = vmul.f32 %v2352_v9, %v5555_v23  ;;  %v5557_v18 = vld [vmem:[#allocation27_spill] sm:$0xff]  ;;  %v5558_v9 = vld [vmem:[#allocation32_spill] sm:$0xff] }
 0x222   : > { %v5022_v0 = vpop.eup %3356  ;;  %3368 = vpow2.f32 %v2048_v13  ;;  %v2218_v39 = vsel %vm2145_vm8, %v2217_v56, %v2216_v24  ;;  %v2221_v31 = vrot.slane %v5015_v8, 1  ;;  %v5027_v4 = vmul.f32 %v2353_v28, %v5556_v7  ;;  %v5559_v28 = vld [vmem:[#allocation14_spill] sm:$0xff] }
 0x223   : > { %v5029_v54 = vpop.eup %3358  ;;  %3370 = vpow2.f32 %v2050_v17  ;;  %v2220_v22 = vsel %vm2148_vm9, %v2219_v6, %v2218_v39  ;;  %v5033_v1 = vmul.f32 %v2354_v30, %v5557_v18  ;;  %v5036_v23 = vmul.f32 %v2359_v38, %v5558_v9  ;;  %v5560_v6 = vld [vmem:[#allocation7_spill] sm:$0xff] }
 0x224   : > { %v5038_v25 = vpop.eup %3360  ;;  %3372 = vpow2.f32 %v2052_v57  ;;  %v2222_v13 = vsel %vm2151_vm10, %v2221_v31, %v2220_v22  ;;  %v2223_v56 = vrot.slane %v5029_v54, 7  ;;  %v5043_v24 = vmul.f32 %v2360_v42, %v5559_v28  ;;  %v5561_v22 = vld [vmem:[#allocation34_spill] sm:$0xff] }
 0x225   : > { %v5045_v7 = vpop.eup %3362  ;;  %3374 = vpow2.f32 %v2054_v35  ;;  %v2225_v17 = vrot.slane %v5038_v25, 6  ;;  %v2289_v30 = vrot.slane %v2222_v13, 4  ;;  %v5049_v39 = vmul.f32 %v2361_v41, %v5560_v6  ;;  %v5562_v6 = vld [vmem:[#allocation23_spill] sm:$0xff] }
 0x226   : > { %v5051_v38 = vpop.eup %3364  ;;  %3376 = vpow2.f32 %v2056_v62  ;;  %v2224_v57 = vsel %vm2133_vm4, %v2223_v56, %v5022_v0  ;;  %v2227_v31 = vrot.slane %v5045_v7, 5  ;;  %v5057_v42 = vmul.f32 %v2362_v16, %v5561_v22  ;;  %v5563_v16 = vld [vmem:[#allocation16_spill] sm:$0xff] }
 0x227   : > { %v5059_v18 = vpop.eup %3366  ;;  %3378 = vpow2.f32 %v4964_v63  ;;  %v2226_v35 = vsel %vm2136_vm5, %v2225_v17, %v2224_v57  ;;  %v2229_v41 = vrot.slane %v5051_v38, 4  ;;  %v2290_v9 = vadd.f32 %v2289_v30, %v2222_v13 }
 0x228   : > { %v5064_v28 = vpop.eup %3368  ;;  %3380 = vpow2.f32 %v4968_v27  ;;  %v2228_v62 = vsel %vm2139_vm6, %v2227_v31, %v2226_v35  ;;  %v2231_v56 = vrot.slane %v5059_v18, 3  ;;  %v5564_v22 = vrot.slane %v5563_v16, 4 }
 0x229   : > { %v5073_v58 = vpop.eup %3370  ;;  %3382 = vpow2.f32 %v4970_v48  ;;  %v2230_v63 = vsel %vm2142_vm7, %v2229_v41, %v2228_v62  ;;  %v2233_v13 = vrot.slane %v5064_v28, 2  ;;  %v2291_v17 = vrot.slane %v2290_v9, 2  ;;  %v5567_v62 = vld [vmem:[#allocation20_spill] sm:$0xff] }
 0x22a   : > { %v2522_v29 = vsel %vm2142_vm7, %v5564_v22, %v5562_v6  ;;  %v5078_v30 = vpop.eup %3372  ;;  %3384 = vpow2.f32 %v4972_v33  ;;  %v2232_v27 = vsel %vm2145_vm8, %v2231_v56, %v2230_v63  ;;  %v2235_v57 = vrot.slane %v5073_v58, 1 }
 0x22b   : > { %v5565_v31 = vrot.slane %v5548_v34, 3  ;;  %v5086_v6 = vpop.eup %3374  ;;  %3386 = vpow2.f32 %v4974_v5  ;;  %v2234_v48 = vsel %vm2148_vm9, %v2233_v13, %v2232_v27  ;;  %v2292_v41 = vadd.f32 %v2291_v17, %v2290_v9  ;;  %v5574_v27 = vld [vmem:[#allocation24_spill] sm:$0xff] }
 0x22c   : > { %5566 = vst [vmem:[#allocation13_spill] sm:$0xff] %v5086_v6  ;;  %v5568_v16 = vrot.slane %v5567_v62, 2  ;;  %v5093_v33 = vpop.eup %3376  ;;  %v2236_v56 = vsel %vm2151_vm10, %v2235_v57, %v2234_v48  ;;  %v2237_v63 = vrot.slane %v5086_v6, 7  ;;  %v2527_v34 = vrot.slane %v4930_v44, 1 }
 0x22d   : > { %v2524_v35 = vsel %vm2145_vm8, %v5565_v31, %v2522_v29  ;;  %5569 = vst [vmem:[#allocation10_spill] sm:$0xff] %v5093_v33  ;;  %v5570_v29 = vld [vmem:[#allocation28_spill] sm:$0xff]  ;;  %v5571_v31 = vld [vmem:[#allocation22_spill] sm:$0xff]  ;;  %v5102_v60 = vpop.eup %3378  ;;  %v2239_v9 = vrot.slane %v5093_v33, 6  ;;  %v2293_v13 = vrot.slane %v2292_v41, 1  ;;  %v2295_v17 = vrot.slane %v2236_v56, 4 }
 0x22e   : > { %v2526_v22 = vsel %vm2148_vm9, %v5568_v16, %v2524_v35  ;;  %v5572_v47 = vrot.slane %v5571_v31, 4  ;;  %5573 = vst [vmem:[#allocation17_spill] sm:$0xff] %v5102_v60  ;;  %v5575_v35 = vrot.slane %v5574_v27, 3  ;;  %v5108_v57 = vpop.eup %3380  ;;  %v2238_v44 = vsel %vm2133_vm4, %v2237_v63, %v5078_v30 }
 0x22f   : > { %v2241_v48 = vrot.slane %v5102_v60, 5  ;;  %v5114_v16 = vsel %vm2151_vm10, %v2527_v34, %v2526_v22  ;;  %v5119_v33 = vpop.eup %3382  ;;  %v2240_v27 = vsel %vm2136_vm5, %v2239_v9, %v2238_v44  ;;  %v2296_v6 = vadd.f32 %v2295_v17, %v2236_v56  ;;  %v5579_v34 = vld [vmem:[#allocation33_spill] sm:$0xff] }
 0x230   : > { %v2536_v5 = vsel %vm2142_vm7, %v5572_v47, %v5570_v29  ;;  %5576 = vst [vmem:[#allocation9_spill] sm:$0xff] %v5114_v16  ;;  %v5577_v47 = vld [vmem:[#allocation25_spill] sm:$0xff]  ;;  %v5123_v11 = vpop.eup %3384  ;;  %v2245_v60 = vrot.slane %v5119_v33, 3  ;;  %v2541_v22 = vrot.slane %v4933_v45, 1  ;;  %v5584_v45 = vld [vmem:[#allocation30_spill] sm:$0xff] }
 0x231   : > { %v2538_v62 = vsel %vm2145_vm8, %v5575_v35, %v2536_v5  ;;  %v5578_v29 = vrot.slane %v5577_v47, 2  ;;  %v2243_v5 = vrot.slane %v5108_v57, 4  ;;  %v2294_v35 = vadd.f32 %v2293_v13, %v2292_v41  ;;  %v5580_v47 = vld [vmem:[#allocation29_spill] sm:$0xff] }
 0x232   : > { %v2242_v63 = vsel %vm2139_vm6, %v2241_v48, %v2240_v27  ;;  %v5581_v16 = vrot.slane %v5580_v47, 5  ;;  %v2247_v41 = vrot.slane %v5123_v11, 2  ;;  %v2297_v56 = vrot.slane %v2296_v6, 2  ;;  %v5586_v47 = vld [vmem:[#allocation41_spill] sm:$0xff] }
 0x233   : > { %v2540_v31 = vsel %vm2148_vm9, %v5578_v29, %v2538_v62  ;;  %v5132_v29 = vpop.eup %3386  ;;  %v2244_v9 = vsel %vm2142_vm7, %v2243_v5, %v2242_v63  ;;  %3388 = vrcp.f32 %v2294_v35  ;;  %v5585_v48 = vrot.slane %v5584_v45, 4 }
 0x234   : > { %v2548_v62 = vsel %vm2139_vm6, %v5581_v16, %v5579_v34  ;;  %5582 = vst [vmem:[#allocation11_spill] sm:$0xff] %v5132_v29  ;;  %v2246_v13 = vsel %vm2145_vm8, %v2245_v60, %v2244_v9  ;;  %v2249_v17 = vrot.slane %v5132_v29, 1  ;;  %v5139_v44 = vsel %vm2151_vm10, %v2541_v22, %v2540_v31  ;;  %v5587_v60 = vld [vmem:[#allocation35_spill] sm:$0xff] }
 0x235   : > { %5583 = vst [vmem:[#allocation19_spill] sm:$0xff] %v5139_v44  ;;  %v2550_v27 = vsel %vm2142_vm7, %v5585_v48, %v2548_v62  ;;  %v2248_v16 = vsel %vm2148_vm9, %v2247_v41, %v2246_v13  ;;  %v2298_v34 = vadd.f32 %v2297_v56, %v2296_v6  ;;  %v2551_v5 = vrot.slane %v5005_v32, 3  ;;  %v5589_v6 = vld [vmem:[#allocation36_spill] sm:$0xff] }
 0x236   : > { %v2555_v63 = vrot.slane %v5013_v52, 1  ;;  %v2250_v35 = vsel %vm2151_vm10, %v2249_v17, %v2248_v16  ;;  %v5588_v9 = vrot.slane %v5587_v60, 5  ;;  %v2565_v31 = vrot.slane %v5020_v12, 3  ;;  %v5591_v52 = vld [vmem:[#allocation31_spill] sm:$0xff]  ;;  %v5594_v12 = vld [vmem:[#allocation8_spill] sm:$0xff] }
 0x237   : > { %v2567_v22 = vrot.slane %v5027_v4, 2  ;;  %v2299_v45 = vrot.slane %v2298_v34, 1  ;;  %v2301_v62 = vrot.slane %v2250_v35, 4  ;;  %v2552_v41 = vsel %vm2145_vm8, %v2551_v5, %v2550_v27 }
 0x238   : > { %v2562_v29 = vsel %vm2139_vm6, %v5588_v9, %v5586_v47  ;;  %v5590_v56 = vrot.slane %v5589_v6, 4  ;;  %v5592_v13 = vrot.slane %v5591_v52, 2  ;;  %v2569_v16 = vrot.slane %v5033_v1, 1  ;;  %v5593_v47 = vld [vmem:[#allocation15_spill] sm:$0xff] }
 0x239   : > { %v5595_v60 = vrot.slane %v5594_v12, 7  ;;  %v3389_v9 = vpop.eup %3388  ;;  %v2300_v44 = vadd.f32 %v2299_v45, %v2298_v34  ;;  %v2302_v27 = vadd.f32 %v2301_v62, %v2250_v35 }
 0x23a   : > { %v2564_v32 = vsel %vm2142_vm7, %v5590_v56, %v2562_v29  ;;  %v2554_v17 = vsel %vm2148_vm9, %v5592_v13, %v2552_v41  ;;  %v2320_v6 = vperm.slane %v3389_v9, 0  ;;  %v5598_v13 = vld [vmem:[#allocation43_spill] sm:$0xff] }
 0x23b   : > { %v2566_v48 = vsel %vm2145_vm8, %v2565_v31, %v2564_v32  ;;  %v2572_v4 = vsel %vm2133_vm4, %v5595_v60, %v5593_v47  ;;  %v5168_v5 = vsel %vm2151_vm10, %v2555_v63, %v2554_v17  ;;  %v5596_v31 = vld [vmem:[#allocation42_spill] sm:$0xff]  ;;  %v2577_v32 = vrot.slane %v5036_v23, 4 }
 0x23c   : > { %v2568_v29 = vsel %vm2148_vm9, %v2567_v22, %v2566_v48  ;;  %v5597_v56 = vrot.slane %v5596_v31, 6  ;;  %v2303_v52 = vrot.slane %v2302_v27, 2  ;;  %3390 = vrcp.f32 %v2300_v44 }
 0x23d   : > { %v5172_v41 = vsel %vm2151_vm10, %v2569_v16, %v2568_v29  ;;  %v5599_v34 = vrot.slane %v5598_v13, 5  ;;  %v2579_v63 = vrot.slane %v5043_v24, 3  ;;  %v2363_v22 = vmul.f32 %v4960_v10, %v2320_v6 }
 0x23e   : > { %v2574_v1 = vsel %vm2136_vm5, %v5597_v56, %v2572_v4  ;;  %v2364_v45 = vmul.f32 %v4962_v37, %v2320_v6  ;;  %v2365_v62 = vmul.f32 %v4966_v49, %v2320_v6  ;;  %v2366_v17 = vmul.f32 %v4984_v21, %v2320_v6 }
 0x23f   : > { %v2576_v35 = vsel %vm2139_vm6, %v5599_v34, %v2574_v1  ;;  %v2304_v48 = vadd.f32 %v2303_v52, %v2302_v27  ;;  %v2367_v16 = vmul.f32 %v4992_v40, %v2320_v6  ;;  %v2368_v23 = vmul.f32 %v4998_v53, %v2320_v6 }
 0x240   : > { %v2369_v44 = vmul.f32 %v5007_v2, %v2320_v6  ;;  %v2370_v47 = vmul.f32 %v5015_v8, %v2320_v6  ;;  %v2427_v12 = vmul.f32 %v2363_v22, %v4634_v19  ;;  %v2428_v24 = vmul.f32 %v2364_v45, %v4636_v43 }
 0x241   : > { %v2429_v10 = vmul.f32 %v2365_v62, %v4638_v14  ;;  %v2305_v37 = vrot.slane %v2304_v48, 1  ;;  %v2430_v49 = vmul.f32 %v2366_v17, %v4640_v26  ;;  %v2431_v21 = vmul.f32 %v2367_v16, %v4649_v36 }
 0x242   : > { %v2432_v60 = vmul.f32 %v2368_v23, %v4662_v3  ;;  %v5197_v40 = vmul.f32 %v2369_v44, %v4678_v61  ;;  %v5200_v53 = vmul.f32 %v2370_v47, %v4889_v20  ;;  %v2578_v2 = vsel %vm2142_vm7, %v2577_v32, %v2576_v35  ;;  %v3391_v43 = vpop.eup %3390  ;;  %v5600_v35 = vld [vmem:[#allocation44_spill] sm:$0xff] }
 0x243   : > { %v2581_v19 = vrot.slane %v5049_v39, 2  ;;  %v2306_v8 = vadd.f32 %v2305_v37, %v2304_v48  ;;  %v2580_v14 = vsel %vm2145_vm8, %v2579_v63, %v2578_v2  ;;  %v2583_v26 = vrot.slane %v5057_v42, 1  ;;  %v5601_v63 = vld [vmem:[#allocation50_spill] sm:$0xff] }
 0x244   : > { %v2585_v4 = vrot.slane %v2428_v24, 7  ;;  %v2321_v36 = vperm.slane %v3391_v43, 0  ;;  %v2587_v9 = vrot.slane %v2429_v10, 6  ;;  %v2589_v61 = vrot.slane %v2430_v49, 5  ;;  %v5602_v24 = vld [vmem:[#allocation13_spill] sm:$0xff]  ;;  %v5603_v37 = vld [vmem:[#allocation10_spill] sm:$0xff] }
 0x245   : > { %v2582_v3 = vsel %vm2148_vm9, %v2581_v19, %v2580_v14  ;;  %3392 = vrcp.f32 %v2306_v8  ;;  %v2591_v29 = vrot.slane %v2431_v21, 4  ;;  %v2593_v22 = vrot.slane %v2432_v60, 3  ;;  %v5604_v21 = vld [vmem:[#allocation17_spill] sm:$0xff]  ;;  %v5605_v19 = vld [vmem:[#allocation11_spill] sm:$0xff] }
 0x246   : > { %v5208_v20 = vsel %vm2151_vm10, %v2583_v26, %v2582_v3  ;;  %v2586_v27 = vsel %vm2133_vm4, %v2585_v4, %v2427_v12  ;;  %v2371_v39 = vmul.f32 %v5022_v0, %v2321_v36  ;;  %v2372_v6 = vmul.f32 %v5029_v54, %v2321_v36  ;;  %v5606_v8 = vld [vmem:[#allocation45_spill] sm:$0xff]  ;;  %v5607_v26 = vld [vmem:[#allocation47_spill] sm:$0xff]  ;;  %v5609_v3 = vld [vmem:[#allocation48_spill] sm:$0xff] }
 0x247   : > { %v2373_v31 = vmul.f32 %v5038_v25, %v2321_v36  ;;  %v2374_v42 = vmul.f32 %v5045_v7, %v2321_v36  ;;  %v2375_v56 = vmul.f32 %v5051_v38, %v2321_v36  ;;  %v2376_v1 = vmul.f32 %v5059_v18, %v2321_v36 }
 0x248   : > { %v2377_v32 = vmul.f32 %v5064_v28, %v2321_v36  ;;  %v2378_v52 = vmul.f32 %v5073_v58, %v2321_v36  ;;  %v2435_v13 = vmul.f32 %v2371_v39, %v4783_v59  ;;  %v2436_v34 = vmul.f32 %v2372_v6, %v4794_v55  ;;  %v5608_v36 = vld [vmem:[#allocation46_spill] sm:$0xff]  ;;  %v5612_v6 = vld [vmem:[#allocation52_spill] sm:$0xff] }
 0x249   : > { %v2437_v0 = vmul.f32 %v2373_v31, %v4780_v51  ;;  %v2438_v54 = vmul.f32 %v2374_v42, %v4786_v46  ;;  %v2439_v25 = vmul.f32 %v2375_v56, %v4800_v50  ;;  %v2440_v7 = vmul.f32 %v2376_v1, %v4892_v15  ;;  %v5613_v31 = vld [vmem:[#allocation53_spill] sm:$0xff] }
 0x24a   : > { %v2441_v38 = vmul.f32 %v2377_v32, %v5600_v35  ;;  %v2442_v18 = vmul.f32 %v2378_v52, %v5601_v63  ;;  %v2588_v28 = vsel %vm2136_vm5, %v2587_v9, %v2586_v27  ;;  %v2595_v58 = vrot.slane %v5197_v40, 2 }
 0x24b   : > { %v2597_v59 = vrot.slane %v5200_v53, 1  ;;  %v3393_v55 = vpop.eup %3392  ;;  %v2590_v51 = vsel %vm2139_vm6, %v2589_v61, %v2588_v28  ;;  %v2599_v45 = vrot.slane %v2436_v34, 7  ;;  %v2601_v46 = vrot.slane %v2437_v0, 6  ;;  %v5610_v61 = vld [vmem:[#allocation49_spill] sm:$0xff] }
 0x24c   : > { %v2603_v62 = vrot.slane %v2438_v54, 5  ;;  %v2322_v50 = vperm.slane %v3393_v55, 0  ;;  %v2592_v15 = vsel %vm2142_vm7, %v2591_v29, %v2590_v51  ;;  %v2605_v17 = vrot.slane %v2439_v25, 4  ;;  %v5611_v29 = vld [vmem:[#allocation51_spill] sm:$0xff] }
 0x24d   : > { %v2607_v48 = vrot.slane %v2440_v7, 3  ;;  %v2594_v16 = vsel %vm2145_vm8, %v2593_v22, %v2592_v15  ;;  %v2600_v23 = vsel %vm2133_vm4, %v2599_v45, %v2435_v13  ;;  %v2609_v44 = vrot.slane %v2441_v38, 2 }
 0x24e   : > { %v2611_v47 = vrot.slane %v2442_v18, 1  ;;  %v2379_v12 = vmul.f32 %v5078_v30, %v2322_v50  ;;  %v2380_v10 = vmul.f32 %v5602_v24, %v2322_v50  ;;  %v2381_v49 = vmul.f32 %v5603_v37, %v2322_v50  ;;  %v5614_v18 = vld [vmem:[#allocation9_spill] sm:$0xff] }
 0x24f   : > { %v2382_v60 = vmul.f32 %v5604_v21, %v2322_v50  ;;  %v2383_v40 = vmul.f32 %v5108_v57, %v2322_v50  ;;  %v2384_v53 = vmul.f32 %v5119_v33, %v2322_v50  ;;  %v2385_v2 = vmul.f32 %v5123_v11, %v2322_v50 }
 0x250   : > { %v2386_v43 = vmul.f32 %v5605_v19, %v2322_v50  ;;  %v2443_v14 = vmul.f32 %v2379_v12, %v5606_v8  ;;  %v2444_v4 = vmul.f32 %v2380_v10, %v5607_v26  ;;  %v2445_v30 = vmul.f32 %v2381_v49, %v5608_v36 }
 0x251   : > { %v2446_v9 = vmul.f32 %v2382_v60, %v5609_v3  ;;  %v2447_v27 = vmul.f32 %v2383_v40, %v5610_v61  ;;  %v2448_v39 = vmul.f32 %v2384_v53, %v5611_v29  ;;  %v2449_v57 = vmul.f32 %v2385_v2, %v5612_v6 }
 0x252   : > { %v2450_v33 = vmul.f32 %v2386_v43, %v5613_v31  ;;  %v2596_v11 = vsel %vm2148_vm9, %v2595_v58, %v2594_v16  ;;  %v2602_v42 = vsel %vm2136_vm5, %v2601_v46, %v2600_v23  ;;  %v2613_v56 = vrot.slane %v2444_v4, 7 }
 0x253   : > { %v2615_v1 = vrot.slane %v2445_v30, 6  ;;  %v2598_v32 = vsel %vm2151_vm10, %v2597_v59, %v2596_v11  ;;  %v2604_v52 = vsel %vm2139_vm6, %v2603_v62, %v2602_v42  ;;  %v2617_v13 = vrot.slane %v2446_v9, 5  ;;  %v5615_v59 = vld [vmem:[#allocation19_spill] sm:$0xff] }
 0x254   : > { %v2619_v34 = vrot.slane %v2447_v27, 4  ;;  %v2606_v0 = vsel %vm2142_vm7, %v2605_v17, %v2604_v52  ;;  %v2614_v54 = vsel %vm2133_vm4, %v2613_v56, %v2443_v14  ;;  %v2621_v25 = vrot.slane %v2448_v39, 3 }
 0x255   : > { %v2623_v7 = vrot.slane %v2449_v57, 2  ;;  %v2608_v35 = vsel %vm2145_vm8, %v2607_v48, %v2606_v0  ;;  %v2616_v38 = vsel %vm2136_vm5, %v2615_v1, %v2614_v54  ;;  %v2625_v63 = vrot.slane %v2450_v33, 1 }
 0x256   : > { %v2635_v28 = vrot.slane %v5614_v18, 4  ;;  %v2610_v22 = vsel %vm2148_vm9, %v2609_v44, %v2608_v35  ;;  %v2618_v58 = vsel %vm2139_vm6, %v2617_v13, %v2616_v38  ;;  %v2641_v55 = vrot.slane %v5615_v59, 4 }
 0x257   : > { %v2647_v51 = vrot.slane %v5168_v5, 4  ;;  %v2612_v45 = vsel %vm2151_vm10, %v2611_v47, %v2610_v22  ;;  %v2620_v46 = vsel %vm2142_vm7, %v2619_v34, %v2618_v58  ;;  %v2653_v50 = vrot.slane %v5172_v41, 4 }
 0x258   : > { %v2636_v62 = vadd.f32 %v2635_v28, %v5614_v18  ;;  %v2622_v15 = vsel %vm2145_vm8, %v2621_v25, %v2620_v46  ;;  %v2642_v17 = vadd.f32 %v2641_v55, %v5615_v59  ;;  %v2659_v16 = vrot.slane %v5208_v20, 4 }
 0x259   : > { %v2648_v48 = vadd.f32 %v2647_v51, %v5168_v5  ;;  %v2624_v23 = vsel %vm2148_vm9, %v2623_v7, %v2622_v15  ;;  %v2654_v12 = vadd.f32 %v2653_v50, %v5172_v41  ;;  %v2665_v47 = vrot.slane %v2598_v32, 4 }
 0x25a   : > { %v2637_v44 = vrot.slane %v2636_v62, 2  ;;  %v2626_v24 = vsel %vm2151_vm10, %v2625_v63, %v2624_v23  ;;  %v2643_v10 = vrot.slane %v2642_v17, 2  ;;  %v2660_v49 = vadd.f32 %v2659_v16, %v5208_v20  ;;  %v3020_v16 = vld [vmem:[%s5394_s9 + $0x78] sm:$0xff]  ;;  %v3019_v23 = vld [vmem:[%s5394_s9 + $0x70] sm:$0xff] }
 0x25b   : > { %v2649_v37 = vrot.slane %v2648_v48, 2  ;;  %v2655_v60 = vrot.slane %v2654_v12, 2  ;;  %v2666_v40 = vadd.f32 %v2665_v47, %v2598_v32  ;;  %v2671_v53 = vrot.slane %v2612_v45, 4  ;;  %3048 = vmatpush.msra.mxu0 %v3020_v16  ;;  %v3018_v47 = vld [vmem:[%s5394_s9 + $0x68] sm:$0xff] }
 0x25c   : > { %v2638_v21 = vadd.f32 %v2637_v44, %v2636_v62  ;;  %v2644_v2 = vadd.f32 %v2643_v10, %v2642_v17  ;;  %v2661_v19 = vrot.slane %v2660_v49, 2  ;;  %v2677_v43 = vrot.slane %v2626_v24, 4 }
 0x25d   : > { %v2650_v5 = vadd.f32 %v2649_v37, %v2648_v48  ;;  %v2656_v14 = vadd.f32 %v2655_v60, %v2654_v12  ;;  %v2667_v26 = vrot.slane %v2666_v40, 2  ;;  %v2672_v4 = vadd.f32 %v2671_v53, %v2612_v45  ;;  %v2747_v45 = vld [vmem:[%s5391_s6] sm:$0xf]  ;;  %3049 = vmatpush.msra.mxu0 %v3019_v23  ;;  %v3016_v53 = vld [vmem:[%s5394_s9 + $0x58] sm:$0xff] }
 0x25e   : > { %v2639_v8 = vrot.slane %v2638_v21, 1  ;;  %v2645_v41 = vrot.slane %v2644_v2, 1  ;;  %v2662_v30 = vadd.f32 %v2661_v19, %v2660_v49  ;;  %v2678_v3 = vadd.f32 %v2677_v43, %v2626_v24  ;;  %v3017_v37 = vld [vmem:[%s5394_s9 + $0x60] sm:$0xff]  ;;  %v3008_v23 = vld [vmem:[%s5394_s9 + $0x18] sm:$0xff] }
 0x25f   : > { %v2651_v36 = vrot.slane %v2650_v5, 1  ;;  %v2657_v9 = vrot.slane %v2656_v14, 1  ;;  %v2668_v61 = vadd.f32 %v2667_v26, %v2666_v40  ;;  %v2673_v27 = vrot.slane %v2672_v4, 2  ;;  %3050 = vmatpush.msra.mxu0 %v3018_v47 }
 0x260   : > { %v2646_v20 = vadd.f32 %v2645_v41, %v2644_v2  ;;  %v2663_v39 = vrot.slane %v2662_v30, 1  ;;  %v2679_v6 = vrot.slane %v2678_v3, 2  ;;  %v2640_v57 = vadd.f32 %v2639_v8, %v2638_v21  ;;  %v3015_v8 = vld [vmem:[%s5394_s9 + $0x50] sm:$0xff] }
 0x261   : > { %v2652_v29 = vadd.f32 %v2651_v36, %v2650_v5  ;;  %v2658_v31 = vadd.f32 %v2657_v9, %v2656_v14  ;;  %v2669_v33 = vrot.slane %v2668_v61, 1  ;;  %v2674_v11 = vadd.f32 %v2673_v27, %v2672_v4  ;;  %3051 = vmatpush.msra.mxu0 %v3017_v37  ;;  %v3014_v36 = vld [vmem:[%s5394_s9 + $0x48] sm:$0xff] }
 0x262   : > { %v2664_v42 = vadd.f32 %v2663_v39, %v2662_v30  ;;  %v2680_v56 = vadd.f32 %v2679_v6, %v2678_v3  ;;  %v2765_v1 = vrot.slane %v2646_v20, 7  ;;  %v2749_v46 = vperm.slane %v2747_v45, 0  ;;  %v5616_v30 = vld [vmem:[#allocation5_spill] sm:$0xff] }
 0x263   : > { %v2767_v32 = vrot.slane %v2652_v29, 6  ;;  %v2670_v52 = vadd.f32 %v2669_v33, %v2668_v61  ;;  %v2675_v13 = vrot.slane %v2674_v11, 1  ;;  %v2769_v34 = vrot.slane %v2658_v31, 5  ;;  %3052 = vmatpush.msra.mxu0 %v3016_v53  ;;  %v3013_v20 = vld [vmem:[%s5394_s9 + $0x40] sm:$0xff]  ;;  %v3012_v31 = vld [vmem:[%s5394_s9 + $0x38] sm:$0xff] }
 0x264   : > { %v2681_v0 = vrot.slane %v2680_v56, 1  ;;  %v2766_v54 = vsel %vm2133_vm4, %v2765_v1, %v2640_v57  ;;  %v2771_v25 = vrot.slane %v2664_v42, 4  ;;  %v2750_v62 = vperm.slane %v2747_v45, 1  ;;  %v5617_v1 = vld [vmem:[#allocation6_spill] sm:$0xff] }
 0x265   : > { %v2676_v7 = vadd.f32 %v2675_v13, %v2674_v11  ;;  %v2768_v35 = vsel %vm2136_vm5, %v2767_v32, %v2766_v54  ;;  %v2773_v38 = vrot.slane %v2670_v52, 3  ;;  %v2751_v44 = vperm.slane %v2747_v45, 2  ;;  %3053 = vmatpush.msra.mxu0 %v3015_v8  ;;  %v2920_v13 = vld [vmem:[%s5392_s7] sm:$0xf] }
 0x266   : > { %v2682_v63 = vadd.f32 %v2681_v0, %v2680_v56  ;;  %v2770_v18 = vsel %vm2139_vm6, %v2769_v34, %v2768_v35  ;;  %v2752_v12 = vperm.slane %v2747_v45, 3  ;;  %v3011_v34 = vld [vmem:[%s5394_s9 + $0x30] sm:$0xff] }
 0x267   : > { %v2772_v28 = vsel %vm2142_vm7, %v2771_v25, %v2770_v18  ;;  %v2775_v22 = vrot.slane %v2676_v7, 2  ;;  %3054 = vmatpush.msra.mxu0 %v3014_v36 }
 0x268   : > { %v2774_v58 = vsel %vm2145_vm8, %v2773_v38, %v2772_v28  ;;  %v2777_v59 = vrot.slane %v2682_v63, 1  ;;  %v3010_v63 = vld [vmem:[%s5394_s9 + $0x28] sm:$0xff] }
 0x269   : > { %v2776_v55 = vsel %vm2148_vm9, %v2775_v22, %v2774_v58  ;;  %3055 = vmatpush.msra.mxu0 %v3013_v20  ;;  %v3005_v20 = vld [vmem:[%s5394_s9] sm:$0xff] }
 0x26a   : > { %v2778_v51 = vsel %vm2151_vm10, %v2777_v59, %v2776_v55 }
 0x26b   : > { %2796 = vmatmul.f32.vlgmr.msrb.gmra.mxu0 %v2778_v51  ;;  %2816 = vmatmul.f32.vlgmr.msra.gmra.mxu1 %v2778_v51 }
 0x26c   : > { %2836 = vmatmul.f32.vlgmr.msrb.gmra.mxu2 %v2778_v51  ;;  %2856 = vmatmul.f32.vlgmr.msrb.gmra.mxu3 %v2778_v51  ;;  %v3009_v51 = vld [vmem:[%s5394_s9 + $0x20] sm:$0xff] }
 0x26d   : > { %3056 = vmatpush.msra.mxu0 %v3012_v31 }
 0x26f   : > { %3057 = vmatpush.msra.mxu0 %v3011_v34 }
 0x271   : > { %3058 = vmatpush.msra.mxu0 %v3010_v63  ;;  %v3248_v63 = vld [vmem:[%s5393_s8] ss:$0 sm:$0xff] }
 0x273   : > { %3059 = vmatpush.msra.mxu0 %v3009_v51 }
 0x275   : > { %3060 = vmatpush.msra.mxu0 %v3008_v23 }
 0x2e8   : > { %v2797_v50 = vpop.f32.mrf.mxu0  ;;  %v2817_v15 = vpop.f32.mrf.mxu1 }
 0x2e9   : > { %v2798_v17 = vadd.f32 %v2797_v50, %v2749_v46  ;;  %v2818_v48 = vadd.f32 %v2817_v15, %v2750_v62 }
 0x2eb   : > { %v2860_v24 = vmax.f32 %v2798_v17, 0.0  ;;  %v2861_v10 = vmax.f32 %v2818_v48, 0.0 }
 0x2ed   : > { %v2866_v2 = vrot.slane %v2860_v24, 4  ;;  %v2878_v5 = vrot.slane %v2861_v10, 4 }
 0x2ef   : > { %v2837_v49 = vpop.f32.mrf.mxu2  ;;  %v2857_v21 = vpop.f32.mrf.mxu3 }
 0x2f0   : > { %v2838_v60 = vadd.f32 %v2837_v49, %v2751_v44  ;;  %v2858_v40 = vadd.f32 %v2857_v21, %v2752_v12 }
 0x2f2   : > { %v2862_v19 = vmax.f32 %v2838_v60, 0.0  ;;  %v2863_v43 = vmax.f32 %v2858_v40, 0.0  ;;  %v3007_v60 = vld [vmem:[%s5394_s9 + $0x10] sm:$0xff] }
 0x2f3   : > { %3061 = vmatpush.msra.mxu0 %v3007_v60 }
 0x2f4   : > { %v2864_v14 = vrot.slane %v2862_v19, 4  ;;  %v2867_v26 = vsel %vm653_vm1, %v2862_v19, %v2866_v2  ;;  %v2876_v4 = vrot.slane %v2863_v43, 4  ;;  %v2879_v41 = vsel %vm653_vm1, %v2863_v43, %v2878_v5 }
 0x2f5   : > { %v2875_v3 = vperm.slane %v2867_v26, %v5616_v30  ;;  %v2887_v9 = vperm.slane %v2879_v41, %v5616_v30  ;;  %v3006_v26 = vld [vmem:[%s5394_s9 + $0x8] sm:$0xff] }
 0x2f6   : > { %v2865_v61 = vsel %vm653_vm1, %v2864_v14, %v2860_v24  ;;  %v2877_v27 = vsel %vm653_vm1, %v2876_v4, %v2861_v10  ;;  %3062 = vmatpush.msra.mxu0 %v3006_v26 }
 0x2f7   : > { %v2871_v29 = vperm.slane %v2865_v61, %v5616_v30  ;;  %v2902_v39 = vrot.slane %v2875_v3, 4  ;;  %v2883_v6 = vperm.slane %v2877_v27, %v5616_v30  ;;  %v2900_v57 = vrot.slane %v2887_v9, 4 }
 0x2f8   : > { %3063 = vmatpush.msra.mxu0 %v3005_v20  ;;  %v3249_v20 = vld [vmem:[%s5395_s10] ss:$0 sm:$0xff] }
 0x2f9   : > { %v2890_v33 = vrot.slane %v2871_v29, 4  ;;  %v2888_v11 = vrot.slane %v2883_v6, 4  ;;  %v2901_v42 = vsel %vm653_vm1, %v2900_v57, %v2875_v3  ;;  %v2903_v56 = vsel %vm653_vm1, %v2887_v9, %v2902_v39 }
 0x2fa   : > { %v2907_v32 = vperm.slane %v2901_v42, %v5617_v1  ;;  %v2911_v52 = vperm.slane %v2903_v56, %v5617_v1 }
 0x2fb   : > { %v2889_v0 = vsel %vm653_vm1, %v2888_v11, %v2871_v29  ;;  %v2891_v54 = vsel %vm653_vm1, %v2883_v6, %v2890_v33 }
 0x2fc   : > { %v2895_v25 = vperm.slane %v2889_v0, %v5617_v1  ;;  %v2899_v7 = vperm.slane %v2891_v54, %v5617_v1  ;;  %v2916_v35 = vrot.slane %v2907_v32, 4  ;;  %v2918_v38 = vrot.slane %v2911_v52, 4 }
 0x2fd   : > { %v2925_v18 = vmul.f32 %v2920_v13, %v2907_v32  ;;  %v2927_v28 = vmul.f32 %v2920_v13, %v2911_v52 }
 0x2fe   : > { %v2912_v22 = vrot.slane %v2895_v25, 4  ;;  %v2914_v58 = vrot.slane %v2899_v7, 4  ;;  %v2917_v59 = vsel %vm653_vm1, 0.0, %v2916_v35  ;;  %v2919_v55 = vsel %vm653_vm1, 0.0, %v2918_v38 }
 0x2ff   : > { %v2921_v45 = vmul.f32 %v2920_v13, %v2895_v25  ;;  %v2923_v46 = vmul.f32 %v2920_v13, %v2899_v7  ;;  %v2926_v62 = vmul.f32 %v2920_v13, %v2917_v59  ;;  %v2928_v50 = vmul.f32 %v2920_v13, %v2919_v55 }
 0x300   : > { %v2913_v15 = vsel %vm653_vm1, 0.0, %v2912_v22  ;;  %v2915_v17 = vsel %vm653_vm1, 0.0, %v2914_v58  ;;  %v2957_v48 = vsel %vm1166_vm2, %v2925_v18, 0.0  ;;  %v2971_v16 = vsel %vm1166_vm2, %v2927_v28, 0.0 }
 0x301   : > { %v2922_v44 = vmul.f32 %v2920_v13, %v2913_v15  ;;  %v2924_v12 = vmul.f32 %v2920_v13, %v2915_v17  ;;  %v2929_v47 = vsel %vm1166_vm2, %v2921_v45, 0.0  ;;  %v2943_v24 = vsel %vm1166_vm2, %v2923_v46, 0.0 }
 0x302   : > { %v2930_v10 = vrot.slane %v2929_v47, 4  ;;  %v2944_v37 = vrot.slane %v2943_v24, 4  ;;  %v2958_v49 = vrot.slane %v2957_v48, 4  ;;  %v2972_v21 = vrot.slane %v2971_v16, 4 }
 0x303   : > { %v2936_v40 = vsel %vm1166_vm2, %v2922_v44, 0.0  ;;  %v2950_v53 = vsel %vm1166_vm2, %v2924_v12, 0.0  ;;  %v2964_v2 = vsel %vm1166_vm2, %v2926_v62, 0.0  ;;  %v2978_v5 = vsel %vm1166_vm2, %v2928_v50, 0.0 }
 0x304   : > { %v2931_v19 = vadd.f32 %v2930_v10, %v2929_v47  ;;  %v2937_v43 = vrot.slane %v2936_v40, 4  ;;  %v2945_v8 = vadd.f32 %v2944_v37, %v2943_v24  ;;  %v2951_v14 = vrot.slane %v2950_v53, 4 }
 0x305   : > { %v2959_v4 = vadd.f32 %v2958_v49, %v2957_v48  ;;  %v2973_v41 = vadd.f32 %v2972_v21, %v2971_v16  ;;  %v2965_v36 = vrot.slane %v2964_v2, 4  ;;  %v2979_v30 = vrot.slane %v2978_v5, 4 }
 0x306   : > { %v2932_v3 = vrot.slane %v2931_v19, 2  ;;  %v2938_v9 = vadd.f32 %v2937_v43, %v2936_v40  ;;  %v2946_v61 = vrot.slane %v2945_v8, 2  ;;  %v2952_v27 = vadd.f32 %v2951_v14, %v2950_v53 }
 0x307   : > { %v2960_v29 = vrot.slane %v2959_v4, 2  ;;  %v2966_v39 = vadd.f32 %v2965_v36, %v2964_v2  ;;  %v2974_v6 = vrot.slane %v2973_v41, 2  ;;  %v2980_v57 = vadd.f32 %v2979_v30, %v2978_v5 }
 0x308   : > { %v2933_v31 = vadd.f32 %v2932_v3, %v2931_v19  ;;  %v2939_v33 = vrot.slane %v2938_v9, 2  ;;  %v2947_v11 = vadd.f32 %v2946_v61, %v2945_v8  ;;  %v2953_v42 = vrot.slane %v2952_v27, 2 }
 0x309   : > { %v2961_v56 = vadd.f32 %v2960_v29, %v2959_v4  ;;  %v2967_v1 = vrot.slane %v2966_v39, 2  ;;  %v2975_v32 = vadd.f32 %v2974_v6, %v2973_v41  ;;  %v2981_v52 = vrot.slane %v2980_v57, 2 }
 0x30a   : > { %v2934_v13 = vrot.slane %v2933_v31, 1  ;;  %v2940_v34 = vadd.f32 %v2939_v33, %v2938_v9  ;;  %v2948_v0 = vrot.slane %v2947_v11, 1  ;;  %v2954_v54 = vadd.f32 %v2953_v42, %v2952_v27 }
 0x30b   : > { %v2962_v25 = vrot.slane %v2961_v56, 1  ;;  %v2968_v7 = vadd.f32 %v2967_v1, %v2966_v39  ;;  %v2976_v35 = vrot.slane %v2975_v32, 1  ;;  %v2982_v38 = vadd.f32 %v2981_v52, %v2980_v57 }
 0x30c   : > { %v2935_v18 = vadd.f32 %v2934_v13, %v2933_v31  ;;  %v2941_v28 = vrot.slane %v2940_v34, 1  ;;  %v2949_v22 = vadd.f32 %v2948_v0, %v2947_v11  ;;  %v2955_v58 = vrot.slane %v2954_v54, 1 }
 0x30d   : > { %v2963_v59 = vadd.f32 %v2962_v25, %v2961_v56  ;;  %v2969_v55 = vrot.slane %v2968_v7, 1  ;;  %v2977_v51 = vadd.f32 %v2976_v35, %v2975_v32  ;;  %v2983_v45 = vrot.slane %v2982_v38, 1 }
 0x30e   : > { %v2942_v46 = vadd.f32 %v2941_v28, %v2940_v34  ;;  %v2956_v62 = vadd.f32 %v2955_v58, %v2954_v54  ;;  %v2991_v50 = vadd.f32 %v3248_v63, %v2949_v22  ;;  %v2989_v16 = vadd.f32 %v3248_v63, %v2935_v18 }
 0x30f   : > { %v2970_v15 = vadd.f32 %v2969_v55, %v2968_v7  ;;  %v2984_v17 = vadd.f32 %v2983_v45, %v2982_v38  ;;  %v2993_v48 = vadd.f32 %v3248_v63, %v2963_v59  ;;  %v2995_v47 = vadd.f32 %v3248_v63, %v2977_v51 }
 0x310   : > { %v2990_v23 = vadd.f32 %v3248_v63, %v2942_v46  ;;  %v2992_v44 = vadd.f32 %v3248_v63, %v2956_v62  ;;  %v2999_v24 = vmax.f32 %v2991_v50, 0.0  ;;  %v2997_v60 = vmax.f32 %v2989_v16, 0.0 }
 0x311   : > { %v2994_v12 = vadd.f32 %v3248_v63, %v2970_v15  ;;  %v2996_v10 = vadd.f32 %v3248_v63, %v2984_v17  ;;  %v3001_v21 = vmax.f32 %v2993_v48, 0.0  ;;  %v3003_v2 = vmax.f32 %v2995_v47, 0.0 }
 0x312   : > { %v2998_v37 = vmax.f32 %v2990_v23, 0.0  ;;  %v3000_v49 = vmax.f32 %v2992_v44, 0.0  ;;  %v3035_v5 = vrot.slane %v2999_v24, 6 }
 0x313   : > { %v3002_v40 = vmax.f32 %v2994_v12, 0.0  ;;  %v3004_v19 = vmax.f32 %v2996_v10, 0.0  ;;  %v3039_v26 = vrot.slane %v3001_v21, 4  ;;  %v3043_v30 = vrot.slane %v3003_v2, 2 }
 0x314   : > { %v3033_v53 = vrot.slane %v2998_v37, 7  ;;  %v3037_v8 = vrot.slane %v3000_v49, 5 }
 0x315   : > { %v3041_v41 = vrot.slane %v3002_v40, 3  ;;  %v3045_v9 = vrot.slane %v3004_v19, 1 }
 0x316   : > { %v3034_v43 = vsel %vm2133_vm4, %v3033_v53, %v2997_v60 }
 0x317   : > { %v3036_v14 = vsel %vm2136_vm5, %v3035_v5, %v3034_v43 }
 0x318   : > { %v3038_v4 = vsel %vm2139_vm6, %v3037_v8, %v3036_v14 }
 0x319   : > { %v3040_v36 = vsel %vm2142_vm7, %v3039_v26, %v3038_v4 }
 0x31a   : > { %v3042_v3 = vsel %vm2145_vm8, %v3041_v41, %v3040_v36 }
 0x31b   : > { %v3044_v61 = vsel %vm2148_vm9, %v3043_v30, %v3042_v3 }
 0x31c   : > { %v3046_v27 = vsel %vm2151_vm10, %v3045_v9, %v3044_v61 }
 0x31d   : > { %3064 = vmatmul.f32.vlgmr.msra.gmra.mxu0 %v3046_v27 }
 0x39a   : > { %v3065_v29 = vpop.f32.mrf.mxu0 }
 0x39b   : > { %v3066_v39 = vadd.f32 %v3249_v20, %v3065_v29 }
 0x39d   : > { %3068 = vst [vmem:[%s403_s18] sm:$0xff] %v3066_v39 }
 0x39e PF: > { %s22_s17 = sadd.s32 1, %s3438_s17  }
 0x39f   : > { %p19_p8 = scmp.ge.s32.totalorder %s22_s17, 4  }
 0x3a1   :  { %21 = sbr.rel (!%p19_p8) target bundleno = 1 (0x1), region = 99 }
 0x3a6   :  { %3088 = vsyncpa [#allocation3], 1 }
 0x3a7   :  { %3090 = vsyncpa [#allocation3 + $0x1], 1 }

</bundles_post_ra>
